<compile_context>
chip_gen: v7x
topology: tpu7x:2x2x1
jax: 0.10.0
libtpu: 0.0.40
codegen_flags: <defaults>
</compile_context>

<pallas_src>
import functools
import math

import jax
import jax.numpy as jnp
from jax.experimental import pallas as pl
from jax.experimental.pallas import tpu as pltpu


# ----------------------------------------------------------------------------
# Helpers / hardware-generation awareness
# ----------------------------------------------------------------------------
def _round_up(x, m):
    return ((x + m - 1) // m) * m


def _pick_tile(dim_padded, candidates=(512, 256, 128)):
    for c in candidates:
        if dim_padded % c == 0:
            return c
    return 128


def _device_kind():
    try:
        return jax.devices()[0].device_kind.lower()
    except Exception:  # pragma: no cover - CPU fallback
        return ""


# v6e / v7x have a 2x256x256 MXU: 128-wide N tiles half-fill it, so pad N to 256
# multiples there.  v5e (128x128 MXU) keeps 128 quanta.  K stays at 128 quanta to
# avoid inflating A-matrix HBM traffic; tk is still raised to 256 when K divides.
_WIDE_MXU = not any(g in _device_kind() for g in ("v2", "v3", "v4", "v5"))


def _pad_n(n):
    if _WIDE_MXU and n > 128:
        return _round_up(n, 256)
    return _round_up(n, 128)


# ----------------------------------------------------------------------------
# Pallas matmul kernel (fused bias / ReLU / residual+LayerNorm epilogue)
# ----------------------------------------------------------------------------
def _mm_kernel(*refs, activation, fuse_ln, multi_k, eps):
    """Tiled matmul, bf16 operands, f32 accumulation.

    refs = (a, b, bias[, residual, gamma, beta], out[, acc_scratch]).
    The accumulator scratch exists only when the K grid axis has >1 step.
    """
    if multi_k:
        acc_ref = refs[-1]
        refs = refs[:-1]
    if fuse_ln:
        a_ref, b_ref, bias_ref, res_ref, g_ref, beta_ref, o_ref = refs
    else:
        a_ref, b_ref, bias_ref, o_ref = refs

    def _epilogue(acc):
        r = acc + bias_ref[...]
        if fuse_ln:
            r = r + res_ref[...].astype(jnp.float32)
            mu = jnp.mean(r, axis=-1, keepdims=True)
            var = jnp.mean((r - mu) ** 2, axis=-1, keepdims=True)
            r = (r - mu) * jax.lax.rsqrt(var + eps) * g_ref[...] + beta_ref[...]
        elif activation == "relu":
            r = jnp.maximum(r, 0.0)
        o_ref[...] = r.astype(o_ref.dtype)

    if multi_k:
        k = pl.program_id(2)

        @pl.when(k == 0)
        def _():
            acc_ref[...] = jnp.zeros_like(acc_ref)

        acc_ref[...] += jnp.dot(a_ref[...], b_ref[...],
                                preferred_element_type=jnp.float32)

        @pl.when(k == pl.num_programs(2) - 1)
        def _():
            _epilogue(acc_ref[...])
    else:
        # Single K step: no zero-fill / scratch round trip.
        _epilogue(jnp.dot(a_ref[...], b_ref[...],
                          preferred_element_type=jnp.float32))


def _pallas_matmul(a, wp, bp, *, activation=None, out_dtype=jnp.bfloat16,
                   ln_g=None, ln_b=None, residual=None, eps=1e-5):
    """a:[Mp,Kp] bf16, wp:[Kp,Np] bf16, bp:[1,Np] f32 (all pre-padded)."""
    Mp, Kp = a.shape
    Np = wp.shape[1]
    fuse_ln = ln_g is not None

    tn = Np if fuse_ln else _pick_tile(Np)   # LN needs the whole row in one tile
    tk = _pick_tile(Kp)
    tm = _pick_tile(Mp)
    # >= 4 parallel (i, j) grid steps where possible: keeps both v7x TensorCores
    # busy and restores input/output double-buffering (avoid a 1-step grid).
    while (Mp // tm) * (Np // tn) < 4 and tm > 128:
        tm //= 2
    nk = Kp // tk
    multi_k = nk > 1

    in_specs = [pl.BlockSpec((tm, tk), lambda i, j, k: (i, k)),
                pl.BlockSpec((tk, tn), lambda i, j, k: (k, j)),
                pl.BlockSpec((1, tn), lambda i, j, k: (0, j))]
    operands = [a, wp, bp]
    if fuse_ln:
        in_specs += [pl.BlockSpec((tm, tn), lambda i, j, k: (i, j)),
                     pl.BlockSpec((1, tn), lambda i, j, k: (0, j)),
                     pl.BlockSpec((1, tn), lambda i, j, k: (0, j))]
        operands += [residual,
                     ln_g.reshape(1, -1).astype(jnp.float32),
                     ln_b.reshape(1, -1).astype(jnp.float32)]

    return pl.pallas_call(
        functools.partial(_mm_kernel, activation=activation, fuse_ln=fuse_ln,
                          multi_k=multi_k, eps=eps),
        out_shape=jax.ShapeDtypeStruct((Mp, Np), out_dtype),
        grid_spec=pltpu.PrefetchScalarGridSpec(
            num_scalar_prefetch=0,
            grid=(Mp // tm, Np // tn, nk),
            in_specs=in_specs,
            out_specs=pl.BlockSpec((tm, tn), lambda i, j, k: (i, j)),
            scratch_shapes=([pltpu.VMEM((tm, tn), jnp.float32)] if multi_k else []),
        ),
        compiler_params=pltpu.CompilerParams(
            dimension_semantics=("parallel", "parallel", "arbitrary")),
    )(*operands)


def linear(x, pw, activation=None, ln=None, residual=None,
           out_dtype=jnp.bfloat16, eps=1e-5):
    """y = act(x @ w + b), optionally fused with LayerNorm(y + residual).

    `pw` is a prepared weight dict: raw f32 ("w","b") for the tiny-M XLA path and
    pre-padded bf16/f32 copies ("wp","bp") for the Pallas path (built once in
    make_params, so no per-call weight cast/pad passes).
    """
    M, K = x.shape
    N = pw["w"].shape[1]

    if M < 128:
        # Decoder-query / head matmuls: padding + launch overhead > useful work.
        y = jnp.dot(x.astype(jnp.float32), pw["w"],
                    preferred_element_type=jnp.float32) + pw["b"]
        if ln is not None:
            h = y + residual.astype(jnp.float32)
            mu = jnp.mean(h, axis=-1, keepdims=True)
            var = jnp.mean((h - mu) ** 2, axis=-1, keepdims=True)
            return (h - mu) * jax.lax.rsqrt(var + eps) * ln["g"] + ln["b"]
        if activation == "relu":
            y = jnp.maximum(y, 0.0)
        return y

    Kp, Np = pw["wp"].shape
    Mp = _round_up(M, 128)
    a = x.astype(jnp.bfloat16)
    if Mp > M or Kp > K:
        a = jnp.pad(a, ((0, Mp - M), (0, Kp - K)))

    fuse_ln = ln is not None and Np == N
    res_p = None
    if fuse_ln:
        res_p = residual.astype(jnp.bfloat16)
        if Mp > M:
            res_p = jnp.pad(res_p, ((0, Mp - M), (0, 0)))

    out = _pallas_matmul(
        a, pw["wp"], pw["bp"], activation=activation, out_dtype=out_dtype,
        ln_g=ln["g"] if fuse_ln else None,
        ln_b=ln["b"] if fuse_ln else None,
        residual=res_p, eps=eps)

    if Mp > M or Np > N:
        out = out[:M, :N]
    if ln is not None and not fuse_ln:
        # Fallback when N was padded (LN needs the unpadded row): plain XLA LN.
        h = out.astype(jnp.float32) + residual.astype(jnp.float32)
        mu = jnp.mean(h, axis=-1, keepdims=True)
        var = jnp.mean((h - mu) ** 2, axis=-1, keepdims=True)
        out = ((h - mu) * jax.lax.rsqrt(var + eps) * ln["g"] + ln["b"]).astype(out_dtype)
    return out


# ----------------------------------------------------------------------------
# Pallas attention kernel (per batch / head / q-tile, heads on a leading axis)
# ----------------------------------------------------------------------------
def _attn_kernel(q_ref, k_ref, v_ref, o_ref, *, scale):
    q = q_ref[0, 0]                                   # [tq, dh] bf16
    k = k_ref[0, 0]                                   # [Sk, dh] bf16
    v = v_ref[0, 0]                                   # [Sk, dh] bf16
    s = jax.lax.dot_general(q, k, (((1,), (1,)), ((), ())),
                            preferred_element_type=jnp.float32) * scale   # [tq, Sk]
    m = jnp.max(s, axis=-1, keepdims=True)
    p = jnp.exp(s - m)
    l = jnp.sum(p, axis=-1, keepdims=True)
    o = jnp.dot(p.astype(v.dtype), v, preferred_element_type=jnp.float32)  # [tq, dh]
    o_ref[0, 0] = (o * pl.reciprocal(l, approx=True)).astype(o_ref.dtype)


def attention(q, k, v, nhead):
    """softmax(QK^T/sqrt(dh)) V.  q:[B,Sq,D] k,v:[B,Sk,D]."""
    B, Sq, D = q.shape
    Sk = k.shape[1]
    dh = D // nhead
    scale = 1.0 / math.sqrt(dh)

    if Sq < 128 or Sq % 128 != 0 or Sk % 8 != 0 or D % nhead != 0:
        # Tiny decoder queries (Sq = n_splines): plain XLA attention.
        qh = q.reshape(B, Sq, nhead, dh).transpose(0, 2, 1, 3).astype(jnp.float32)
        kh = k.reshape(B, Sk, nhead, dh).transpose(0, 2, 1, 3).astype(jnp.float32)
        vh = v.reshape(B, Sk, nhead, dh).transpose(0, 2, 1, 3).astype(jnp.float32)
        s = jnp.einsum('bhqd,bhkd->bhqk', qh, kh) * scale
        p = jax.nn.softmax(s, axis=-1)
        o = jnp.einsum('bhqk,bhkd->bhqd', p, vh)
        return o.transpose(0, 2, 1, 3).reshape(B, Sq, D)

    # Heads moved to a leading axis outside the kernel so it never lane-slices
    # 16-wide head chunks nor concatenates across lanes; grid over (B, head, q-tile)
    # gives 4x+ the grid steps of the old (B,)-grid and halves the score tile.
    tq = 128
    qh = q.reshape(B, Sq, nhead, dh).transpose(0, 2, 1, 3).astype(jnp.bfloat16)
    kh = k.reshape(B, Sk, nhead, dh).transpose(0, 2, 1, 3).astype(jnp.bfloat16)
    vh = v.reshape(B, Sk, nhead, dh).transpose(0, 2, 1, 3).astype(jnp.bfloat16)
    out = pl.pallas_call(
        functools.partial(_attn_kernel, scale=scale),
        out_shape=jax.ShapeDtypeStruct((B, nhead, Sq, dh), jnp.bfloat16),
        grid=(B, nhead, Sq // tq),
        in_specs=[
            pl.BlockSpec((1, 1, tq, dh), lambda b, h, i: (b, h, i, 0)),
            pl.BlockSpec((1, 1, Sk, dh), lambda b, h, i: (b, h, 0, 0)),  # resident over i
            pl.BlockSpec((1, 1, Sk, dh), lambda b, h, i: (b, h, 0, 0)),  # resident over i
        ],
        out_specs=pl.BlockSpec((1, 1, tq, dh), lambda b, h, i: (b, h, i, 0)),
        compiler_params=pltpu.CompilerParams(
            dimension_semantics=("parallel", "parallel", "parallel")),
    )(qh, kh, vh)
    return out.transpose(0, 2, 1, 3).reshape(B, Sq, D)


# ----------------------------------------------------------------------------
# Model building blocks (glue around the Pallas kernels)
# ----------------------------------------------------------------------------
def _im2col_nhwc(x, stride):
    """x: [B, H, W, C] -> patches [B*Ho*Wo, C*9] for a 3x3 conv, pad=1."""
    B, H, W, C = x.shape
    Ho = (H + 2 - 3) // stride + 1
    Wo = (W + 2 - 3) // stride + 1
    xp = jnp.pad(x, ((0, 0), (1, 1), (1, 1), (0, 0)))
    cols = []
    for dh in range(3):
        for dw in range(3):
            cols.append(xp[:,
                           dh:dh + stride * (Ho - 1) + 1:stride,
                           dw:dw + stride * (Wo - 1) + 1:stride, :])
    patches = jnp.stack(cols, axis=-1)                      # [B, Ho, Wo, C, 9]
    return patches.reshape(B * Ho * Wo, C * 9), Ho, Wo


def conv2d_nhwc(x, cp, stride, relu):
    """3x3 conv, pad=1, NHWC in/out.

    Wide-channel convs -> im2col + Pallas matmul.  Narrow-channel convs (conv1/conv2)
    -> XLA conv: a Pallas matmul there would pad K/N 4-8x and emit lane-sparse stores.
    """
    B = x.shape[0]
    if "mat" not in cp:
        y = jax.lax.conv_general_dilated(
            x, cp["w4"].astype(x.dtype), window_strides=(stride, stride),
            padding=((1, 1), (1, 1)),
            dimension_numbers=("NHWC", "HWIO", "NHWC"),
            preferred_element_type=jnp.float32)
        y = y + cp["b"]
        if relu:
            y = jnp.maximum(y, 0.0)
        return y.astype(jnp.bfloat16)
    patches, Ho, Wo = _im2col_nhwc(x, stride)
    out = linear(patches, cp["mat"], activation="relu" if relu else None)
    return out.reshape(B, Ho, Wo, -1)


def mha_fwd(q_in, k_in, v_in, p, nhead, self_attn, ln=None, residual=None):
    B, Sq, D = q_in.shape
    Sk = k_in.shape[1]
    if self_attn:
        # Fused QKV projection (weights pre-concatenated at param-build time).
        qkv = linear(q_in.reshape(-1, D), p["qkv"]).reshape(B, Sq, 3 * D)
        q, k, v = qkv[..., :D], qkv[..., D:2 * D], qkv[..., 2 * D:]
    else:
        q = linear(q_in.reshape(-1, D), p["q"]).reshape(B, Sq, D)
        kv = linear(k_in.reshape(-1, D), p["kv"]).reshape(B, Sk, 2 * D)
        k, v = kv[..., :D], kv[..., D:]
    o = attention(q, k, v, nhead).reshape(-1, D)
    res = residual.reshape(-1, D) if residual is not None else None
    # Residual + LayerNorm fused into the out-projection epilogue (big-M path).
    return linear(o, p["o"], ln=ln, residual=res).reshape(B, Sq, D)


def encoder_layer_fwd(x, p, nhead):
    B, S, D = x.shape
    x = mha_fwd(x, x, x, p["attn"], nhead, self_attn=True,
                ln=p["ln1"], residual=x)
    h = linear(x.reshape(-1, D), p["lin1"], activation="relu")
    out = linear(h, p["lin2"], ln=p["ln2"], residual=x.reshape(-1, D))
    return out.reshape(B, S, D)


def decoder_layer_fwd(x, mem, p, nhead):
    B, S, D = x.shape
    x = mha_fwd(x, x, x, p["self_attn"], nhead, self_attn=True,
                ln=p["ln1"], residual=x)
    x = mha_fwd(x, mem, mem, p["cross_attn"], nhead, self_attn=False,
                ln=p["ln2"], residual=x)
    h = linear(x.reshape(-1, D), p["lin1"], activation="relu")
    out = linear(h, p["lin2"], ln=p["ln3"], residual=x.reshape(-1, D))
    return out.reshape(B, S, D)


def sine_positional_encoding(H, W, feat_dim, temperature=10000.0):
    """DETR-style sine positional encoding -> [H, W, 2*feat_dim] (NHWC layout)."""
    eps, scale = 1e-6, 2.0 * math.pi
    y = jnp.broadcast_to(jnp.arange(1, H + 1, dtype=jnp.float32)[:, None], (H, W))
    x = jnp.broadcast_to(jnp.arange(1, W + 1, dtype=jnp.float32)[None, :], (H, W))
    y = y / (H + eps) * scale
    x = x / (W + eps) * scale
    dim_t = temperature ** (2.0 * (jnp.arange(feat_dim) // 2) / feat_dim)
    px = x[..., None] / dim_t
    py = y[..., None] / dim_t
    px = jnp.stack([jnp.sin(px[..., 0::2]), jnp.cos(px[..., 1::2])], -1).reshape(H, W, feat_dim)
    py = jnp.stack([jnp.sin(py[..., 0::2]), jnp.cos(py[..., 1::2])], -1).reshape(H, W, feat_dim)
    return jnp.concatenate([py, px], axis=-1)


def bernstein_basis(n_eval, n_cp):
    """Clamped cubic B-spline (4 ctrl pts, degree 3) == Bernstein basis."""
    assert n_cp == 4
    u = jnp.linspace(1e-5, 1.0 - 1e-5, n_eval)
    c = [1.0, 3.0, 3.0, 1.0]
    return jnp.stack([c[i] * u ** i * (1.0 - u) ** (3 - i) for i in range(4)], axis=1)


def forward(params, x, *, nhead, n_splines, n_cp, n_eval):
    # --- CNN backbone (stride 8, channel-matched stand-in for resnet18), NHWC bf16 ---
    h = x.transpose(0, 2, 3, 1).astype(jnp.bfloat16)                     # NCHW -> NHWC once
    h = conv2d_nhwc(h, params["conv1"], 2, True)
    h = conv2d_nhwc(h, params["conv2"], 2, True)
    h = conv2d_nhwc(h, params["conv3"], 2, True)                         # [B,16,16,D] bf16
    B, H, W, D = h.shape

    # --- positional encoding + flatten(2,-1).transpose(1,2) (free reshape in NHWC) ---
    pos = sine_positional_encoding(H, W, D // 2).astype(jnp.bfloat16)    # [H, W, D]
    seq = (h + pos[None]).reshape(B, H * W, D)                           # [B, S, D] bf16

    # --- transformer encoder (Pallas: fused QKV / attention / out-proj+LN / FFN+LN) ---
    mem = seq
    for lp in params["enc"]:
        mem = encoder_layer_fwd(mem, lp, nhead)

    # --- query embedding + transformer decoder (tiny: XLA small paths, KV proj Pallas) ---
    tgt = jnp.broadcast_to(params["query_embed"][None], (B, n_splines, D)).astype(jnp.float32)
    dec = tgt
    for lp in params["dec"]:
        dec = decoder_layer_fwd(dec, mem, lp, nhead)

    # --- heads (B*n_splines rows -> plain XLA via linear() dispatcher) ---
    flat = dec.reshape(B * n_splines, D)
    f = linear(flat, params["feat1"], activation="relu")
    f = linear(f, params["feat2"], activation="relu")
    cp_flat = linear(f, params["feat3"])                                  # [B*ns, 2*n_cp]
    p = linear(flat, params["prob1"], activation="relu")
    spline_logits = linear(p, params["prob2"]).reshape(B, n_splines, 2)
    control_points = cp_flat.reshape(B, n_splines, n_cp, 2)

    # --- rational curve evaluation (weights == 1); trivially small -> plain XLA ---
    w = jnp.ones((n_splines, n_cp, 1), jnp.float32)
    cpw = control_points * w[None]
    wb = jnp.broadcast_to(w[None], (B, n_splines, n_cp, 1))
    cp_h = jnp.concatenate([cpw, wb], axis=-1)                            # [B, ns, ncp, 3]
    basis = bernstein_basis(n_eval, n_cp)                                 # [n_eval, ncp]
    rhs = cp_h.transpose(2, 0, 1, 3).reshape(n_cp, B * n_splines * 3)
    res = jnp.dot(basis, rhs).reshape(n_eval, B, n_splines, 3).transpose(1, 2, 0, 3)
    curves = res[..., :2] / res[..., 2:3]                                 # [B, ns, n_eval, 2]

    return curves, control_points, spline_logits


# ----------------------------------------------------------------------------
# Deterministic parameter construction (weight prep hoisted here, outside jit)
# ----------------------------------------------------------------------------
class KeyGen:
    def __init__(self, key):
        self.key = key

    def __call__(self):
        self.key, k = jax.random.split(self.key)
        return k


def _prep_dense(w, b):
    """Hoisted weight prep: bf16 cast + MXU-quantum padding done once, not per call."""
    K, N = w.shape
    Kp = _round_up(K, 128)
    Np = _pad_n(N)
    wp = w.astype(jnp.bfloat16)
    if Kp > K or Np > N:
        wp = jnp.pad(wp, ((0, Kp - K), (0, Np - N)))
    bp = b.astype(jnp.float32).reshape(1, -1)
    if Np > N:
        bp = jnp.pad(bp, ((0, 0), (0, Np - N)))
    return {"w": w.astype(jnp.float32), "b": b.astype(jnp.float32), "wp": wp, "bp": bp}


def _dense_param(kg, fin, fout):
    w = jax.random.normal(kg(), (fin, fout), jnp.float32) / math.sqrt(fin)
    b = jnp.zeros((fout,), jnp.float32)
    return _prep_dense(w, b)


def _ln_param(d):
    return {"g": jnp.ones((d,), jnp.float32), "b": jnp.zeros((d,), jnp.float32)}


def _mha_param(kg, d):
    def dense(fin, fout):
        return (jax.random.normal(kg(), (fin, fout), jnp.float32) / math.sqrt(fin),
                jnp.zeros((fout,), jnp.float32))
    raw = {n: dense(d, d) for n in ("q", "k", "v", "o")}
    p = {n: _prep_dense(w, b) for n, (w, b) in raw.items()}
    # Pre-concatenated fused projections (hoisted out of the per-call path).
    p["qkv"] = _prep_dense(
        jnp.concatenate([raw["q"][0], raw["k"][0], raw["v"][0]], axis=1),
        jnp.concatenate([raw["q"][1], raw["k"][1], raw["v"][1]]))
    p["kv"] = _prep_dense(
        jnp.concatenate([raw["k"][0], raw["v"][0]], axis=1),
        jnp.concatenate([raw["k"][1], raw["v"][1]]))
    return p


def _conv_param(kg, cin, cout):
    w4 = jax.random.normal(kg(), (3, 3, cin, cout), jnp.float32) / math.sqrt(cin * 9)
    b = jnp.zeros((cout,), jnp.float32)
    p = {"w4": w4, "b": b}
    if cout >= 128 and cin * 9 >= 128:
        # im2col weight layout (channel-major, tap-minor), prepared for the Pallas matmul.
        mat = w4.transpose(2, 0, 1, 3).reshape(cin * 9, cout)
        p["mat"] = _prep_dense(mat, b)
    return p


def make_params(key, channels, n_enc, n_dec, dff, n_cp, n_splines):
    kg = KeyGen(key)
    d = channels[-1]
    params = {
        "conv1": _conv_param(kg, channels[0], channels[1]),
        "conv2": _conv_param(kg, channels[1], channels[2]),
        "conv3": _conv_param(kg, channels[2], channels[3]),
        "enc": [{"attn": _mha_param(kg, d), "ln1": _ln_param(d),
                 "lin1": _dense_param(kg, d, dff), "lin2": _dense_param(kg, dff, d),
                 "ln2": _ln_param(d)} for _ in range(n_enc)],
        "dec": [{"self_attn": _mha_param(kg, d), "ln1": _ln_param(d),
                 "cross_attn": _mha_param(kg, d), "ln2": _ln_param(d),
                 "lin1": _dense_param(kg, d, dff), "lin2": _dense_param(kg, dff, d),
                 "ln3": _ln_param(d)} for _ in range(n_dec)],
        "query_embed": jax.random.normal(kg(), (n_splines, d), jnp.float32),
        "feat1": _dense_param(kg, d, d),
        "feat2": _dense_param(kg, d, d),
        "feat3": _dense_param(kg, d, n_cp * 2),
        "prob1": _dense_param(kg, d, d),
        "prob2": _dense_param(kg, d, 2),
    }
    return params


# ----------------------------------------------------------------------------
if __name__ == "__main__":
    # Small but structure-consistent configuration (16x16 feature map -> seq 256).
    channels = [3, 16, 32, 128]
    nhead = 8
    n_enc, n_dec = 2, 2
    dff = 256
    n_cp, n_splines, n_eval = 4, 1, 100
    batch = 2

    key = jax.random.PRNGKey(0)
    pkey, xkey = jax.random.split(key)
    params = make_params(pkey, channels, n_enc, n_dec, dff, n_cp, n_splines)
    x = jax.random.normal(xkey, (batch, 3, 128, 128), jnp.float32)

    fwd = jax.jit(functools.partial(forward, nhead=nhead, n_splines=n_splines,
                                    n_cp=n_cp, n_eval=n_eval))
    out, cps, logits = fwd(params, x)
    jax.block_until_ready((out, cps, logits))

    assert out.shape == (batch, n_splines, n_eval, 2)
    assert cps.shape == (batch, n_splines, n_cp, 2)
    assert logits.shape == (batch, n_splines, 2)
    print("KERNEL_OK")
</pallas_src>

<mosaic_0001>
module attributes {stable_mosaic.version = 11 : i64} {
  func.func @_mm_kernel(%arg0: i32, %arg1: i32, %arg2: i32, %arg3: memref<128x128xbf16, #tpu.memory_space<vmem>>, %arg4: memref<128x128xbf16, #tpu.memory_space<vmem>>, %arg5: memref<1x128xf32, #tpu.memory_space<vmem>>, %arg6: memref<128x128xbf16, #tpu.memory_space<vmem>>, %arg7: memref<128x128xf32, #tpu.memory_space<vmem>>) attributes {dimension_semantics = [#tpu.dimension_semantics<parallel>, #tpu.dimension_semantics<parallel>, #tpu.dimension_semantics<arbitrary>], iteration_bounds = array<i64: 4, 1, 3>, scalar_prefetch = 0 : i64, scratch_operands = 1 : i64, tpu.core_type = #tpu.core_type<tc>, window_params = [{transform_indices = @transform_0, window_bounds = array<i64: 128, 128>}, {transform_indices = @transform_1, window_bounds = array<i64: 128, 128>}, {transform_indices = @transform_2, window_bounds = array<i64: 1, 128>}, {transform_indices = @transform_3, window_bounds = array<i64: 128, 128>}]} {
    %c0_i32 = arith.constant 0 : i32
    %0 = arith.cmpi eq, %arg2, %c0_i32 : i32
    %1 = arith.extui %0 : i1 to i32
    %c0_i32_0 = arith.constant 0 : i32
    %2 = arith.cmpi ne, %1, %c0_i32_0 : i32
    scf.if %2 {
      %cst_9 = arith.constant 0.000000e+00 : f32
      %12 = vector.broadcast %cst_9 : f32 to vector<128x128xf32>
      %c0_10 = arith.constant 0 : index
      %c0_11 = arith.constant 0 : index
      %13 = vector.load %arg7[%c0_10, %c0_11] : memref<128x128xf32, #tpu.memory_space<vmem>>, vector<128x128xf32>
      tpu.vector_store %arg7[%c0_10, %c0_11], %12 {strides = array<i32>} : memref<128x128xf32, #tpu.memory_space<vmem>>, vector<128x128xf32>,
    } else {
    }
    %c0 = arith.constant 0 : index
    %c0_1 = arith.constant 0 : index
    %3 = vector.load %arg7[%c0, %c0_1] : memref<128x128xf32, #tpu.memory_space<vmem>>, vector<128x128xf32>
    %c0_2 = arith.constant 0 : index
    %c0_3 = arith.constant 0 : index
    %4 = vector.load %arg3[%c0_2, %c0_3] : memref<128x128xbf16, #tpu.memory_space<vmem>>, vector<128x128xbf16>
    %c0_4 = arith.constant 0 : index
    %c0_5 = arith.constant 0 : index
    %5 = vector.load %arg4[%c0_4, %c0_5] : memref<128x128xbf16, #tpu.memory_space<vmem>>, vector<128x128xbf16>
    %cst = arith.constant dense<0.000000e+00> : vector<128x128xf32>
    %6 = tpu.matmul %4, %5, %cst {dimension_numbers = #tpu.dot_dimension_numbers<[1], [0], [0], [1], [0, 0, 1, 1], [], []>} : vector<128x128xbf16>, vector<128x128xbf16>, vector<128x128xf32> -> vector<128x128xf32>
    %7 = arith.addf %3, %6 : vector<128x128xf32>
    %c0_6 = arith.constant 0 : index
    %c0_7 = arith.constant 0 : index
    %8 = vector.load %arg7[%c0_6, %c0_7] : memref<128x128xf32, #tpu.memory_space<vmem>>, vector<128x128xf32>
    tpu.vector_store %arg7[%c0_6, %c0_7], %7 {strides = array<i32>} : memref<128x128xf32, #tpu.memory_space<vmem>>, vector<128x128xf32>,
    %c2_i32 = arith.constant 2 : i32
    %9 = arith.cmpi eq, %arg2, %c2_i32 : i32
    %10 = arith.extui %9 : i1 to i32
    %c0_i32_8 = arith.constant 0 : i32
    %11 = arith.cmpi ne, %10, %c0_i32_8 : i32
    scf.if %11 {
      %c0_9 = arith.constant 0 : index
      %c0_10 = arith.constant 0 : index
      %12 = vector.load %arg7[%c0_9, %c0_10] : memref<128x128xf32, #tpu.memory_space<vmem>>, vector<128x128xf32>
      %c0_11 = arith.constant 0 : index
      %c0_12 = arith.constant 0 : index
      %13 = vector.load %arg5[%c0_11, %c0_12] : memref<1x128xf32, #tpu.memory_space<vmem>>, vector<1x128xf32>
      %14 = vector.broadcast %13 : vector<1x128xf32> to vector<128x128xf32>
      %15 = arith.addf %12, %14 : vector<128x128xf32>
      %cst_13 = arith.constant 0.000000e+00 : f32
      %16 = vector.broadcast %cst_13 : f32 to vector<128x128xf32>
      %17 = arith.maximumf %15, %16 : vector<128x128xf32>
      %18 = arith.truncf %17 : vector<128x128xf32> to vector<128x128xbf16>
      %c0_14 = arith.constant 0 : index
      %c0_15 = arith.constant 0 : index
      %19 = vector.load %arg6[%c0_14, %c0_15] : memref<128x128xbf16, #tpu.memory_space<vmem>>, vector<128x128xbf16>
      tpu.vector_store %arg6[%c0_14, %c0_15], %18 {strides = array<i32>} : memref<128x128xbf16, #tpu.memory_space<vmem>>, vector<128x128xbf16>,
    } else {
    }
    return
  }
  func.func @transform_0(%arg0: i32, %arg1: i32, %arg2: i32) -> (i32, i32) {
    %c0_i32 = arith.constant 0 : i32
    return %arg0, %arg2 : i32, i32
  }
  func.func @transform_1(%arg0: i32, %arg1: i32, %arg2: i32) -> (i32, i32) {
    %c0_i32 = arith.constant 0 : i32
    return %arg2, %arg1 : i32, i32
  }
  func.func @transform_2(%arg0: i32, %arg1: i32, %arg2: i32) -> (i32, i32) {
    %c0_i32 = arith.constant 0 : i32
    %c0_i32_0 = arith.constant 0 : i32
    return %c0_i32, %arg1 : i32, i32
  }
  func.func @transform_3(%arg0: i32, %arg1: i32, %arg2: i32) -> (i32, i32) {
    %c0_i32 = arith.constant 0 : i32
    return %arg0, %arg1 : i32, i32
  }
}

module attributes {stable_mosaic.version = 11 : i64} {
  func.func @_mm_kernel(%arg0: i32, %arg1: i32, %arg2: i32, %arg3: memref<128x128xbf16, #tpu.memory_space<vmem>>, %arg4: memref<128x512xbf16, #tpu.memory_space<vmem>>, %arg5: memref<1x512xf32, #tpu.memory_space<vmem>>, %arg6: memref<128x512xbf16, #tpu.memory_space<vmem>>) attributes {dimension_semantics = [#tpu.dimension_semantics<parallel>, #tpu.dimension_semantics<parallel>, #tpu.dimension_semantics<arbitrary>], iteration_bounds = array<i64: 4, 1, 1>, scalar_prefetch = 0 : i64, scratch_operands = 0 : i64, tpu.core_type = #tpu.core_type<tc>, window_params = [{transform_indices = @transform_0, window_bounds = array<i64: 128, 128>}, {transform_indices = @transform_1, window_bounds = array<i64: 128, 512>}, {transform_indices = @transform_2, window_bounds = array<i64: 1, 512>}, {transform_indices = @transform_3, window_bounds = array<i64: 128, 512>}]} {
    %c0 = arith.constant 0 : index
    %c0_0 = arith.constant 0 : index
    %0 = vector.load %arg3[%c0, %c0_0] : memref<128x128xbf16, #tpu.memory_space<vmem>>, vector<128x128xbf16>
    %c0_1 = arith.constant 0 : index
    %c0_2 = arith.constant 0 : index
    %1 = vector.load %arg4[%c0_1, %c0_2] : memref<128x512xbf16, #tpu.memory_space<vmem>>, vector<128x512xbf16>
    %cst = arith.constant dense<0.000000e+00> : vector<128x512xf32>
    %2 = tpu.matmul %0, %1, %cst {dimension_numbers = #tpu.dot_dimension_numbers<[1], [0], [0], [1], [0, 0, 1, 1], [], []>} : vector<128x128xbf16>, vector<128x512xbf16>, vector<128x512xf32> -> vector<128x512xf32>
    %c0_3 = arith.constant 0 : index
    %c0_4 = arith.constant 0 : index
    %3 = vector.load %arg5[%c0_3, %c0_4] : memref<1x512xf32, #tpu.memory_space<vmem>>, vector<1x512xf32>
    %4 = vector.broadcast %3 : vector<1x512xf32> to vector<128x512xf32>
    %5 = arith.addf %2, %4 : vector<128x512xf32>
    %6 = arith.truncf %5 : vector<128x512xf32> to vector<128x512xbf16>
    %c0_5 = arith.constant 0 : index
    %c0_6 = arith.constant 0 : index
    %7 = vector.load %arg6[%c0_5, %c0_6] : memref<128x512xbf16, #tpu.memory_space<vmem>>, vector<128x512xbf16>
    tpu.vector_store %arg6[%c0_5, %c0_6], %6 {strides = array<i32>} : memref<128x512xbf16, #tpu.memory_space<vmem>>, vector<128x512xbf16>,
    return
  }
  func.func @transform_0(%arg0: i32, %arg1: i32, %arg2: i32) -> (i32, i32) {
    %c0_i32 = arith.constant 0 : i32
    return %arg0, %arg2 : i32, i32
  }
  func.func @transform_1(%arg0: i32, %arg1: i32, %arg2: i32) -> (i32, i32) {
    %c0_i32 = arith.constant 0 : i32
    return %arg2, %arg1 : i32, i32
  }
  func.func @transform_2(%arg0: i32, %arg1: i32, %arg2: i32) -> (i32, i32) {
    %c0_i32 = arith.constant 0 : i32
    %c0_i32_0 = arith.constant 0 : i32
    return %c0_i32, %arg1 : i32, i32
  }
  func.func @transform_3(%arg0: i32, %arg1: i32, %arg2: i32) -> (i32, i32) {
    %c0_i32 = arith.constant 0 : i32
    return %arg0, %arg1 : i32, i32
  }
}

module attributes {stable_mosaic.version = 11 : i64} {
  func.func @_attn_kernel(%arg0: i32, %arg1: i32, %arg2: i32, %arg3: memref<1x1x128x16xbf16, #tpu.memory_space<vmem>>, %arg4: memref<1x1x256x16xbf16, #tpu.memory_space<vmem>>, %arg5: memref<1x1x256x16xbf16, #tpu.memory_space<vmem>>, %arg6: memref<1x1x128x16xbf16, #tpu.memory_space<vmem>>) attributes {dimension_semantics = [#tpu.dimension_semantics<parallel>, #tpu.dimension_semantics<parallel>, #tpu.dimension_semantics<parallel>], iteration_bounds = array<i64: 2, 8, 2>, scalar_prefetch = 0 : i64, scratch_operands = 0 : i64, tpu.core_type = #tpu.core_type<tc>, window_params = [{transform_indices = @transform_0, window_bounds = array<i64: 1, 1, 128, 16>}, {transform_indices = @transform_1, window_bounds = array<i64: 1, 1, 256, 16>}, {transform_indices = @transform_2, window_bounds = array<i64: 1, 1, 256, 16>}, {transform_indices = @transform_3, window_bounds = array<i64: 1, 1, 128, 16>}]} {
    %c0 = arith.constant 0 : index
    %c0_0 = arith.constant 0 : index
    %c0_1 = arith.constant 0 : index
    %c0_2 = arith.constant 0 : index
    %0 = vector.load %arg3[%c0, %c0_0, %c0_1, %c0_2] : memref<1x1x128x16xbf16, #tpu.memory_space<vmem>>, vector<1x1x128x16xbf16>
    %1 = vector.shape_cast %0 : vector<1x1x128x16xbf16> to vector<128x16xbf16>
    %c0_3 = arith.constant 0 : index
    %c0_4 = arith.constant 0 : index
    %c0_5 = arith.constant 0 : index
    %c0_6 = arith.constant 0 : index
    %2 = vector.load %arg4[%c0_3, %c0_4, %c0_5, %c0_6] : memref<1x1x256x16xbf16, #tpu.memory_space<vmem>>, vector<1x1x256x16xbf16>
    %3 = vector.shape_cast %2 : vector<1x1x256x16xbf16> to vector<256x16xbf16>
    %c0_7 = arith.constant 0 : index
    %c0_8 = arith.constant 0 : index
    %c0_9 = arith.constant 0 : index
    %c0_10 = arith.constant 0 : index
    %4 = vector.load %arg5[%c0_7, %c0_8, %c0_9, %c0_10] : memref<1x1x256x16xbf16, #tpu.memory_space<vmem>>, vector<1x1x256x16xbf16>
    %5 = vector.shape_cast %4 : vector<1x1x256x16xbf16> to vector<256x16xbf16>
    %cst = arith.constant dense<0.000000e+00> : vector<128x256xf32>
    %6 = tpu.matmul %1, %3, %cst {dimension_numbers = #tpu.dot_dimension_numbers<[1], [1], [0], [0], [0, 0, 1, 0], [], []>} : vector<128x16xbf16>, vector<256x16xbf16>, vector<128x256xf32> -> vector<128x256xf32>
    %cst_11 = arith.constant 2.500000e-01 : f32
    %7 = vector.broadcast %cst_11 : f32 to vector<128x256xf32>
    %8 = arith.mulf %6, %7 : vector<128x256xf32>
    %cst_12 = arith.constant dense<0xFF800000> : vector<128xf32>
    %9 = vector.multi_reduction <maximumf>, %8, %cst_12 [1] : vector<128x256xf32> to vector<128xf32>
    %10 = vector.shape_cast %9 : vector<128xf32> to vector<128x1xf32>
    %11 = vector.broadcast %10 : vector<128x1xf32> to vector<128x256xf32>
    %12 = arith.subf %8, %11 : vector<128x256xf32>
    %13 = math.exp %12 : vector<128x256xf32>
    %cst_13 = arith.constant dense<0.000000e+00> : vector<128xf32>
    %14 = vector.multi_reduction <add>, %13, %cst_13 [1] : vector<128x256xf32> to vector<128xf32>
    %15 = vector.shape_cast %14 : vector<128xf32> to vector<128x1xf32>
    %16 = arith.truncf %13 : vector<128x256xf32> to vector<128x256xbf16>
    %cst_14 = arith.constant dense<0.000000e+00> : vector<128x16xf32>
    %17 = tpu.matmul %16, %5, %cst_14 {dimension_numbers = #tpu.dot_dimension_numbers<[1], [0], [0], [1], [0, 0, 1, 1], [], []>} : vector<128x256xbf16>, vector<256x16xbf16>, vector<128x16xf32> -> vector<128x16xf32>
    %18 = tpu.reciprocal %15 {approx = true} : vector<128x1xf32> -> vector<128x1xf32>
    %19 = vector.broadcast %18 : vector<128x1xf32> to vector<128x16xf32>
    %20 = arith.mulf %17, %19 : vector<128x16xf32>
    %21 = arith.truncf %20 : vector<128x16xf32> to vector<128x16xbf16>
    %c0_15 = arith.constant 0 : index
    %c0_16 = arith.constant 0 : index
    %c0_17 = arith.constant 0 : index
    %c0_18 = arith.constant 0 : index
    %22 = vector.load %arg6[%c0_15, %c0_16, %c0_17, %c0_18] : memref<1x1x128x16xbf16, #tpu.memory_space<vmem>>, vector<1x1x128x16xbf16>
    %23 = vector.shape_cast %22 : vector<1x1x128x16xbf16> to vector<128x16xbf16>
    %24 = vector.shape_cast %21 : vector<128x16xbf16> to vector<1x1x128x16xbf16>
    tpu.vector_store %arg6[%c0_15, %c0_16, %c0_17, %c0_18], %24 {strides = array<i32>} : memref<1x1x128x16xbf16, #tpu.memory_space<vmem>>, vector<1x1x128x16xbf16>,
    return
  }
  func.func @transform_0(%arg0: i32, %arg1: i32, %arg2: i32) -> (i32, i32, i32, i32) {
    %c0_i32 = arith.constant 0 : i32
    %c0_i32_0 = arith.constant 0 : i32
    return %arg0, %arg1, %arg2, %c0_i32 : i32, i32, i32, i32
  }
  func.func @transform_1(%arg0: i32, %arg1: i32, %arg2: i32) -> (i32, i32, i32, i32) {
    %c0_i32 = arith.constant 0 : i32
    %c0_i32_0 = arith.constant 0 : i32
    %c0_i32_1 = arith.constant 0 : i32
    return %arg0, %arg1, %c0_i32, %c0_i32_0 : i32, i32, i32, i32
  }
  func.func @transform_2(%arg0: i32, %arg1: i32, %arg2: i32) -> (i32, i32, i32, i32) {
    %c0_i32 = arith.constant 0 : i32
    %c0_i32_0 = arith.constant 0 : i32
    %c0_i32_1 = arith.constant 0 : i32
    return %arg0, %arg1, %c0_i32, %c0_i32_0 : i32, i32, i32, i32
  }
  func.func @transform_3(%arg0: i32, %arg1: i32, %arg2: i32) -> (i32, i32, i32, i32) {
    %c0_i32 = arith.constant 0 : i32
    %c0_i32_0 = arith.constant 0 : i32
    return %arg0, %arg1, %arg2, %c0_i32 : i32, i32, i32, i32
  }
}

module attributes {stable_mosaic.version = 11 : i64} {
  func.func @_mm_kernel(%arg0: i32, %arg1: i32, %arg2: i32, %arg3: memref<128x128xbf16, #tpu.memory_space<vmem>>, %arg4: memref<128x128xbf16, #tpu.memory_space<vmem>>, %arg5: memref<1x128xf32, #tpu.memory_space<vmem>>, %arg6: memref<128x128xbf16, #tpu.memory_space<vmem>>, %arg7: memref<1x128xf32, #tpu.memory_space<vmem>>, %arg8: memref<1x128xf32, #tpu.memory_space<vmem>>, %arg9: memref<128x128xbf16, #tpu.memory_space<vmem>>) attributes {dimension_semantics = [#tpu.dimension_semantics<parallel>, #tpu.dimension_semantics<parallel>, #tpu.dimension_semantics<arbitrary>], iteration_bounds = array<i64: 4, 1, 1>, scalar_prefetch = 0 : i64, scratch_operands = 0 : i64, tpu.core_type = #tpu.core_type<tc>, window_params = [{transform_indices = @transform_0, window_bounds = array<i64: 128, 128>}, {transform_indices = @transform_1, window_bounds = array<i64: 128, 128>}, {transform_indices = @transform_2, window_bounds = array<i64: 1, 128>}, {transform_indices = @transform_3, window_bounds = array<i64: 128, 128>}, {transform_indices = @transform_4, window_bounds = array<i64: 1, 128>}, {transform_indices = @transform_5, window_bounds = array<i64: 1, 128>}, {transform_indices = @transform_6, window_bounds = array<i64: 128, 128>}]} {
    %c0 = arith.constant 0 : index
    %c0_0 = arith.constant 0 : index
    %0 = vector.load %arg3[%c0, %c0_0] : memref<128x128xbf16, #tpu.memory_space<vmem>>, vector<128x128xbf16>
    %c0_1 = arith.constant 0 : index
    %c0_2 = arith.constant 0 : index
    %1 = vector.load %arg4[%c0_1, %c0_2] : memref<128x128xbf16, #tpu.memory_space<vmem>>, vector<128x128xbf16>
    %cst = arith.constant dense<0.000000e+00> : vector<128x128xf32>
    %2 = tpu.matmul %0, %1, %cst {dimension_numbers = #tpu.dot_dimension_numbers<[1], [0], [0], [1], [0, 0, 1, 1], [], []>} : vector<128x128xbf16>, vector<128x128xbf16>, vector<128x128xf32> -> vector<128x128xf32>
    %c0_3 = arith.constant 0 : index
    %c0_4 = arith.constant 0 : index
    %3 = vector.load %arg5[%c0_3, %c0_4] : memref<1x128xf32, #tpu.memory_space<vmem>>, vector<1x128xf32>
    %4 = vector.broadcast %3 : vector<1x128xf32> to vector<128x128xf32>
    %5 = arith.addf %2, %4 : vector<128x128xf32>
    %c0_5 = arith.constant 0 : index
    %c0_6 = arith.constant 0 : index
    %6 = vector.load %arg6[%c0_5, %c0_6] : memref<128x128xbf16, #tpu.memory_space<vmem>>, vector<128x128xbf16>
    %7 = arith.extf %6 : vector<128x128xbf16> to vector<128x128xf32>
    %8 = arith.addf %5, %7 : vector<128x128xf32>
    %cst_7 = arith.constant dense<0.000000e+00> : vector<128xf32>
    %9 = vector.multi_reduction <add>, %8, %cst_7 [1] : vector<128x128xf32> to vector<128xf32>
    %10 = vector.shape_cast %9 : vector<128xf32> to vector<128x1xf32>
    %cst_8 = arith.constant 1.280000e+02 : f32
    %11 = vector.broadcast %cst_8 : f32 to vector<128x1xf32>
    %12 = arith.divf %10, %11 : vector<128x1xf32>
    %13 = vector.broadcast %12 : vector<128x1xf32> to vector<128x128xf32>
    %14 = arith.subf %8, %13 : vector<128x128xf32>
    %15 = arith.mulf %14, %14 : vector<128x128xf32>
    %cst_9 = arith.constant dense<0.000000e+00> : vector<128xf32>
    %16 = vector.multi_reduction <add>, %15, %cst_9 [1] : vector<128x128xf32> to vector<128xf32>
    %17 = vector.shape_cast %16 : vector<128xf32> to vector<128x1xf32>
    %cst_10 = arith.constant 1.280000e+02 : f32
    %18 = vector.broadcast %cst_10 : f32 to vector<128x1xf32>
    %19 = arith.divf %17, %18 : vector<128x1xf32>
    %20 = vector.broadcast %12 : vector<128x1xf32> to vector<128x128xf32>
    %21 = arith.subf %8, %20 : vector<128x128xf32>
    %cst_11 = arith.constant 9.99999974E-6 : f32
    %22 = vector.broadcast %cst_11 : f32 to vector<128x1xf32>
    %23 = arith.addf %19, %22 : vector<128x1xf32>
    %24 = math.rsqrt %23 : vector<128x1xf32>
    %25 = vector.broadcast %24 : vector<128x1xf32> to vector<128x128xf32>
    %26 = arith.mulf %21, %25 : vector<128x128xf32>
    %c0_12 = arith.constant 0 : index
    %c0_13 = arith.constant 0 : index
    %27 = vector.load %arg7[%c0_12, %c0_13] : memref<1x128xf32, #tpu.memory_space<vmem>>, vector<1x128xf32>
    %28 = vector.broadcast %27 : vector<1x128xf32> to vector<128x128xf32>
    %29 = arith.mulf %26, %28 : vector<128x128xf32>
    %c0_14 = arith.constant 0 : index
    %c0_15 = arith.constant 0 : index
    %30 = vector.load %arg8[%c0_14, %c0_15] : memref<1x128xf32, #tpu.memory_space<vmem>>, vector<1x128xf32>
    %31 = vector.broadcast %30 : vector<1x128xf32> to vector<128x128xf32>
    %32 = arith.addf %29, %31 : vector<128x128xf32>
    %33 = arith.truncf %32 : vector<128x128xf32> to vector<128x128xbf16>
    %c0_16 = arith.constant 0 : index
    %c0_17 = arith.constant 0 : index
    %34 = vector.load %arg9[%c0_16, %c0_17] : memref<128x128xbf16, #tpu.memory_space<vmem>>, vector<128x128xbf16>
    tpu.vector_store %arg9[%c0_16, %c0_17], %33 {strides = array<i32>} : memref<128x128xbf16, #tpu.memory_space<vmem>>, vector<128x128xbf16>,
    return
  }
  func.func @transform_0(%arg0: i32, %arg1: i32, %arg2: i32) -> (i32, i32) {
    %c0_i32 = arith.constant 0 : i32
    return %arg0, %arg2 : i32, i32
  }
  func.func @transform_1(%arg0: i32, %arg1: i32, %arg2: i32) -> (i32, i32) {
    %c0_i32 = arith.constant 0 : i32
    return %arg2, %arg1 : i32, i32
  }
  func.func @transform_2(%arg0: i32, %arg1: i32, %arg2: i32) -> (i32, i32) {
    %c0_i32 = arith.constant 0 : i32
    %c0_i32_0 = arith.constant 0 : i32
    return %c0_i32, %arg1 : i32, i32
  }
  func.func @transform_3(%arg0: i32, %arg1: i32, %arg2: i32) -> (i32, i32) {
    %c0_i32 = arith.constant 0 : i32
    return %arg0, %arg1 : i32, i32
  }
  func.func @transform_4(%arg0: i32, %arg1: i32, %arg2: i32) -> (i32, i32) {
    %c0_i32 = arith.constant 0 : i32
    %c0_i32_0 = arith.constant 0 : i32
    return %c0_i32, %arg1 : i32, i32
  }
  func.func @transform_5(%arg0: i32, %arg1: i32, %arg2: i32) -> (i32, i32) {
    %c0_i32 = arith.constant 0 : i32
    %c0_i32_0 = arith.constant 0 : i32
    return %c0_i32, %arg1 : i32, i32
  }
  func.func @transform_6(%arg0: i32, %arg1: i32, %arg2: i32) -> (i32, i32) {
    %c0_i32 = arith.constant 0 : i32
    return %arg0, %arg1 : i32, i32
  }
}

module attributes {stable_mosaic.version = 11 : i64} {
  func.func @_mm_kernel(%arg0: i32, %arg1: i32, %arg2: i32, %arg3: memref<128x128xbf16, #tpu.memory_space<vmem>>, %arg4: memref<128x256xbf16, #tpu.memory_space<vmem>>, %arg5: memref<1x256xf32, #tpu.memory_space<vmem>>, %arg6: memref<128x256xbf16, #tpu.memory_space<vmem>>) attributes {dimension_semantics = [#tpu.dimension_semantics<parallel>, #tpu.dimension_semantics<parallel>, #tpu.dimension_semantics<arbitrary>], iteration_bounds = array<i64: 4, 1, 1>, scalar_prefetch = 0 : i64, scratch_operands = 0 : i64, tpu.core_type = #tpu.core_type<tc>, window_params = [{transform_indices = @transform_0, window_bounds = array<i64: 128, 128>}, {transform_indices = @transform_1, window_bounds = array<i64: 128, 256>}, {transform_indices = @transform_2, window_bounds = array<i64: 1, 256>}, {transform_indices = @transform_3, window_bounds = array<i64: 128, 256>}]} {
    %c0 = arith.constant 0 : index
    %c0_0 = arith.constant 0 : index
    %0 = vector.load %arg3[%c0, %c0_0] : memref<128x128xbf16, #tpu.memory_space<vmem>>, vector<128x128xbf16>
    %c0_1 = arith.constant 0 : index
    %c0_2 = arith.constant 0 : index
    %1 = vector.load %arg4[%c0_1, %c0_2] : memref<128x256xbf16, #tpu.memory_space<vmem>>, vector<128x256xbf16>
    %cst = arith.constant dense<0.000000e+00> : vector<128x256xf32>
    %2 = tpu.matmul %0, %1, %cst {dimension_numbers = #tpu.dot_dimension_numbers<[1], [0], [0], [1], [0, 0, 1, 1], [], []>} : vector<128x128xbf16>, vector<128x256xbf16>, vector<128x256xf32> -> vector<128x256xf32>
    %c0_3 = arith.constant 0 : index
    %c0_4 = arith.constant 0 : index
    %3 = vector.load %arg5[%c0_3, %c0_4] : memref<1x256xf32, #tpu.memory_space<vmem>>, vector<1x256xf32>
    %4 = vector.broadcast %3 : vector<1x256xf32> to vector<128x256xf32>
    %5 = arith.addf %2, %4 : vector<128x256xf32>
    %cst_5 = arith.constant 0.000000e+00 : f32
    %6 = vector.broadcast %cst_5 : f32 to vector<128x256xf32>
    %7 = arith.maximumf %5, %6 : vector<128x256xf32>
    %8 = arith.truncf %7 : vector<128x256xf32> to vector<128x256xbf16>
    %c0_6 = arith.constant 0 : index
    %c0_7 = arith.constant 0 : index
    %9 = vector.load %arg6[%c0_6, %c0_7] : memref<128x256xbf16, #tpu.memory_space<vmem>>, vector<128x256xbf16>
    tpu.vector_store %arg6[%c0_6, %c0_7], %8 {strides = array<i32>} : memref<128x256xbf16, #tpu.memory_space<vmem>>, vector<128x256xbf16>,
    return
  }
  func.func @transform_0(%arg0: i32, %arg1: i32, %arg2: i32) -> (i32, i32) {
    %c0_i32 = arith.constant 0 : i32
    return %arg0, %arg2 : i32, i32
  }
  func.func @transform_1(%arg0: i32, %arg1: i32, %arg2: i32) -> (i32, i32) {
    %c0_i32 = arith.constant 0 : i32
    return %arg2, %arg1 : i32, i32
  }
  func.func @transform_2(%arg0: i32, %arg1: i32, %arg2: i32) -> (i32, i32) {
    %c0_i32 = arith.constant 0 : i32
    %c0_i32_0 = arith.constant 0 : i32
    return %c0_i32, %arg1 : i32, i32
  }
  func.func @transform_3(%arg0: i32, %arg1: i32, %arg2: i32) -> (i32, i32) {
    %c0_i32 = arith.constant 0 : i32
    return %arg0, %arg1 : i32, i32
  }
}

module attributes {stable_mosaic.version = 11 : i64} {
  func.func @_mm_kernel(%arg0: i32, %arg1: i32, %arg2: i32, %arg3: memref<128x256xbf16, #tpu.memory_space<vmem>>, %arg4: memref<256x128xbf16, #tpu.memory_space<vmem>>, %arg5: memref<1x128xf32, #tpu.memory_space<vmem>>, %arg6: memref<128x128xbf16, #tpu.memory_space<vmem>>, %arg7: memref<1x128xf32, #tpu.memory_space<vmem>>, %arg8: memref<1x128xf32, #tpu.memory_space<vmem>>, %arg9: memref<128x128xbf16, #tpu.memory_space<vmem>>) attributes {dimension_semantics = [#tpu.dimension_semantics<parallel>, #tpu.dimension_semantics<parallel>, #tpu.dimension_semantics<arbitrary>], iteration_bounds = array<i64: 4, 1, 1>, scalar_prefetch = 0 : i64, scratch_operands = 0 : i64, tpu.core_type = #tpu.core_type<tc>, window_params = [{transform_indices = @transform_0, window_bounds = array<i64: 128, 256>}, {transform_indices = @transform_1, window_bounds = array<i64: 256, 128>}, {transform_indices = @transform_2, window_bounds = array<i64: 1, 128>}, {transform_indices = @transform_3, window_bounds = array<i64: 128, 128>}, {transform_indices = @transform_4, window_bounds = array<i64: 1, 128>}, {transform_indices = @transform_5, window_bounds = array<i64: 1, 128>}, {transform_indices = @transform_6, window_bounds = array<i64: 128, 128>}]} {
    %c0 = arith.constant 0 : index
    %c0_0 = arith.constant 0 : index
    %0 = vector.load %arg3[%c0, %c0_0] : memref<128x256xbf16, #tpu.memory_space<vmem>>, vector<128x256xbf16>
    %c0_1 = arith.constant 0 : index
    %c0_2 = arith.constant 0 : index
    %1 = vector.load %arg4[%c0_1, %c0_2] : memref<256x128xbf16, #tpu.memory_space<vmem>>, vector<256x128xbf16>
    %cst = arith.constant dense<0.000000e+00> : vector<128x128xf32>
    %2 = tpu.matmul %0, %1, %cst {dimension_numbers = #tpu.dot_dimension_numbers<[1], [0], [0], [1], [0, 0, 1, 1], [], []>} : vector<128x256xbf16>, vector<256x128xbf16>, vector<128x128xf32> -> vector<128x128xf32>
    %c0_3 = arith.constant 0 : index
    %c0_4 = arith.constant 0 : index
    %3 = vector.load %arg5[%c0_3, %c0_4] : memref<1x128xf32, #tpu.memory_space<vmem>>, vector<1x128xf32>
    %4 = vector.broadcast %3 : vector<1x128xf32> to vector<128x128xf32>
    %5 = arith.addf %2, %4 : vector<128x128xf32>
    %c0_5 = arith.constant 0 : index
    %c0_6 = arith.constant 0 : index
    %6 = vector.load %arg6[%c0_5, %c0_6] : memref<128x128xbf16, #tpu.memory_space<vmem>>, vector<128x128xbf16>
    %7 = arith.extf %6 : vector<128x128xbf16> to vector<128x128xf32>
    %8 = arith.addf %5, %7 : vector<128x128xf32>
    %cst_7 = arith.constant dense<0.000000e+00> : vector<128xf32>
    %9 = vector.multi_reduction <add>, %8, %cst_7 [1] : vector<128x128xf32> to vector<128xf32>
    %10 = vector.shape_cast %9 : vector<128xf32> to vector<128x1xf32>
    %cst_8 = arith.constant 1.280000e+02 : f32
    %11 = vector.broadcast %cst_8 : f32 to vector<128x1xf32>
    %12 = arith.divf %10, %11 : vector<128x1xf32>
    %13 = vector.broadcast %12 : vector<128x1xf32> to vector<128x128xf32>
    %14 = arith.subf %8, %13 : vector<128x128xf32>
    %15 = arith.mulf %14, %14 : vector<128x128xf32>
    %cst_9 = arith.constant dense<0.000000e+00> : vector<128xf32>
    %16 = vector.multi_reduction <add>, %15, %cst_9 [1] : vector<128x128xf32> to vector<128xf32>
    %17 = vector.shape_cast %16 : vector<128xf32> to vector<128x1xf32>
    %cst_10 = arith.constant 1.280000e+02 : f32
    %18 = vector.broadcast %cst_10 : f32 to vector<128x1xf32>
    %19 = arith.divf %17, %18 : vector<128x1xf32>
    %20 = vector.broadcast %12 : vector<128x1xf32> to vector<128x128xf32>
    %21 = arith.subf %8, %20 : vector<128x128xf32>
    %cst_11 = arith.constant 9.99999974E-6 : f32
    %22 = vector.broadcast %cst_11 : f32 to vector<128x1xf32>
    %23 = arith.addf %19, %22 : vector<128x1xf32>
    %24 = math.rsqrt %23 : vector<128x1xf32>
    %25 = vector.broadcast %24 : vector<128x1xf32> to vector<128x128xf32>
    %26 = arith.mulf %21, %25 : vector<128x128xf32>
    %c0_12 = arith.constant 0 : index
    %c0_13 = arith.constant 0 : index
    %27 = vector.load %arg7[%c0_12, %c0_13] : memref<1x128xf32, #tpu.memory_space<vmem>>, vector<1x128xf32>
    %28 = vector.broadcast %27 : vector<1x128xf32> to vector<128x128xf32>
    %29 = arith.mulf %26, %28 : vector<128x128xf32>
    %c0_14 = arith.constant 0 : index
    %c0_15 = arith.constant 0 : index
    %30 = vector.load %arg8[%c0_14, %c0_15] : memref<1x128xf32, #tpu.memory_space<vmem>>, vector<1x128xf32>
    %31 = vector.broadcast %30 : vector<1x128xf32> to vector<128x128xf32>
    %32 = arith.addf %29, %31 : vector<128x128xf32>
    %33 = arith.truncf %32 : vector<128x128xf32> to vector<128x128xbf16>
    %c0_16 = arith.constant 0 : index
    %c0_17 = arith.constant 0 : index
    %34 = vector.load %arg9[%c0_16, %c0_17] : memref<128x128xbf16, #tpu.memory_space<vmem>>, vector<128x128xbf16>
    tpu.vector_store %arg9[%c0_16, %c0_17], %33 {strides = array<i32>} : memref<128x128xbf16, #tpu.memory_space<vmem>>, vector<128x128xbf16>,
    return
  }
  func.func @transform_0(%arg0: i32, %arg1: i32, %arg2: i32) -> (i32, i32) {
    %c0_i32 = arith.constant 0 : i32
    return %arg0, %arg2 : i32, i32
  }
  func.func @transform_1(%arg0: i32, %arg1: i32, %arg2: i32) -> (i32, i32) {
    %c0_i32 = arith.constant 0 : i32
    return %arg2, %arg1 : i32, i32
  }
  func.func @transform_2(%arg0: i32, %arg1: i32, %arg2: i32) -> (i32, i32) {
    %c0_i32 = arith.constant 0 : i32
    %c0_i32_0 = arith.constant 0 : i32
    return %c0_i32, %arg1 : i32, i32
  }
  func.func @transform_3(%arg0: i32, %arg1: i32, %arg2: i32) -> (i32, i32) {
    %c0_i32 = arith.constant 0 : i32
    return %arg0, %arg1 : i32, i32
  }
  func.func @transform_4(%arg0: i32, %arg1: i32, %arg2: i32) -> (i32, i32) {
    %c0_i32 = arith.constant 0 : i32
    %c0_i32_0 = arith.constant 0 : i32
    return %c0_i32, %arg1 : i32, i32
  }
  func.func @transform_5(%arg0: i32, %arg1: i32, %arg2: i32) -> (i32, i32) {
    %c0_i32 = arith.constant 0 : i32
    %c0_i32_0 = arith.constant 0 : i32
    return %c0_i32, %arg1 : i32, i32
  }
  func.func @transform_6(%arg0: i32, %arg1: i32, %arg2: i32) -> (i32, i32) {
    %c0_i32 = arith.constant 0 : i32
    return %arg0, %arg1 : i32, i32
  }
}

module attributes {stable_mosaic.version = 11 : i64} {
  func.func @_mm_kernel(%arg0: i32, %arg1: i32, %arg2: i32, %arg3: memref<128x128xbf16, #tpu.memory_space<vmem>>, %arg4: memref<128x256xbf16, #tpu.memory_space<vmem>>, %arg5: memref<1x256xf32, #tpu.memory_space<vmem>>, %arg6: memref<128x256xbf16, #tpu.memory_space<vmem>>) attributes {dimension_semantics = [#tpu.dimension_semantics<parallel>, #tpu.dimension_semantics<parallel>, #tpu.dimension_semantics<arbitrary>], iteration_bounds = array<i64: 4, 1, 1>, scalar_prefetch = 0 : i64, scratch_operands = 0 : i64, tpu.core_type = #tpu.core_type<tc>, window_params = [{transform_indices = @transform_0, window_bounds = array<i64: 128, 128>}, {transform_indices = @transform_1, window_bounds = array<i64: 128, 256>}, {transform_indices = @transform_2, window_bounds = array<i64: 1, 256>}, {transform_indices = @transform_3, window_bounds = array<i64: 128, 256>}]} {
    %c0 = arith.constant 0 : index
    %c0_0 = arith.constant 0 : index
    %0 = vector.load %arg3[%c0, %c0_0] : memref<128x128xbf16, #tpu.memory_space<vmem>>, vector<128x128xbf16>
    %c0_1 = arith.constant 0 : index
    %c0_2 = arith.constant 0 : index
    %1 = vector.load %arg4[%c0_1, %c0_2] : memref<128x256xbf16, #tpu.memory_space<vmem>>, vector<128x256xbf16>
    %cst = arith.constant dense<0.000000e+00> : vector<128x256xf32>
    %2 = tpu.matmul %0, %1, %cst {dimension_numbers = #tpu.dot_dimension_numbers<[1], [0], [0], [1], [0, 0, 1, 1], [], []>} : vector<128x128xbf16>, vector<128x256xbf16>, vector<128x256xf32> -> vector<128x256xf32>
    %c0_3 = arith.constant 0 : index
    %c0_4 = arith.constant 0 : index
    %3 = vector.load %arg5[%c0_3, %c0_4] : memref<1x256xf32, #tpu.memory_space<vmem>>, vector<1x256xf32>
    %4 = vector.broadcast %3 : vector<1x256xf32> to vector<128x256xf32>
    %5 = arith.addf %2, %4 : vector<128x256xf32>
    %6 = arith.truncf %5 : vector<128x256xf32> to vector<128x256xbf16>
    %c0_5 = arith.constant 0 : index
    %c0_6 = arith.constant 0 : index
    %7 = vector.load %arg6[%c0_5, %c0_6] : memref<128x256xbf16, #tpu.memory_space<vmem>>, vector<128x256xbf16>
    tpu.vector_store %arg6[%c0_5, %c0_6], %6 {strides = array<i32>} : memref<128x256xbf16, #tpu.memory_space<vmem>>, vector<128x256xbf16>,
    return
  }
  func.func @transform_0(%arg0: i32, %arg1: i32, %arg2: i32) -> (i32, i32) {
    %c0_i32 = arith.constant 0 : i32
    return %arg0, %arg2 : i32, i32
  }
  func.func @transform_1(%arg0: i32, %arg1: i32, %arg2: i32) -> (i32, i32) {
    %c0_i32 = arith.constant 0 : i32
    return %arg2, %arg1 : i32, i32
  }
  func.func @transform_2(%arg0: i32, %arg1: i32, %arg2: i32) -> (i32, i32) {
    %c0_i32 = arith.constant 0 : i32
    %c0_i32_0 = arith.constant 0 : i32
    return %c0_i32, %arg1 : i32, i32
  }
  func.func @transform_3(%arg0: i32, %arg1: i32, %arg2: i32) -> (i32, i32) {
    %c0_i32 = arith.constant 0 : i32
    return %arg0, %arg1 : i32, i32
  }
}

</mosaic_0001>

<bundles_post_ra>
// kernel: forward.13
= control target key start
LH: loop header
LB: loop body
LE: loop exit
PB: predicated region body
PF: predicated region fallthrough
CT: control target
= control target key end

     0   :  { %s1232_s12 = smov 0   ;;  %s1234_s13 = smov 0   ;;  %s1377_s0 = inlined_call_operand.vmem [shape: bf16[512,384], index: 0, kind: input, shape index: {}]   ;;  %s1378_s1 = inlined_call_operand.vmem [shape: bf16[384,128], index: 1, kind: input, shape index: {}]   ;;  %s1379_s2 = inlined_call_operand.vmem [shape: f32[1,128], index: 2, kind: input, shape index: {}]   ;;  %s1380_s3 = inlined_call_operand.vmem [shape: bf16[512,128], index: 3, kind: output, shape index: {}]  }
   0x1   :  { %s1236_s14 = smov 0   ;;  %s1238_s15 = smov 0  }
   0x2   :  { %s1240_s16 = smov 0   ;;  %s1242_s17 = smov 0  }
   0x3   :  { %s1244_s18 = smov 0  }
   0x4 LB: > { %s25_s19 = sadd.s32 1, %s1201_s16  ;;  %s32_s20 = sadd.s32 1, %s1205_s17  ;;  %s1209_s18 = sphi %s1244_s18, %s13_s18   ;;  %s1205_s17 = sphi %s1242_s17, %s1386_s17   ;;  %s1201_s16 = sphi %s1240_s16, %s1385_s16   ;;  %s1197_s15 = sphi %s1238_s15, %s1384_s15   ;;  %s1193_s14 = sphi %s1236_s14, %s1383_s14   ;;  %s1189_s13 = sphi %s1234_s13, %s1382_s13   ;;  %s1185_s12 = sphi %s1232_s12, %s1381_s12  }
   0x5   : > { %p26_p0 = scmp.ge.s32.totalorder %s25_s19, 3  ;;  %p48_p1 = scmp.ne.s32.totalorder %s1189_s13, %s1185_s12 }
   0x6   : > { %p49_p2 = scmp.eq.s32.totalorder %s1209_s18, 0  ;;  %s41_s24 = sadd.s32 1, %s1189_s13 }
   0x7   : > { %s1388_s19 = smov (%p26_p0, %s25_s19), 0  ;;  %s1390_s20 = smov (!%p26_p0, %s32_s20), %s1205_s17 }
   0x8   : > { %p50_p3 = por %p49_p2, %p48_p1  ;;  %p34_p4 = scmp.ge.s32.totalorder %s1390_s20, 4 }
   0x9   : > { %s37_s21 = ssub.s32 %s1201_s16, %s1388_s19  ;;  %p906_p6 = scmp.ge.s32.totalorder %s1209_s18, 12 }
   0xa   : > { %s1392_s20 = smov (%p34_p4, %s1390_s20), 0 }
   0xb   : > { %s36_s22 = ssub.s32 %s1205_s17, %s1392_s20  ;;  %162 = sbr.rel (%p906_p6) target bundleno = 35 (0x23), region = 20 }
   0xc   : > { %s38_s23 = sor.u32 %s37_s21, %s36_s22 }
   0xd   : > { %p39_p5 = scmp.eq.s32.totalorder %s38_s23, 0 }
   0xf   : > { %s1283_s25 = scalar_select %p39_p5, %s1189_s13, %s41_s24  }
  0x12   : > { %165 = sbr.rel (!%p50_p3) target bundleno = 35 (0x23), region = 24  ;;  %s167_s26 = sand.u32 (%p50_p3), 1, %s1189_s13  }
  0x13   : > { %s1081_s27 = smul.u32 (%p50_p3), 48, %s1205_s17  ;;  %s907_s28 = sshll.u32 (%p50_p3), %s167_s26, 6 }
  0x14   : > { %s169_s7 = scalar_lea.vmem (%p50_p3), [#allocation3], %s907_s28 }
  0x15   : > { %s172_s29 = sadd.s32 (%p50_p3), %s1201_s16, %s1081_s27 }
  0x16   : > { %s910_s30 = sshll.u32 (%p50_p3), %s172_s29, 2 }
  0x17   : > { %s1292_s6 = scalar_lea.vmem (%p50_p3), %s1377_s0, %s910_s30 }
  0x18   : > { %v190_v0 = vld [vmem:[%s1292_s6] sm:$0xf] (%p50_p3)  ;;  %v192_v1 = vld [vmem:[%s1292_s6 + $0xc] sm:$0xf] (%p50_p3)  ;;  %v194_v2 = vld [vmem:[%s1292_s6 + $0x18] sm:$0xf] (%p50_p3) }
  0x19   : > { %191 = vst [vmem:[%s169_s7] sm:$0xf] %v190_v0  ;;  %193 = vst [vmem:[%s169_s7 + $0x4] sm:$0xf] %v192_v1  ;;  %v196_v3 = vld [vmem:[%s1292_s6 + $0x24] sm:$0xf] }
  0x1a   : > { %195 = vst [vmem:[%s169_s7 + $0x8] sm:$0xf] %v194_v2  ;;  %v198_v4 = vld [vmem:[%s1292_s6 + $0x30] sm:$0xf]  ;;  %v200_v5 = vld [vmem:[%s1292_s6 + $0x3c] sm:$0xf] }
  0x1b   : > { %197 = vst [vmem:[%s169_s7 + $0xc] sm:$0xf] %v196_v3  ;;  %199 = vst [vmem:[%s169_s7 + $0x10] sm:$0xf] %v198_v4  ;;  %v202_v6 = vld [vmem:[%s1292_s6 + $0x48] sm:$0xf] }
  0x1c   : > { %201 = vst [vmem:[%s169_s7 + $0x14] sm:$0xf] %v200_v5  ;;  %v204_v7 = vld [vmem:[%s1292_s6 + $0x54] sm:$0xf]  ;;  %v206_v8 = vld [vmem:[%s1292_s6 + $0x60] sm:$0xf] }
  0x1d   : > { %203 = vst [vmem:[%s169_s7 + $0x18] sm:$0xf] %v202_v6  ;;  %205 = vst [vmem:[%s169_s7 + $0x1c] sm:$0xf] %v204_v7  ;;  %v208_v9 = vld [vmem:[%s1292_s6 + $0x6c] sm:$0xf] }
  0x1e   : > { %207 = vst [vmem:[%s169_s7 + $0x20] sm:$0xf] %v206_v8  ;;  %v210_v10 = vld [vmem:[%s1292_s6 + $0x78] sm:$0xf]  ;;  %v212_v11 = vld [vmem:[%s1292_s6 + $0x84] sm:$0xf] }
  0x1f   : > { %209 = vst [vmem:[%s169_s7 + $0x24] sm:$0xf] %v208_v9  ;;  %211 = vst [vmem:[%s169_s7 + $0x28] sm:$0xf] %v210_v10  ;;  %v214_v12 = vld [vmem:[%s1292_s6 + $0x90] sm:$0xf] }
  0x20   : > { %213 = vst [vmem:[%s169_s7 + $0x2c] sm:$0xf] %v212_v11  ;;  %v216_v13 = vld [vmem:[%s1292_s6 + $0x9c] sm:$0xf]  ;;  %v218_v14 = vld [vmem:[%s1292_s6 + $0xa8] sm:$0xf] }
  0x21   : > { %215 = vst [vmem:[%s169_s7 + $0x30] sm:$0xf] %v214_v12  ;;  %217 = vst [vmem:[%s169_s7 + $0x34] sm:$0xf] %v216_v13  ;;  %v220_v15 = vld [vmem:[%s1292_s6 + $0xb4] sm:$0xf] }
  0x22   : > { %219 = vst [vmem:[%s169_s7 + $0x38] sm:$0xf] %v218_v14  ;;  %221 = vst [vmem:[%s169_s7 + $0x3c] sm:$0xf] %v220_v15 }
  0x23 PF: > { %p911_p7 = scmp.ge.s32.totalorder %s1209_s18, 1  ;;  %p287_p8 = scmp.lt.s32.totalorder %s1209_s18, 13 }
  0x25   : > { %p288_p9 = pnand %p911_p7, %p287_p8 }
  0x26   : > { %s294_s8 = sand.u32 (!%p288_p9), 1, %s1185_s12   ;;  %s913_s9 = sshll.u32 (!%p288_p9), %s1193_s14, 4 }
  0x27   : > { %291 = sbr.rel (%p288_p9) target bundleno = 330 (0x14a), region = 69  ;;  %s912_s10 = sshll.u32 (!%p288_p9), %s294_s8, 6 }
  0x28   : > { %p333_p10 = scmp.lt.s32.totalorder (!%p288_p9), %s913_s9, 47  ;;  %s915_s11 = sshll.u32 (!%p288_p9), %s1197_s15, 4 }
  0x29   : > { %p345_p11 = scmp.lt.s32.totalorder (!%p288_p9), %s915_s11, 63  ;;  %s1325_s12 = scalar_lea.vmem (!%p288_p9), [#allocation3], %s912_s10 }
  0x2a   : > { %p917_p12 = scmp.ne.s32.totalorder (!%p288_p9), %s1193_s14, 0 }
  0x2e   : > { %s1394_s9 = smov (!%p333_p10, %s913_s9), 47  ;;  %s1396_s11 = smov (!%p345_p11, %s915_s11), 63 }
  0x2f   : > { %s914_s21 = sshll.u32 %s1394_s9, 2  ;;  %s916_s26 = sshll.u32 %s1396_s11, 2  ;;  %v1211_v16 = vmov (!%p917_p12), 0.0  }
  0x30   : > { %s1318_s24 = scalar_lea.vmem %s1378_s1, %s914_s21  ;;  %s1323_s29 = scalar_lea.vmem %s1380_s3, %s916_s26  ;;  %358 = vst [vmem:[#allocation2] sm:$0xff] (!%p917_p12), %v1211_v16  ;;  %359 = vst [vmem:[#allocation2 + $0x8] sm:$0xff] (!%p917_p12), %v1211_v16 }
  0x31   : > { %357 = sbr.rel (%p917_p12) target bundleno = 56 (0x38), region = 77  ;;  %360 = vst [vmem:[#allocation2 + $0x10] sm:$0xff] (!%p917_p12), %v1211_v16  ;;  %361 = vst [vmem:[#allocation2 + $0x18] sm:$0xff] (!%p917_p12), %v1211_v16 }
  0x32   : > { %362 = vst [vmem:[#allocation2 + $0x20] sm:$0xff] (!%p917_p12), %v1211_v16  ;;  %363 = vst [vmem:[#allocation2 + $0x28] sm:$0xff] (!%p917_p12), %v1211_v16 }
  0x33   : > { %364 = vst [vmem:[#allocation2 + $0x30] sm:$0xff] (!%p917_p12), %v1211_v16  ;;  %365 = vst [vmem:[#allocation2 + $0x38] sm:$0xff] (!%p917_p12), %v1211_v16 }
  0x34   : > { %366 = vst [vmem:[#allocation2 + $0x40] sm:$0xff] (!%p917_p12), %v1211_v16  ;;  %367 = vst [vmem:[#allocation2 + $0x48] sm:$0xff] (!%p917_p12), %v1211_v16 }
  0x35   : > { %368 = vst [vmem:[#allocation2 + $0x50] sm:$0xff] (!%p917_p12), %v1211_v16  ;;  %369 = vst [vmem:[#allocation2 + $0x58] sm:$0xff] (!%p917_p12), %v1211_v16 }
  0x36   : > { %370 = vst [vmem:[#allocation2 + $0x60] sm:$0xff] (!%p917_p12), %v1211_v16  ;;  %371 = vst [vmem:[#allocation2 + $0x68] sm:$0xff] (!%p917_p12), %v1211_v16 }
  0x37   : > { %372 = vst [vmem:[#allocation2 + $0x70] sm:$0xff] (!%p917_p12), %v1211_v16  ;;  %373 = vst [vmem:[#allocation2 + $0x78] sm:$0xff] (!%p917_p12), %v1211_v16 }
  0x38 PF: > { %v1139_v17 = vld [vmem:[%s1318_s24] sm:$0xff]   ;;  %v1140_v18 = vld [vmem:[%s1318_s24 + $0x8] sm:$0xff]   ;;  %v1141_v19 = vld [vmem:[%s1318_s24 + $0x10] sm:$0xff]   ;;  %p934_p13 = scmp.ne.s32.totalorder %s1193_s14, 2 }
  0x39   : > { %1033 = vmatprep.subr.bf16.mxu0 %v1139_v17  ;;  %1065 = vmatprep.subr.bf16.mxu1 %v1139_v17  ;;  %v1142_v20 = vld [vmem:[%s1318_s24 + $0x18] sm:$0xff]   ;;  %v1147_v21 = vld [vmem:[%s1325_s12] sm:$0xff]   ;;  %v1144_v24 = vld [vmem:[%s1318_s24 + $0x28] sm:$0xff]  }
  0x3a   : > { %1034 = vmatpush3.bf16.msra.mxu0 %v1139_v17  ;;  %1073 = vmatpush3.bf16.msra.mxu1 %v1139_v17  ;;  %v1148_v22 = vld [vmem:[%s1325_s12 + $0x20] sm:$0xff]   ;;  %v1145_v25 = vld [vmem:[%s1318_s24 + $0x30] sm:$0xff]   ;;  %v1146_v26 = vld [vmem:[%s1318_s24 + $0x38] sm:$0xff]  }
  0x3b   : > { %1035 = vmatprep.subr.bf16.mxu0 %v1140_v18  ;;  %1066 = vmatprep.subr.bf16.mxu1 %v1140_v18  ;;  %v1143_v23 = vld [vmem:[%s1318_s24 + $0x20] sm:$0xff]   ;;  %v1149_v27 = vld [vmem:[%s1325_s12 + $0x8] sm:$0xff]   ;;  %v1151_v29 = vld [vmem:[%s1325_s12 + $0x10] sm:$0xff]  }
  0x3c   : > { %1049 = vmatprep.mubr.bf16.mxu0 %v1147_v21  ;;  %1057 = vmatprep.mubr.bf16.mxu1 %v1148_v22  ;;  %v1150_v28 = vld [vmem:[%s1325_s12 + $0x28] sm:$0xff]   ;;  %v1152_v30 = vld [vmem:[%s1325_s12 + $0x30] sm:$0xff]   ;;  %v1153_v31 = vld [vmem:[%s1325_s12 + $0x18] sm:$0xff]  }
  0x3d   : > { %v1154_v32 = vld [vmem:[%s1325_s12 + $0x38] sm:$0xff]   ;;  %v376_v33 = vld [vmem:[#allocation2 + $0x10] sm:$0xff]  ;;  %v374_v35 = vld [vmem:[#allocation2] sm:$0xff] }
  0x3e   : > { %1036 = vmatpush3.bf16.msra.mxu0 %v1140_v18  ;;  %1074 = vmatpush3.bf16.msra.mxu1 %v1140_v18  ;;  %v384_v34 = vld [vmem:[#allocation2 + $0x50] sm:$0xff]  ;;  %v382_v36 = vld [vmem:[#allocation2 + $0x40] sm:$0xff]  ;;  %v377_v39 = vld [vmem:[#allocation2 + $0x18] sm:$0xff] }
  0x3f   : > { %1037 = vmatprep.subr.bf16.mxu0 %v1141_v19  ;;  %1067 = vmatprep.subr.bf16.mxu1 %v1141_v19  ;;  %v385_v40 = vld [vmem:[#allocation2 + $0x58] sm:$0xff]  ;;  %v375_v45 = vld [vmem:[#allocation2 + $0x8] sm:$0xff]  ;;  %v380_v57 = vld [vmem:[#allocation2 + $0x30] sm:$0xff] }
  0x40   : > { %v383_v46 = vld [vmem:[#allocation2 + $0x48] sm:$0xff]  ;;  %v388_v58 = vld [vmem:[#allocation2 + $0x70] sm:$0xff]  ;;  %v378_v59 = vld [vmem:[#allocation2 + $0x20] sm:$0xff] }
  0x41   : > { %v386_v60 = vld [vmem:[#allocation2 + $0x60] sm:$0xff]  ;;  %v381_v63 = vld [vmem:[#allocation2 + $0x38] sm:$0xff]  ;;  %v379_v5 = vld [vmem:[#allocation2 + $0x28] sm:$0xff] }
  0x42   : > { %1038 = vmatpush3.bf16.msra.mxu0 %v1141_v19  ;;  %1075 = vmatpush3.bf16.msra.mxu1 %v1141_v19  ;;  %v389_v0 = vld [vmem:[#allocation2 + $0x78] sm:$0xff]  ;;  %v387_v6 = vld [vmem:[#allocation2 + $0x68] sm:$0xff]  ;;  %v935_v19 = vld [vmem:[%s1379_s2] ss:$0 sm:$0xff] (!%p934_p13) }
  0x43   : > { %1039 = vmatprep.subr.bf16.mxu0 %v1142_v20  ;;  %1068 = vmatprep.subr.bf16.mxu1 %v1142_v20 }
  0x46   : > { %1040 = vmatpush3.bf16.msra.mxu0 %v1142_v20  ;;  %1076 = vmatpush3.bf16.msra.mxu1 %v1142_v20 }
  0x47   : > { %1041 = vmatprep.subr.bf16.mxu0 %v1143_v23  ;;  %1069 = vmatprep.subr.bf16.mxu1 %v1143_v23 }
  0x4a   : > { %1042 = vmatpush3.bf16.msra.mxu0 %v1143_v23  ;;  %1077 = vmatpush3.bf16.msra.mxu1 %v1143_v23 }
  0x4b   : > { %1043 = vmatprep.subr.bf16.mxu0 %v1144_v24  ;;  %1070 = vmatprep.subr.bf16.mxu1 %v1144_v24 }
  0x4e   : > { %1044 = vmatpush3.bf16.msra.mxu0 %v1144_v24  ;;  %1078 = vmatpush3.bf16.msra.mxu1 %v1144_v24 }
  0x4f   : > { %1045 = vmatprep.subr.bf16.mxu0 %v1145_v25  ;;  %1071 = vmatprep.subr.bf16.mxu1 %v1145_v25 }
  0x52   : > { %1046 = vmatpush3.bf16.msra.mxu0 %v1145_v25  ;;  %1079 = vmatpush3.bf16.msra.mxu1 %v1145_v25 }
  0x53   : > { %1047 = vmatprep.subr.bf16.mxu0 %v1146_v26  ;;  %1072 = vmatprep.subr.bf16.mxu1 %v1146_v26 }
  0x56   : > { %1048 = vmatpush3.bf16.msra.mxu0 %v1146_v26  ;;  %1080 = vmatpush3.bf16.msra.mxu1 %v1146_v26 }
  0x59   : > { %1050 = vmatmul.mubr.bf16.vlgmr.msra.gmra.mrb[0].mxu0 %v1149_v27  ;;  %1058 = vmatmul.mubr.bf16.vlgmr.msra.gmra.mrb[0].mxu1 %v1150_v28 }
  0x5a   : > { %1053 = vmatprep.mubr.bf16.mxu0 %v1151_v29  ;;  %1061 = vmatprep.mubr.bf16.mxu1 %v1152_v30 }
  0x61   : > { %1054 = vmatmul.mubr.bf16.gmra.mrb[4].mxu0 %v1153_v31  ;;  %1062 = vmatmul.mubr.bf16.gmra.mrb[4].mxu1 %v1154_v32 }
 0x12c   : > { %v1051_v37 = vpop.f32.mrb[0].mxu0  ;;  %v1059_v38 = vpop.f32.mrb[0].mxu1 }
 0x12d   : > { %v617_v41 = vadd.f32 %v1051_v37, %v376_v33  ;;  %v625_v42 = vadd.f32 %v1059_v38, %v384_v34  ;;  %v552_v43 = vpop.f32.mrb[1].mxu0  ;;  %v584_v44 = vpop.f32.mrb[1].mxu1 }
 0x12e   : > { %v615_v47 = vadd.f32 %v552_v43, %v374_v35  ;;  %v623_v48 = vadd.f32 %v584_v44, %v382_v36  ;;  %v1052_v49 = vpop.f32.mrb[2].mxu0  ;;  %v1060_v50 = vpop.f32.mrb[2].mxu1 }
 0x12f   : > { %633 = vst [vmem:[#allocation2 + $0x10] sm:$0xff] %v617_v41  ;;  %641 = vst [vmem:[#allocation2 + $0x50] sm:$0xff] %v625_v42  ;;  %v618_v51 = vadd.f32 %v1052_v49, %v377_v39  ;;  %v626_v52 = vadd.f32 %v1060_v50, %v385_v40  ;;  %v555_v53 = vpop.f32.mrb[3].mxu0  ;;  %v587_v54 = vpop.f32.mrb[3].mxu1 }
 0x130   : > { %631 = vst [vmem:[#allocation2] sm:$0xff] %v615_v47  ;;  %639 = vst [vmem:[#allocation2 + $0x40] sm:$0xff] %v623_v48  ;;  %v616_v55 = vadd.f32 %v555_v53, %v375_v45  ;;  %v624_v56 = vadd.f32 %v587_v54, %v383_v46 }
 0x131   : > { %634 = vst [vmem:[#allocation2 + $0x18] sm:$0xff] %v618_v51  ;;  %642 = vst [vmem:[#allocation2 + $0x58] sm:$0xff] %v626_v52 }
 0x132   : > { %632 = vst [vmem:[#allocation2 + $0x8] sm:$0xff] %v616_v55  ;;  %640 = vst [vmem:[#allocation2 + $0x48] sm:$0xff] %v624_v56 }
 0x134   : > { %v1055_v61 = vpop.f32.mrb[4].mxu0  ;;  %v1063_v62 = vpop.f32.mrb[4].mxu1  ;;  %650 = sbr.rel (%p934_p13) target bundleno = 330 (0x14a), region = 81 }
 0x135   : > { %v621_v1 = vadd.f32 %v1055_v61, %v380_v57  ;;  %v629_v2 = vadd.f32 %v1063_v62, %v388_v58  ;;  %v568_v3 = vpop.f32.mrb[5].mxu0  ;;  %v600_v4 = vpop.f32.mrb[5].mxu1 }
 0x136   : > { %v619_v7 = vadd.f32 %v568_v3, %v378_v59  ;;  %v627_v8 = vadd.f32 %v600_v4, %v386_v60  ;;  %v1056_v9 = vpop.f32.mrb[6].mxu0  ;;  %v1064_v10 = vpop.f32.mrb[6].mxu1  ;;  %v653_v22 = vld [vmem:[#allocation2 + $0x10] sm:$0xff] (!%p934_p13) }
 0x137   : > { %637 = vst [vmem:[#allocation2 + $0x30] sm:$0xff] %v621_v1  ;;  %645 = vst [vmem:[#allocation2 + $0x70] sm:$0xff] %v629_v2  ;;  %v622_v11 = vadd.f32 %v1056_v9, %v381_v63  ;;  %v630_v12 = vadd.f32 %v1064_v10, %v389_v0  ;;  %v571_v13 = vpop.f32.mrb[7].mxu0  ;;  %v603_v14 = vpop.f32.mrb[7].mxu1  ;;  %v651_v17 = vld [vmem:[#allocation2] sm:$0xff] (!%p934_p13)  ;;  %v676_v25 = vadd.f32 (!%p934_p13), %v935_v19, %v653_v22  ;;  %v661_v37 = vld [vmem:[#allocation2 + $0x50] sm:$0xff] (!%p934_p13) }
 0x138   : > { %635 = vst [vmem:[#allocation2 + $0x20] sm:$0xff] %v619_v7  ;;  %643 = vst [vmem:[#allocation2 + $0x60] sm:$0xff] %v627_v8  ;;  %v620_v15 = vadd.f32 %v571_v13, %v379_v5  ;;  %v628_v16 = vadd.f32 %v603_v14, %v387_v6  ;;  %v674_v20 = vadd.f32 (!%p934_p13), %v935_v19, %v651_v17  ;;  %v654_v23 = vld [vmem:[#allocation2 + $0x18] sm:$0xff] (!%p934_p13)  ;;  %v659_v35 = vld [vmem:[#allocation2 + $0x40] sm:$0xff] (!%p934_p13) }
 0x139   : > { %638 = vst [vmem:[#allocation2 + $0x38] sm:$0xff] %v622_v11  ;;  %646 = vst [vmem:[#allocation2 + $0x78] sm:$0xff] %v630_v12  ;;  %v652_v18 = vld [vmem:[#allocation2 + $0x8] sm:$0xff] (!%p934_p13)  ;;  %v677_v26 = vadd.f32 (!%p934_p13), %v935_v19, %v654_v23  ;;  %v692_v38 = vmax.f32 (!%p934_p13), %v676_v25, 0.0  ;;  %v662_v42 = vld [vmem:[#allocation2 + $0x58] sm:$0xff] (!%p934_p13)  ;;  %v682_v47 = vadd.f32 (!%p934_p13), %v935_v19, %v659_v35  ;;  %v684_v52 = vadd.f32 (!%p934_p13), %v935_v19, %v661_v37 }
 0x13a   : > { %636 = vst [vmem:[#allocation2 + $0x28] sm:$0xff] %v620_v15  ;;  %644 = vst [vmem:[#allocation2 + $0x68] sm:$0xff] %v628_v16  ;;  %v675_v21 = vadd.f32 (!%p934_p13), %v935_v19, %v652_v18  ;;  %v690_v31 = vmax.f32 (!%p934_p13), %v674_v20, 0.0  ;;  %v660_v36 = vld [vmem:[#allocation2 + $0x48] sm:$0xff] (!%p934_p13)  ;;  %v685_v57 = vadd.f32 (!%p934_p13), %v935_v19, %v662_v42 }
 0x13b   : > { %v693_v39 = vmax.f32 %v677_v26, 0.0  ;;  %v683_v51 = vadd.f32 %v935_v19, %v660_v36  ;;  %v698_v56 = vmax.f32 %v682_v47, 0.0  ;;  %v700_v61 = vmax.f32 %v684_v52, 0.0 }
 0x13c   : > { %v691_v32 = vmax.f32 %v675_v21, 0.0  ;;  %v701_v63 = vmax.f32 %v685_v57, 0.0 }
 0x13d   : > { %v978_v49 = vpack.c.bf16 %v693_v39, %v692_v38  ;;  %v699_v60 = vmax.f32 %v683_v51, 0.0 }
 0x13e   : > { %v657_v29 = vld [vmem:[#allocation2 + $0x30] sm:$0xff]  ;;  %v973_v44 = vpack.c.bf16 %v691_v32, %v690_v31  ;;  %v998_v5 = vpack.c.bf16 %v701_v63, %v700_v61 }
 0x13f   : > { %v655_v24 = vld [vmem:[#allocation2 + $0x20] sm:$0xff]  ;;  %v680_v34 = vadd.f32 %v935_v19, %v657_v29  ;;  %v665_v53 = vld [vmem:[#allocation2 + $0x70] sm:$0xff]  ;;  %1010 = vst [vmem:[%s1323_s29 + $0x8] sm:$0xff] %v978_v49   ;;  %v993_v3 = vpack.c.bf16 %v699_v60, %v698_v56 }
 0x140   : > { %v678_v28 = vadd.f32 %v935_v19, %v655_v24  ;;  %v658_v30 = vld [vmem:[#allocation2 + $0x38] sm:$0xff]  ;;  %v663_v43 = vld [vmem:[#allocation2 + $0x60] sm:$0xff]  ;;  %974 = vst [vmem:[%s1323_s29] sm:$0xff] %v973_v44   ;;  %v688_v1 = vadd.f32 %v935_v19, %v665_v53  ;;  %1014 = vst [vmem:[%s1323_s29 + $0x28] sm:$0xff] %v998_v5  }
 0x141   : > { %v656_v27 = vld [vmem:[#allocation2 + $0x28] sm:$0xff]  ;;  %v681_v41 = vadd.f32 %v935_v19, %v658_v30  ;;  %v696_v46 = vmax.f32 %v680_v34, 0.0  ;;  %v666_v54 = vld [vmem:[#allocation2 + $0x78] sm:$0xff]  ;;  %v686_v58 = vadd.f32 %v935_v19, %v663_v43  ;;  %1013 = vst [vmem:[%s1323_s29 + $0x20] sm:$0xff] %v993_v3  }
 0x142   : > { %v679_v33 = vadd.f32 %v935_v19, %v656_v27  ;;  %v694_v40 = vmax.f32 %v678_v28, 0.0  ;;  %v664_v48 = vld [vmem:[#allocation2 + $0x68] sm:$0xff]  ;;  %v689_v2 = vadd.f32 %v935_v19, %v666_v54  ;;  %v704_v6 = vmax.f32 %v688_v1, 0.0 }
 0x143   : > { %v697_v50 = vmax.f32 %v681_v41, 0.0  ;;  %v687_v62 = vadd.f32 %v935_v19, %v664_v48  ;;  %v702_v0 = vmax.f32 %v686_v58, 0.0 }
 0x144   : > { %v695_v45 = vmax.f32 %v679_v33, 0.0  ;;  %v705_v7 = vmax.f32 %v689_v2, 0.0 }
 0x145   : > { %v988_v59 = vpack.c.bf16 %v697_v50, %v696_v46  ;;  %v703_v4 = vmax.f32 %v687_v62, 0.0 }
 0x146   : > { %v983_v55 = vpack.c.bf16 %v695_v45, %v694_v40  ;;  %v1008_v9 = vpack.c.bf16 %v705_v7, %v704_v6 }
 0x147   : > { %1012 = vst [vmem:[%s1323_s29 + $0x18] sm:$0xff] %v988_v59   ;;  %v1003_v8 = vpack.c.bf16 %v703_v4, %v702_v0 }
 0x148   : > { %1011 = vst [vmem:[%s1323_s29 + $0x10] sm:$0xff] %v983_v55   ;;  %1016 = vst [vmem:[%s1323_s29 + $0x38] sm:$0xff] %v1008_v9  }
 0x149   : > { %1015 = vst [vmem:[%s1323_s29 + $0x30] sm:$0xff] %v1003_v8  }
 0x14a PF: > { %s13_s18 = sadd.s32 1, %s1209_s18   ;;  %s1381_s12 = smov %s1189_s13 }
 0x14b   : > { %p10_p0 = scmp.ge.s32.totalorder %s13_s18, 14   ;;  %s1382_s13 = smov %s1283_s25 }
 0x14c   : > { %s1383_s14 = smov %s1201_s16  ;;  %s1384_s15 = smov %s1205_s17 }
 0x14d   : > { %s1385_s16 = smov %s1388_s19  ;;  %s1386_s17 = smov %s1392_s20 }
 0x14e   :  { %12 = sbr.rel (!%p10_p0) target bundleno = 4 (0x4), region = 122 }

// kernel: forward.14
= control target key start
LH: loop header
LB: loop body
LE: loop exit
PB: predicated region body
PF: predicated region fallthrough
CT: control target
= control target key end

     0   :  { %s1374_s12 = smov 0   ;;  %s1376_s13 = smov 0   ;;  %s1645_s0 = inlined_call_operand.vmem [shape: bf16[512,128], index: 0, kind: input, shape index: {}]   ;;  %s1646_s1 = inlined_call_operand.vmem [shape: bf16[128,512], index: 1, kind: input, shape index: {}]   ;;  %s1647_s2 = inlined_call_operand.vmem [shape: f32[1,512], index: 2, kind: input, shape index: {}]   ;;  %s1648_s3 = inlined_call_operand.vmem [shape: bf16[512,512], index: 3, kind: output, shape index: {}]  }
   0x1   :  { %s1378_s14 = smov 0  }
   0x2 LB: > { %s32_s15 = sadd.s32 1, %s1347_s13  ;;  %p1135_p0 = scmp.ge.s32.totalorder %s1351_s14, 1  ;;  %s1351_s14 = sphi %s1378_s14, %s13_s14   ;;  %s1347_s13 = sphi %s1376_s13, %s1650_s13   ;;  %s1343_s12 = sphi %s1374_s12, %s1649_s12  }
   0x3   : > { %p34_p1 = scmp.ge.s32.totalorder %s32_s15, 4  ;;  %p193_p2 = scmp.lt.s32.totalorder %s1351_s14, 5 }
   0x5   : > { %s1652_s15 = smov (%p34_p1, %s32_s15), 0  ;;  %p194_p3 = pnand %p1135_p0, %p193_p2 }
   0x6   : > { %v1273_v0 = vld [vmem:[%s1646_s1 + $0x4] ss:$16 sps:$4 sm:$0xff] (!%p194_p3)   ;;  %v1275_v1 = vld [vmem:[%s1646_s1 + $0xc] ss:$16 sps:$4 sm:$0xff] (!%p194_p3)   ;;  %v1353_v2 = vmov (!%p194_p3), 0   ;;  %s1136_s7 = sshll.u32 (!%p194_p3), %s1343_s12, 4  ;;  %v328_v41 = vlaneseq (!%p194_p3) }
   0x7   : > { %197 = sbr.rel (%p194_p3) target bundleno = 316 (0x13c), region = 32  ;;  %588 = vmatprep.mubr.bf16.mxu0 (!%p194_p3), %v1353_v2  ;;  %701 = vmatprep.mubr.bf16.mxu1 (!%p194_p3), %v1353_v2  ;;  %v1277_v3 = vld [vmem:[%s1646_s1] ss:$16 sps:$4 sm:$0xff] (!%p194_p3)   ;;  %v1278_v4 = vld [vmem:[%s1646_s1 + $0x8] ss:$16 sps:$4 sm:$0xff] (!%p194_p3)   ;;  %p240_p4 = scmp.lt.s32.totalorder (!%p194_p3), %s1136_s7, 63 }
   0x8   : > { %556 = vmatprep.subr.bf16.mxu0 (!%p194_p3), %v1273_v0  ;;  %669 = vmatprep.subr.bf16.mxu1 (!%p194_p3), %v1275_v1  ;;  %v1279_v5 = vld [vmem:[%s1646_s1 + $0x24] ss:$16 sps:$4 sm:$0xff] (!%p194_p3)   ;;  %v1281_v6 = vld [vmem:[%s1646_s1 + $0x2c] ss:$16 sps:$4 sm:$0xff] (!%p194_p3)   ;;  %v1283_v7 = vld [vmem:[%s1646_s1 + $0x20] ss:$16 sps:$4 sm:$0xff] (!%p194_p3)  }
   0x9   : > { %557 = vmatpush1.bf16.msra.mxu0 (!%p194_p3), %v1277_v3  ;;  %670 = vmatpush1.bf16.msra.mxu1 (!%p194_p3), %v1278_v4  ;;  %v1284_v8 = vld [vmem:[%s1646_s1 + $0x28] ss:$16 sps:$4 sm:$0xff] (!%p194_p3)   ;;  %v1285_v9 = vld [vmem:[%s1646_s1 + $0x44] ss:$16 sps:$4 sm:$0xff] (!%p194_p3)   ;;  %v1287_v10 = vld [vmem:[%s1646_s1 + $0x4c] ss:$16 sps:$4 sm:$0xff] (!%p194_p3)  }
   0xa   : > { %558 = vmatprep.subr.bf16.mxu0 (!%p194_p3), %v1279_v5  ;;  %671 = vmatprep.subr.bf16.mxu1 (!%p194_p3), %v1281_v6  ;;  %v1289_v11 = vld [vmem:[%s1646_s1 + $0x40] ss:$16 sps:$4 sm:$0xff] (!%p194_p3)   ;;  %v1290_v12 = vld [vmem:[%s1646_s1 + $0x48] ss:$16 sps:$4 sm:$0xff] (!%p194_p3)   ;;  %v1291_v13 = vld [vmem:[%s1646_s1 + $0x64] ss:$16 sps:$4 sm:$0xff] (!%p194_p3)  }
   0xb   : > { %v1293_v14 = vld [vmem:[%s1646_s1 + $0x6c] ss:$16 sps:$4 sm:$0xff] (!%p194_p3)   ;;  %v1295_v15 = vld [vmem:[%s1646_s1 + $0x60] ss:$16 sps:$4 sm:$0xff] (!%p194_p3)   ;;  %v1296_v16 = vld [vmem:[%s1646_s1 + $0x68] ss:$16 sps:$4 sm:$0xff] (!%p194_p3)  }
   0xc   : > { %v1297_v17 = vld [vmem:[%s1646_s1 + $0x84] ss:$16 sps:$4 sm:$0xff] (!%p194_p3)   ;;  %v1299_v18 = vld [vmem:[%s1646_s1 + $0x8c] ss:$16 sps:$4 sm:$0xff] (!%p194_p3)   ;;  %v1301_v19 = vld [vmem:[%s1646_s1 + $0x80] ss:$16 sps:$4 sm:$0xff] (!%p194_p3)  }
   0xd   : > { %559 = vmatpush1.bf16.msra.mxu0 (!%p194_p3), %v1283_v7  ;;  %672 = vmatpush1.bf16.msra.mxu1 (!%p194_p3), %v1284_v8  ;;  %v1302_v20 = vld [vmem:[%s1646_s1 + $0x88] ss:$16 sps:$4 sm:$0xff] (!%p194_p3)   ;;  %v1303_v21 = vld [vmem:[%s1646_s1 + $0xa4] ss:$16 sps:$4 sm:$0xff] (!%p194_p3)   ;;  %v1305_v22 = vld [vmem:[%s1646_s1 + $0xac] ss:$16 sps:$4 sm:$0xff] (!%p194_p3)  }
   0xe   : > { %560 = vmatprep.subr.bf16.mxu0 %v1285_v9  ;;  %673 = vmatprep.subr.bf16.mxu1 %v1287_v10  ;;  %s1654_s7 = smov (!%p240_p4, %s1136_s7), 63  ;;  %v1307_v23 = vld [vmem:[%s1646_s1 + $0xa0] ss:$16 sps:$4 sm:$0xff]   ;;  %v1308_v24 = vld [vmem:[%s1646_s1 + $0xa8] ss:$16 sps:$4 sm:$0xff]   ;;  %v329_v42 = vshrl.u32 %v328_v41, 7 }
   0xf   : > { %s1137_s11 = sshll.u32 %s1654_s7, 2  ;;  %v1309_v25 = vld [vmem:[%s1646_s1 + $0xc4] ss:$16 sps:$4 sm:$0xff]   ;;  %v1311_v26 = vld [vmem:[%s1646_s1 + $0xcc] ss:$16 sps:$4 sm:$0xff]   ;;  %s1215_s18 = sshll.u32 %s1654_s7, 4 }
  0x10   : > { %s1478_s23 = scalar_lea.vmem %s1645_s0, %s1137_s11  ;;  %v1313_v27 = vld [vmem:[%s1646_s1 + $0xc0] ss:$16 sps:$4 sm:$0xff]   ;;  %v1314_v28 = vld [vmem:[%s1646_s1 + $0xc8] ss:$16 sps:$4 sm:$0xff]   ;;  %v1315_v29 = vld [vmem:[%s1646_s1 + $0xe4] ss:$16 sps:$4 sm:$0xff]   ;;  %s1542_s20 = scalar_lea.vmem %s1648_s3, %s1215_s18 }
  0x11   : > { %561 = vmatpush1.bf16.msra.mxu0 %v1289_v11  ;;  %674 = vmatpush1.bf16.msra.mxu1 %v1290_v12  ;;  %v1317_v30 = vld [vmem:[%s1646_s1 + $0xec] ss:$16 sps:$4 sm:$0xff]   ;;  %v1319_v31 = vld [vmem:[%s1646_s1 + $0xe0] ss:$16 sps:$4 sm:$0xff]   ;;  %v1320_v32 = vld [vmem:[%s1646_s1 + $0xe8] ss:$16 sps:$4 sm:$0xff]  }
  0x12   : > { %562 = vmatprep.subr.bf16.mxu0 %v1291_v13  ;;  %675 = vmatprep.subr.bf16.mxu1 %v1293_v14  ;;  %v1321_v33 = vld [vmem:[%s1478_s23] sm:$0xff]   ;;  %v1322_v34 = vld [vmem:[%s1478_s23 + $0x8] sm:$0xff]   ;;  %v1323_v35 = vld [vmem:[%s1478_s23 + $0x10] sm:$0xff]   ;;  %v330_v43 = vsub.s32 0, %v329_v42  ;;  %v338_v44 = vsub.s32 2, %v329_v42  ;;  %v334_v46 = vsub.s32 1, %v329_v42 }
  0x13   : > { %v1324_v36 = vld [vmem:[%s1478_s23 + $0x18] sm:$0xff]   ;;  %v1325_v37 = vld [vmem:[%s1478_s23 + $0x20] sm:$0xff]   ;;  %v1326_v38 = vld [vmem:[%s1478_s23 + $0x28] sm:$0xff]   ;;  %v342_v47 = vsub.s32 3, %v329_v42 }
  0x14   : > { %v1327_v39 = vld [vmem:[%s1478_s23 + $0x30] sm:$0xff]   ;;  %v1328_v40 = vld [vmem:[%s1478_s23 + $0x38] sm:$0xff]   ;;  %v326_v45 = vld [vmem:[%s1647_s2] sm:$0xf] }
  0x15   : > { %563 = vmatpush1.bf16.msra.mxu0 %v1295_v15  ;;  %676 = vmatpush1.bf16.msra.mxu1 %v1296_v16  ;;  %v1526_v48 = vrot.slane %v326_v45, %v330_v43  ;;  %v1528_v49 = vrot.slane %v326_v45, %v338_v44  ;;  %v1530_v50 = vrot.slane %v326_v45, %v334_v46 }
  0x16   : > { %564 = vmatprep.subr.bf16.mxu0 %v1297_v17  ;;  %677 = vmatprep.subr.bf16.mxu1 %v1299_v18  ;;  %v1532_v51 = vrot.slane %v326_v45, %v342_v47 }
  0x19   : > { %565 = vmatpush1.bf16.msra.mxu0 %v1301_v19  ;;  %678 = vmatpush1.bf16.msra.mxu1 %v1302_v20 }
  0x1a   : > { %566 = vmatprep.subr.bf16.mxu0 %v1303_v21  ;;  %679 = vmatprep.subr.bf16.mxu1 %v1305_v22 }
  0x1d   : > { %567 = vmatpush1.bf16.msra.mxu0 %v1307_v23  ;;  %680 = vmatpush1.bf16.msra.mxu1 %v1308_v24 }
  0x1e   : > { %568 = vmatprep.subr.bf16.mxu0 %v1309_v25  ;;  %681 = vmatprep.subr.bf16.mxu1 %v1311_v26 }
  0x21   : > { %569 = vmatpush1.bf16.msra.mxu0 %v1313_v27  ;;  %682 = vmatpush1.bf16.msra.mxu1 %v1314_v28 }
  0x22   : > { %570 = vmatprep.subr.bf16.mxu0 %v1315_v29  ;;  %683 = vmatprep.subr.bf16.mxu1 %v1317_v30 }
  0x25   : > { %571 = vmatpush1.bf16.msra.mxu0 %v1319_v31  ;;  %684 = vmatpush1.bf16.msra.mxu1 %v1320_v32 }
  0x28   : > { %589 = vmatmul.mubr.bf16.vlgmr.msra.gmra.mrb[0].mxu0 %v1321_v33  ;;  %702 = vmatmul.mubr.bf16.vlgmr.msra.gmra.mrb[0].mxu1 %v1321_v33 }
  0x29   : > { %598 = vmatprep.mubr.bf16.mxu0 %v1353_v2  ;;  %711 = vmatprep.mubr.bf16.mxu1 %v1353_v2 }
  0x30   : > { %599 = vmatmul.mubr.bf16.gmra.mrb[4].mxu0 %v1322_v34  ;;  %712 = vmatmul.mubr.bf16.gmra.mrb[4].mxu1 %v1322_v34 }
  0x31   : > { %608 = vmatprep.mubr.bf16.mxu0 %v1353_v2  ;;  %721 = vmatprep.mubr.bf16.mxu1 %v1353_v2 }
  0x38   : > { %609 = vmatmul.mubr.bf16.gmra.mrb[8].mxu0 %v1323_v35  ;;  %722 = vmatmul.mubr.bf16.gmra.mrb[8].mxu1 %v1323_v35 }
  0x39   : > { %618 = vmatprep.mubr.bf16.mxu0 %v1353_v2  ;;  %731 = vmatprep.mubr.bf16.mxu1 %v1353_v2 }
  0x40   : > { %619 = vmatmul.mubr.bf16.gmra.mrb[12].mxu0 %v1324_v36  ;;  %732 = vmatmul.mubr.bf16.gmra.mrb[12].mxu1 %v1324_v36 }
  0x41   : > { %628 = vmatprep.mubr.bf16.mxu0 %v1353_v2  ;;  %741 = vmatprep.mubr.bf16.mxu1 %v1353_v2 }
  0x48   : > { %629 = vmatmul.mubr.bf16.gmra.mrb[16].mxu0 %v1325_v37  ;;  %742 = vmatmul.mubr.bf16.gmra.mrb[16].mxu1 %v1325_v37 }
  0x49   : > { %638 = vmatprep.mubr.bf16.mxu0 %v1353_v2  ;;  %751 = vmatprep.mubr.bf16.mxu1 %v1353_v2 }
  0x50   : > { %639 = vmatmul.mubr.bf16.gmra.mrb[20].mxu0 %v1326_v38  ;;  %752 = vmatmul.mubr.bf16.gmra.mrb[20].mxu1 %v1326_v38 }
  0x51   : > { %648 = vmatprep.mubr.bf16.mxu0 %v1353_v2  ;;  %761 = vmatprep.mubr.bf16.mxu1 %v1353_v2 }
  0x58   : > { %649 = vmatmul.mubr.bf16.gmra.mrb[24].mxu0 %v1327_v39  ;;  %762 = vmatmul.mubr.bf16.gmra.mrb[24].mxu1 %v1327_v39 }
  0x59   : > { %658 = vmatprep.mubr.bf16.mxu0 %v1353_v2  ;;  %771 = vmatprep.mubr.bf16.mxu1 %v1353_v2 }
  0x60   : > { %659 = vmatmul.mubr.bf16.gmra.mrb[28].mxu0 %v1328_v40  ;;  %772 = vmatmul.mubr.bf16.gmra.mrb[28].mxu1 %v1328_v40 }
  0xfb   : > { %v590_v52 = vpop.f32.mrb[0].mxu0  ;;  %v703_v53 = vpop.f32.mrb[0].mxu1 }
  0xfc   : > { %v591_v54 = vadd.f32 %v590_v52, %v1526_v48  ;;  %v704_v55 = vadd.f32 %v703_v53, %v1528_v49  ;;  %v592_v56 = vpop.f32.mrb[1].mxu0  ;;  %v705_v57 = vpop.f32.mrb[1].mxu1 }
  0xfd   : > { %v593_v58 = vadd.f32 %v592_v56, %v1530_v50  ;;  %v706_v59 = vadd.f32 %v705_v57, %v1532_v51  ;;  %v594_v60 = vpop.f32.mrb[2].mxu0  ;;  %v707_v61 = vpop.f32.mrb[2].mxu1 }
  0xfe   : > { %v595_v62 = vadd.f32 %v594_v60, %v1526_v48  ;;  %v708_v63 = vadd.f32 %v707_v61, %v1528_v49  ;;  %v596_v0 = vpop.f32.mrb[3].mxu0  ;;  %v709_v1 = vpop.f32.mrb[3].mxu1 }
  0xff   : > { %v1216_v2 = vpack.c.bf16 %v593_v58, %v591_v54  ;;  %v1217_v3 = vpack.c.bf16 %v706_v59, %v704_v55  ;;  %v597_v4 = vadd.f32 %v596_v0, %v1530_v50  ;;  %v710_v5 = vadd.f32 %v709_v1, %v1532_v51 }
 0x101   : > { %974 = vst [vmem:[%s1542_s20] sm:$0xff] %v1216_v2  ;;  %975 = vst [vmem:[%s1542_s20 + $0x8] sm:$0xff] %v1217_v3  ;;  %v1218_v6 = vpack.c.bf16 %v597_v4, %v595_v62  ;;  %v1219_v7 = vpack.c.bf16 %v710_v5, %v708_v63 }
 0x103   : > { %976 = vst [vmem:[%s1542_s20 + $0x10] sm:$0xff] %v1218_v6  ;;  %977 = vst [vmem:[%s1542_s20 + $0x18] sm:$0xff] %v1219_v7  ;;  %v600_v8 = vpop.f32.mrb[4].mxu0  ;;  %v713_v9 = vpop.f32.mrb[4].mxu1 }
 0x104   : > { %v601_v10 = vadd.f32 %v600_v8, %v1526_v48  ;;  %v714_v11 = vadd.f32 %v713_v9, %v1528_v49  ;;  %v602_v12 = vpop.f32.mrb[5].mxu0  ;;  %v715_v13 = vpop.f32.mrb[5].mxu1 }
 0x105   : > { %v603_v14 = vadd.f32 %v602_v12, %v1530_v50  ;;  %v716_v15 = vadd.f32 %v715_v13, %v1532_v51  ;;  %v604_v16 = vpop.f32.mrb[6].mxu0  ;;  %v717_v17 = vpop.f32.mrb[6].mxu1 }
 0x106   : > { %v605_v18 = vadd.f32 %v604_v16, %v1526_v48  ;;  %v718_v19 = vadd.f32 %v717_v17, %v1528_v49  ;;  %v606_v20 = vpop.f32.mrb[7].mxu0  ;;  %v719_v21 = vpop.f32.mrb[7].mxu1 }
 0x107   : > { %v1220_v22 = vpack.c.bf16 %v603_v14, %v601_v10  ;;  %v1221_v23 = vpack.c.bf16 %v716_v15, %v714_v11  ;;  %v607_v24 = vadd.f32 %v606_v20, %v1530_v50  ;;  %v720_v25 = vadd.f32 %v719_v21, %v1532_v51 }
 0x109   : > { %978 = vst [vmem:[%s1542_s20 + $0x20] sm:$0xff] %v1220_v22  ;;  %979 = vst [vmem:[%s1542_s20 + $0x28] sm:$0xff] %v1221_v23  ;;  %v1222_v26 = vpack.c.bf16 %v607_v24, %v605_v18  ;;  %v1223_v27 = vpack.c.bf16 %v720_v25, %v718_v19 }
 0x10b   : > { %980 = vst [vmem:[%s1542_s20 + $0x30] sm:$0xff] %v1222_v26  ;;  %981 = vst [vmem:[%s1542_s20 + $0x38] sm:$0xff] %v1223_v27  ;;  %v610_v28 = vpop.f32.mrb[8].mxu0  ;;  %v723_v29 = vpop.f32.mrb[8].mxu1 }
 0x10c   : > { %v611_v30 = vadd.f32 %v610_v28, %v1526_v48  ;;  %v724_v31 = vadd.f32 %v723_v29, %v1528_v49  ;;  %v612_v32 = vpop.f32.mrb[9].mxu0  ;;  %v725_v33 = vpop.f32.mrb[9].mxu1 }
 0x10d   : > { %v613_v34 = vadd.f32 %v612_v32, %v1530_v50  ;;  %v726_v35 = vadd.f32 %v725_v33, %v1532_v51  ;;  %v614_v36 = vpop.f32.mrb[10].mxu0  ;;  %v727_v37 = vpop.f32.mrb[10].mxu1 }
 0x10e   : > { %v615_v38 = vadd.f32 %v614_v36, %v1526_v48  ;;  %v728_v39 = vadd.f32 %v727_v37, %v1528_v49  ;;  %v616_v40 = vpop.f32.mrb[11].mxu0  ;;  %v729_v41 = vpop.f32.mrb[11].mxu1 }
 0x10f   : > { %v1224_v42 = vpack.c.bf16 %v613_v34, %v611_v30  ;;  %v1225_v43 = vpack.c.bf16 %v726_v35, %v724_v31  ;;  %v617_v44 = vadd.f32 %v616_v40, %v1530_v50  ;;  %v730_v45 = vadd.f32 %v729_v41, %v1532_v51 }
 0x111   : > { %982 = vst [vmem:[%s1542_s20 + $0x40] sm:$0xff] %v1224_v42  ;;  %983 = vst [vmem:[%s1542_s20 + $0x48] sm:$0xff] %v1225_v43  ;;  %v1226_v46 = vpack.c.bf16 %v617_v44, %v615_v38  ;;  %v1227_v47 = vpack.c.bf16 %v730_v45, %v728_v39 }
 0x113   : > { %984 = vst [vmem:[%s1542_s20 + $0x50] sm:$0xff] %v1226_v46  ;;  %985 = vst [vmem:[%s1542_s20 + $0x58] sm:$0xff] %v1227_v47  ;;  %v620_v52 = vpop.f32.mrb[12].mxu0  ;;  %v733_v53 = vpop.f32.mrb[12].mxu1 }
 0x114   : > { %v621_v54 = vadd.f32 %v620_v52, %v1526_v48  ;;  %v734_v55 = vadd.f32 %v733_v53, %v1528_v49  ;;  %v622_v56 = vpop.f32.mrb[13].mxu0  ;;  %v735_v57 = vpop.f32.mrb[13].mxu1 }
 0x115   : > { %v623_v58 = vadd.f32 %v622_v56, %v1530_v50  ;;  %v736_v59 = vadd.f32 %v735_v57, %v1532_v51  ;;  %v624_v60 = vpop.f32.mrb[14].mxu0  ;;  %v737_v61 = vpop.f32.mrb[14].mxu1 }
 0x116   : > { %v625_v62 = vadd.f32 %v624_v60, %v1526_v48  ;;  %v738_v63 = vadd.f32 %v737_v61, %v1528_v49  ;;  %v626_v0 = vpop.f32.mrb[15].mxu0  ;;  %v739_v1 = vpop.f32.mrb[15].mxu1 }
 0x117   : > { %v1228_v2 = vpack.c.bf16 %v623_v58, %v621_v54  ;;  %v1229_v3 = vpack.c.bf16 %v736_v59, %v734_v55  ;;  %v627_v4 = vadd.f32 %v626_v0, %v1530_v50  ;;  %v740_v5 = vadd.f32 %v739_v1, %v1532_v51 }
 0x119   : > { %986 = vst [vmem:[%s1542_s20 + $0x60] sm:$0xff] %v1228_v2  ;;  %987 = vst [vmem:[%s1542_s20 + $0x68] sm:$0xff] %v1229_v3  ;;  %v1230_v6 = vpack.c.bf16 %v627_v4, %v625_v62  ;;  %v1231_v7 = vpack.c.bf16 %v740_v5, %v738_v63 }
 0x11b   : > { %988 = vst [vmem:[%s1542_s20 + $0x70] sm:$0xff] %v1230_v6  ;;  %989 = vst [vmem:[%s1542_s20 + $0x78] sm:$0xff] %v1231_v7  ;;  %v630_v8 = vpop.f32.mrb[16].mxu0  ;;  %v743_v9 = vpop.f32.mrb[16].mxu1 }
 0x11c   : > { %v631_v10 = vadd.f32 %v630_v8, %v1526_v48  ;;  %v744_v11 = vadd.f32 %v743_v9, %v1528_v49  ;;  %v632_v12 = vpop.f32.mrb[17].mxu0  ;;  %v745_v13 = vpop.f32.mrb[17].mxu1 }
 0x11d   : > { %v633_v14 = vadd.f32 %v632_v12, %v1530_v50  ;;  %v746_v15 = vadd.f32 %v745_v13, %v1532_v51  ;;  %v634_v16 = vpop.f32.mrb[18].mxu0  ;;  %v747_v17 = vpop.f32.mrb[18].mxu1 }
 0x11e   : > { %v635_v18 = vadd.f32 %v634_v16, %v1526_v48  ;;  %v748_v19 = vadd.f32 %v747_v17, %v1528_v49  ;;  %v636_v20 = vpop.f32.mrb[19].mxu0  ;;  %v749_v21 = vpop.f32.mrb[19].mxu1 }
 0x11f   : > { %v1232_v22 = vpack.c.bf16 %v633_v14, %v631_v10  ;;  %v1233_v23 = vpack.c.bf16 %v746_v15, %v744_v11  ;;  %v637_v24 = vadd.f32 %v636_v20, %v1530_v50  ;;  %v750_v25 = vadd.f32 %v749_v21, %v1532_v51 }
 0x121   : > { %990 = vst [vmem:[%s1542_s20 + $0x80] sm:$0xff] %v1232_v22  ;;  %991 = vst [vmem:[%s1542_s20 + $0x88] sm:$0xff] %v1233_v23  ;;  %v1234_v26 = vpack.c.bf16 %v637_v24, %v635_v18  ;;  %v1235_v27 = vpack.c.bf16 %v750_v25, %v748_v19 }
 0x123   : > { %992 = vst [vmem:[%s1542_s20 + $0x90] sm:$0xff] %v1234_v26  ;;  %993 = vst [vmem:[%s1542_s20 + $0x98] sm:$0xff] %v1235_v27  ;;  %v640_v28 = vpop.f32.mrb[20].mxu0  ;;  %v753_v29 = vpop.f32.mrb[20].mxu1 }
 0x124   : > { %v641_v30 = vadd.f32 %v640_v28, %v1526_v48  ;;  %v754_v31 = vadd.f32 %v753_v29, %v1528_v49  ;;  %v642_v32 = vpop.f32.mrb[21].mxu0  ;;  %v755_v33 = vpop.f32.mrb[21].mxu1 }
 0x125   : > { %v643_v34 = vadd.f32 %v642_v32, %v1530_v50  ;;  %v756_v35 = vadd.f32 %v755_v33, %v1532_v51  ;;  %v644_v36 = vpop.f32.mrb[22].mxu0  ;;  %v757_v37 = vpop.f32.mrb[22].mxu1 }
 0x126   : > { %v645_v38 = vadd.f32 %v644_v36, %v1526_v48  ;;  %v758_v39 = vadd.f32 %v757_v37, %v1528_v49  ;;  %v646_v40 = vpop.f32.mrb[23].mxu0  ;;  %v759_v41 = vpop.f32.mrb[23].mxu1 }
 0x127   : > { %v1236_v42 = vpack.c.bf16 %v643_v34, %v641_v30  ;;  %v1237_v43 = vpack.c.bf16 %v756_v35, %v754_v31  ;;  %v647_v44 = vadd.f32 %v646_v40, %v1530_v50  ;;  %v760_v45 = vadd.f32 %v759_v41, %v1532_v51 }
 0x129   : > { %994 = vst [vmem:[%s1542_s20 + $0xa0] sm:$0xff] %v1236_v42  ;;  %995 = vst [vmem:[%s1542_s20 + $0xa8] sm:$0xff] %v1237_v43  ;;  %v1238_v46 = vpack.c.bf16 %v647_v44, %v645_v38  ;;  %v1239_v47 = vpack.c.bf16 %v760_v45, %v758_v39 }
 0x12b   : > { %996 = vst [vmem:[%s1542_s20 + $0xb0] sm:$0xff] %v1238_v46  ;;  %997 = vst [vmem:[%s1542_s20 + $0xb8] sm:$0xff] %v1239_v47  ;;  %v650_v52 = vpop.f32.mrb[24].mxu0  ;;  %v763_v53 = vpop.f32.mrb[24].mxu1 }
 0x12c   : > { %v651_v54 = vadd.f32 %v650_v52, %v1526_v48  ;;  %v764_v55 = vadd.f32 %v763_v53, %v1528_v49  ;;  %v652_v56 = vpop.f32.mrb[25].mxu0  ;;  %v765_v57 = vpop.f32.mrb[25].mxu1 }
 0x12d   : > { %v653_v58 = vadd.f32 %v652_v56, %v1530_v50  ;;  %v766_v59 = vadd.f32 %v765_v57, %v1532_v51  ;;  %v654_v60 = vpop.f32.mrb[26].mxu0  ;;  %v767_v61 = vpop.f32.mrb[26].mxu1 }
 0x12e   : > { %v655_v62 = vadd.f32 %v654_v60, %v1526_v48  ;;  %v768_v63 = vadd.f32 %v767_v61, %v1528_v49  ;;  %v656_v0 = vpop.f32.mrb[27].mxu0  ;;  %v769_v1 = vpop.f32.mrb[27].mxu1 }
 0x12f   : > { %v1240_v2 = vpack.c.bf16 %v653_v58, %v651_v54  ;;  %v1241_v3 = vpack.c.bf16 %v766_v59, %v764_v55  ;;  %v657_v4 = vadd.f32 %v656_v0, %v1530_v50  ;;  %v770_v5 = vadd.f32 %v769_v1, %v1532_v51 }
 0x131   : > { %998 = vst [vmem:[%s1542_s20 + $0xc0] sm:$0xff] %v1240_v2  ;;  %999 = vst [vmem:[%s1542_s20 + $0xc8] sm:$0xff] %v1241_v3  ;;  %v1242_v6 = vpack.c.bf16 %v657_v4, %v655_v62  ;;  %v1243_v7 = vpack.c.bf16 %v770_v5, %v768_v63 }
 0x133   : > { %1000 = vst [vmem:[%s1542_s20 + $0xd0] sm:$0xff] %v1242_v6  ;;  %1001 = vst [vmem:[%s1542_s20 + $0xd8] sm:$0xff] %v1243_v7  ;;  %v660_v8 = vpop.f32.mrb[28].mxu0  ;;  %v773_v9 = vpop.f32.mrb[28].mxu1 }
 0x134   : > { %v661_v10 = vadd.f32 %v660_v8, %v1526_v48  ;;  %v774_v11 = vadd.f32 %v773_v9, %v1528_v49  ;;  %v662_v12 = vpop.f32.mrb[29].mxu0  ;;  %v775_v13 = vpop.f32.mrb[29].mxu1 }
 0x135   : > { %v663_v14 = vadd.f32 %v662_v12, %v1530_v50  ;;  %v776_v15 = vadd.f32 %v775_v13, %v1532_v51  ;;  %v664_v16 = vpop.f32.mrb[30].mxu0  ;;  %v777_v17 = vpop.f32.mrb[30].mxu1 }
 0x136   : > { %v665_v18 = vadd.f32 %v664_v16, %v1526_v48  ;;  %v778_v19 = vadd.f32 %v777_v17, %v1528_v49  ;;  %v666_v20 = vpop.f32.mrb[31].mxu0  ;;  %v779_v21 = vpop.f32.mrb[31].mxu1 }
 0x137   : > { %v1244_v22 = vpack.c.bf16 %v663_v14, %v661_v10  ;;  %v1245_v23 = vpack.c.bf16 %v776_v15, %v774_v11  ;;  %v667_v24 = vadd.f32 %v666_v20, %v1530_v50  ;;  %v780_v25 = vadd.f32 %v779_v21, %v1532_v51 }
 0x139   : > { %1002 = vst [vmem:[%s1542_s20 + $0xe0] sm:$0xff] %v1244_v22  ;;  %1003 = vst [vmem:[%s1542_s20 + $0xe8] sm:$0xff] %v1245_v23  ;;  %v1246_v26 = vpack.c.bf16 %v667_v24, %v665_v18  ;;  %v1247_v27 = vpack.c.bf16 %v780_v25, %v778_v19 }
 0x13b   : > { %1004 = vst [vmem:[%s1542_s20 + $0xf0] sm:$0xff] %v1246_v26  ;;  %1005 = vst [vmem:[%s1542_s20 + $0xf8] sm:$0xff] %v1247_v27 }
 0x13c PF: > { %s13_s14 = sadd.s32 1, %s1351_s14   ;;  %s1649_s12 = smov %s1347_s13 }
 0x13d   : > { %p10_p5 = scmp.ge.s32.totalorder %s13_s14, 6   ;;  %s1650_s13 = smov %s1652_s15 }
 0x13f   :  { %12 = sbr.rel (!%p10_p5) target bundleno = 2 (0x2), region = 68 }

// kernel: forward.15
= control target key start
LH: loop header
LB: loop body
LE: loop exit
PB: predicated region body
PF: predicated region fallthrough
CT: control target
= control target key end

     0   :  { %s1875_s12 = smov 0   ;;  %s1877_s13 = smov 0   ;;  %s2207_s0 = inlined_call_operand.vmem [shape: bf16[2,8,256,16], index: 0, kind: input, shape index: {}]   ;;  %s2208_s1 = inlined_call_operand.vmem [shape: bf16[2,8,256,16], index: 1, kind: input, shape index: {}]   ;;  %s2209_s2 = inlined_call_operand.vmem [shape: bf16[2,8,256,16], index: 2, kind: input, shape index: {}]   ;;  %s2210_s3 = inlined_call_operand.vmem [shape: bf16[2,8,256,16], index: 3, kind: output, shape index: {}]  }
   0x1   :  { %s1879_s14 = smov 0   ;;  %s1881_s15 = smov 0  }
   0x2   :  { %s1883_s16 = smov 0   ;;  %s1885_s17 = smov 0  }
   0x3   :  { %s1887_s18 = smov 0  }
   0x4 LB: > { %s25_s19 = sadd.s32 1, %s1841_s15  ;;  %s28_s20 = sadd.s32 1, %s1845_s16  ;;  %s1853_s18 = sphi %s1887_s18, %s13_s18   ;;  %s1849_s17 = sphi %s1885_s17, %s2216_s17   ;;  %s1845_s16 = sphi %s1883_s16, %s2215_s16   ;;  %s1841_s15 = sphi %s1881_s15, %s2214_s15   ;;  %s1837_s14 = sphi %s1879_s14, %s2213_s14   ;;  %s1833_s13 = sphi %s1877_s13, %s2212_s13   ;;  %s1829_s12 = sphi %s1875_s12, %s2211_s12  }
   0x5   : > { %p26_p0 = scmp.ge.s32.totalorder %s25_s19, 2  ;;  %p1406_p1 = scmp.ge.s32.totalorder %s1853_s18, 1 }
   0x6   : > { %p205_p2 = scmp.lt.s32.totalorder %s1853_s18, 33  ;;  %s32_s21 = sadd.s32 1, %s1849_s17 }
   0x7   : > { %s2218_s19 = smov (%p26_p0, %s25_s19), 0  ;;  %s2220_s20 = smov (!%p26_p0, %s28_s20), %s1845_s16 }
   0x8   : > { %p206_p3 = pnand %p1406_p1, %p205_p2  ;;  %p30_p4 = scmp.ge.s32.totalorder %s2220_s20, 8 }
   0x9   : > { %p264_p6 = scmp.lt.s32.totalorder (!%p206_p3), %s1837_s14, 1  ;;  %p266_p7 = scmp.lt.s32.totalorder (!%p206_p3), %s1833_s13, 7  ;;  %vm510_vm0 = vcmask (!%p206_p3), 130048   ;;  %vm1225_vm1 = vcmask (!%p206_p3), 125952  }
   0xa   : > { %s2222_s20 = smov (%p30_p4, %s2220_s20), 0  ;;  %s2224_s21 = smov (!%p30_p4, %s32_s21), %s1849_s17 }
   0xb   : > { %p34_p5 = scmp.ge.s32.totalorder %s2224_s21, 2  ;;  %209 = sbr.rel (%p206_p3) target bundleno = 749 (0x2ed), region = 32 }
   0xc   : > { %s1407_s22 = sshll.u32 (!%p206_p3), %s1829_s12, 4 }
   0xd   : > { %s2226_s21 = smov (%p34_p5, %s2224_s21), 0  ;;  %p268_p8 = scmp.lt.s32.totalorder (!%p206_p3), %s1407_s22, 31 }
  0x12   : > { %s2228_s14 = smov (!%p264_p6, %s1837_s14), 1  ;;  %s2230_s13 = smov (!%p266_p7, %s1833_s13), 7 }
  0x13   : > { %s1409_s23 = sshll.u32 %s2228_s14, 8  ;;  %s1408_s24 = sshll.u32 %s2230_s13, 5 }
  0x14   : > { %s1920_s25 = sadd.s32 %s1409_s23, %s1408_s24  ;;  %s2232_s22 = smov (!%p268_p8, %s1407_s22), 31 }
  0x15   : > { %s1413_s26 = sshll.u32 %s1920_s25, 2  ;;  %s271_s30 = sadd.s32 %s1408_s24, %s2232_s22 }
  0x16   : > { %s1928_s29 = scalar_lea.vmem %s2208_s1, %s1413_s26  ;;  %s1937_s4 = sadd.s32 %s1409_s23, %s271_s30 }
  0x17   : > { %v1663_v0 = vld [vmem:[%s1928_s29 + $0x40] sm:$0xff]   ;;  %v1665_v2 = vld [vmem:[%s1928_s29 + $0x48] sm:$0xff]   ;;  %v1667_v6 = vld [vmem:[%s1928_s29 + $0x50] sm:$0xff]   ;;  %s1410_s5 = sshll.u32 %s1937_s4, 2  ;;  %s2001_s11 = scalar_lea.vmem %s2209_s2, %s1413_s26 }
  0x18   : > { %v1664_v1 = vld [vmem:[%s1928_s29] sm:$0xff]   ;;  %1599 = vmatprep.subr.msk.bf16.mxu0 %vm510_vm0, %v1663_v0  ;;  %v1666_v4 = vld [vmem:[%s1928_s29 + $0x8] sm:$0xff]   ;;  %v1668_v7 = vld [vmem:[%s1928_s29 + $0x10] sm:$0xff]   ;;  %s1949_s8 = scalar_lea.vmem %s2207_s0, %s1410_s5  ;;  %s2152_s14 = scalar_lea.vmem %s2210_s3, %s1410_s5 }
  0x19   : > { %v536_v3 = vsel %vm510_vm0, %v1664_v1, 0  ;;  %v539_v5 = vsel %vm510_vm0, %v1666_v4, 0  ;;  %v1679_v8 = vld [vmem:[%s1949_s8] sm:$0xff]   ;;  %v542_v9 = vsel %vm510_vm0, %v1668_v7, 0  ;;  %v1669_v10 = vld [vmem:[%s1928_s29 + $0x58] sm:$0xff]   ;;  %v1673_v16 = vld [vmem:[%s1928_s29 + $0x68] sm:$0xff]  }
  0x1a   : > { %1504 = vmatpush3.bf16.xpose.msra.mxu0 %v536_v3  ;;  %1519 = vmatprep.mubr.msk.bf16.mxu0 %vm510_vm0, %v1679_v8  ;;  %v1670_v11 = vld [vmem:[%s1928_s29 + $0x18] sm:$0xff]   ;;  %v1671_v13 = vld [vmem:[%s1928_s29 + $0x60] sm:$0xff]   ;;  %v1674_v17 = vld [vmem:[%s1928_s29 + $0x28] sm:$0xff]  }
  0x1b   : > { %1600 = vmatprep.subr.msk.bf16.mxu0 %vm510_vm0, %v1665_v2  ;;  %v545_v12 = vsel %vm510_vm0, %v1670_v11, 0  ;;  %v1672_v14 = vld [vmem:[%s1928_s29 + $0x20] sm:$0xff]   ;;  %v551_v18 = vsel %vm510_vm0, %v1674_v17, 0  ;;  %v1675_v19 = vld [vmem:[%s1928_s29 + $0x70] sm:$0xff]   ;;  %v1677_v22 = vld [vmem:[%s1928_s29 + $0x78] sm:$0xff]  }
  0x1c   : > { %v548_v15 = vsel %vm510_vm0, %v1672_v14, 0  ;;  %v1676_v20 = vld [vmem:[%s1928_s29 + $0x30] sm:$0xff]   ;;  %v1678_v23 = vld [vmem:[%s1928_s29 + $0x38] sm:$0xff]   ;;  %v1680_v25 = vld [vmem:[%s1949_s8 + $0x8] sm:$0xff]  }
  0x1d   : > { %v554_v21 = vsel %vm510_vm0, %v1676_v20, 0  ;;  %v557_v24 = vsel %vm510_vm0, %v1678_v23, 0  ;;  %v1681_v26 = vld [vmem:[%s1949_s8 + $0x10] sm:$0xff]   ;;  %v1682_v27 = vld [vmem:[%s1949_s8 + $0x18] sm:$0xff]   ;;  %v1683_v28 = vld [vmem:[%s1949_s8 + $0x20] sm:$0xff]  }
  0x1e   : > { %v1684_v29 = vld [vmem:[%s1949_s8 + $0x28] sm:$0xff]   ;;  %v1685_v30 = vld [vmem:[%s1949_s8 + $0x30] sm:$0xff]   ;;  %v1686_v31 = vld [vmem:[%s1949_s8 + $0x38] sm:$0xff]  }
  0x1f   : > { %v1687_v32 = vld [vmem:[%s2001_s11 + $0x40] sm:$0xff]   ;;  %v1689_v34 = vld [vmem:[%s2001_s11 + $0x48] sm:$0xff]   ;;  %v1691_v36 = vld [vmem:[%s2001_s11 + $0x50] sm:$0xff]  }
  0x20   : > { %v1688_v33 = vld [vmem:[%s2001_s11] sm:$0xff]   ;;  %1535 = vmatprep.subr.bf16.mxu1 %v1687_v32  ;;  %v1690_v35 = vld [vmem:[%s2001_s11 + $0x8] sm:$0xff]   ;;  %v1692_v37 = vld [vmem:[%s2001_s11 + $0x10] sm:$0xff]  }
  0x21   : > { %1536 = vmatpush3.bf16.msra.mxu1 %v1688_v33  ;;  %v1693_v3 = vld [vmem:[%s2001_s11 + $0x58] sm:$0xff]   ;;  %v1697_v17 = vld [vmem:[%s2001_s11 + $0x68] sm:$0xff]   ;;  %v1699_v23 = vld [vmem:[%s2001_s11 + $0x70] sm:$0xff]  }
  0x22   : > { %1506 = vmatpush3.bf16.xpose.msra.mxu0 %v539_v5  ;;  %1537 = vmatprep.subr.bf16.mxu1 %v1689_v34  ;;  %v1694_v5 = vld [vmem:[%s2001_s11 + $0x18] sm:$0xff]  }
  0x23   : > { %1601 = vmatprep.subr.msk.bf16.mxu0 %vm510_vm0, %v1667_v6  ;;  %v1702_v33 = vld [vmem:[%s2001_s11 + $0x38] sm:$0xff]  }
  0x25   : > { %1538 = vmatpush3.bf16.msra.mxu1 %v1690_v35 }
  0x26   : > { %1539 = vmatprep.subr.bf16.mxu1 %v1691_v36 }
  0x29   : > { %1540 = vmatpush3.bf16.msra.mxu1 %v1692_v37 }
  0x2a   : > { %1508 = vmatpush3.bf16.xpose.msra.mxu0 %v542_v9  ;;  %1541 = vmatprep.subr.bf16.mxu1 %v1693_v3  ;;  %v1695_v9 = vld [vmem:[%s2001_s11 + $0x60] sm:$0xff]  }
  0x2b   : > { %1602 = vmatprep.subr.msk.bf16.mxu0 %vm510_vm0, %v1669_v10 }
  0x2d   : > { %1542 = vmatpush3.bf16.msra.mxu1 %v1694_v5 }
  0x2e   : > { %1543 = vmatprep.subr.bf16.mxu1 %v1695_v9 }
  0x32   : > { %1510 = vmatpush3.bf16.xpose.msra.mxu0 %v545_v12  ;;  %v1696_v12 = vld [vmem:[%s2001_s11 + $0x20] sm:$0xff]  }
  0x33   : > { %1603 = vmatprep.subr.msk.bf16.mxu0 %vm510_vm0, %v1671_v13  ;;  %1544 = vmatpush3.bf16.msra.mxu1 %v1696_v12 }
  0x34   : > { %1545 = vmatprep.subr.bf16.mxu1 %v1697_v17 }
  0x3a   : > { %1512 = vmatpush3.bf16.xpose.msra.mxu0 %v548_v15 }
  0x3b   : > { %1604 = vmatprep.subr.msk.bf16.mxu0 %vm510_vm0, %v1673_v16 }
  0x42   : > { %1514 = vmatpush3.bf16.xpose.msra.mxu0 %v551_v18 }
  0x43   : > { %1605 = vmatprep.subr.msk.bf16.mxu0 %vm510_vm0, %v1675_v19  ;;  %v1698_v19 = vld [vmem:[%s2001_s11 + $0x28] sm:$0xff]  }
  0x44   : > { %1546 = vmatpush3.bf16.msra.mxu1 %v1698_v19 }
  0x45   : > { %1547 = vmatprep.subr.bf16.mxu1 %v1699_v23 }
  0x4a   : > { %1516 = vmatpush3.bf16.xpose.msra.mxu0 %v554_v21 }
  0x4b   : > { %1606 = vmatprep.subr.msk.bf16.mxu0 %vm510_vm0, %v1677_v22 }
  0x52   : > { %1518 = vmatpush3.bf16.xpose.msra.mxu0 %v557_v24 }
  0x59   : > { %1520 = vmatmul.mubr.msk.bf16.vlgmr.msra.gmra.mrb[0].mxu0 %vm510_vm0, %v1679_v8 }
  0x5a   : > { %1521 = vmatprep.mubr.msk.bf16.mxu0 %vm510_vm0, %v1680_v25 }
  0x61   : > { %1522 = vmatmul.mubr.msk.bf16.gmra.mrb[4].mxu0 %vm510_vm0, %v1680_v25 }
  0x62   : > { %1523 = vmatprep.mubr.msk.bf16.mxu0 %vm510_vm0, %v1681_v26 }
  0x69   : > { %1524 = vmatmul.mubr.msk.bf16.gmra.mrb[8].mxu0 %vm510_vm0, %v1681_v26  ;;  %v1700_v26 = vld [vmem:[%s2001_s11 + $0x30] sm:$0xff]  }
  0x6a   : > { %1525 = vmatprep.mubr.msk.bf16.mxu0 %vm510_vm0, %v1682_v27  ;;  %1548 = vmatpush3.bf16.msra.mxu1 %v1700_v26 }
  0x71   : > { %1526 = vmatmul.mubr.msk.bf16.gmra.mrb[12].mxu0 %vm510_vm0, %v1682_v27 }
  0x72   : > { %1527 = vmatprep.mubr.msk.bf16.mxu0 %vm510_vm0, %v1683_v28 }
  0x79   : > { %1528 = vmatmul.mubr.msk.bf16.gmra.mrb[16].mxu0 %vm510_vm0, %v1683_v28 }
  0x7a   : > { %1529 = vmatprep.mubr.msk.bf16.mxu0 %vm510_vm0, %v1684_v29 }
  0x81   : > { %1530 = vmatmul.mubr.msk.bf16.gmra.mrb[20].mxu0 %vm510_vm0, %v1684_v29 }
  0x82   : > { %1531 = vmatprep.mubr.msk.bf16.mxu0 %vm510_vm0, %v1685_v30 }
  0x89   : > { %1532 = vmatmul.mubr.msk.bf16.gmra.mrb[24].mxu0 %vm510_vm0, %v1685_v30 }
  0x8a   : > { %1533 = vmatprep.mubr.msk.bf16.mxu0 %vm510_vm0, %v1686_v31 }
  0x91   : > { %1534 = vmatmul.mubr.msk.bf16.gmra.mrb[28].mxu0 %vm510_vm0, %v1686_v31  ;;  %v1701_v31 = vld [vmem:[%s2001_s11 + $0x78] sm:$0xff]  }
  0x92   : > { %1549 = vmatprep.subr.bf16.mxu1 %v1701_v31 }
  0x93   : > { %1550 = vmatpush3.bf16.msra.mxu1 %v1702_v33 }
 0x12c   : > { %v617_v38 = vpop.f32.mrb[0].mxu0 }
 0x12d   : > { %v2009_v39 = vmul.f32 0.25, %v617_v38  ;;  %v619_v40 = vpop.f32.mrb[1].mxu0 }
 0x12e   : > { %v2011_v41 = vmul.f32 0.25, %v619_v40  ;;  %v621_v42 = vpop.f32.mrb[2].mxu0 }
 0x12f   : > { %v623_v43 = vpop.f32.mrb[3].mxu0  ;;  %v2013_v44 = vmul.f32 0.25, %v621_v42 }
 0x130   : > { %v2015_v45 = vmul.f32 0.25, %v623_v43  ;;  %v728_v46 = vmax.f32 %v2009_v39, %v2011_v41 }
 0x132   : > { %729 = vmax.xlane.f32.xlu0 %v728_v46  ;;  %v731_v48 = vmax.f32 %v2013_v44, %v2015_v45 }
 0x134   : > { %v627_v47 = vpop.f32.mrb[4].mxu0 }
 0x135   : > { %v2021_v49 = vmul.f32 0.25, %v627_v47  ;;  %v629_v50 = vpop.f32.mrb[5].mxu0 }
 0x136   : > { %v2023_v51 = vmul.f32 0.25, %v629_v50  ;;  %732 = vmax.xlane.f32.xlu0 %v731_v48  ;;  %v631_v52 = vpop.f32.mrb[6].mxu0 }
 0x137   : > { %v633_v53 = vpop.f32.mrb[7].mxu0  ;;  %v2025_v54 = vmul.f32 0.25, %v631_v52 }
 0x138   : > { %v2027_v55 = vmul.f32 0.25, %v633_v53  ;;  %v734_v56 = vmax.f32 %v2021_v49, %v2023_v51 }
 0x13a   : > { %735 = vmax.xlane.f32.xlu1 %v734_v56  ;;  %v737_v58 = vmax.f32 %v2025_v54, %v2027_v55 }
 0x13c   : > { %v637_v57 = vpop.f32.mrb[8].mxu0 }
 0x13d   : > { %v2033_v59 = vmul.f32 0.25, %v637_v57  ;;  %v639_v60 = vpop.f32.mrb[9].mxu0 }
 0x13e   : > { %v2035_v61 = vmul.f32 0.25, %v639_v60  ;;  %738 = vmax.xlane.f32.xlu1 %v737_v58  ;;  %v641_v62 = vpop.f32.mrb[10].mxu0 }
 0x13f   : > { %v2037_v63 = vmul.f32 0.25, %v641_v62  ;;  %v643_v0 = vpop.f32.mrb[11].mxu0 }
 0x140   : > { %v2039_v1 = vmul.f32 0.25, %v643_v0  ;;  %v740_v2 = vmax.f32 %v2033_v59, %v2035_v61 }
 0x142   : > { %741 = vmax.xlane.f32.xlu0 %v740_v2  ;;  %v743_v4 = vmax.f32 %v2037_v63, %v2039_v1 }
 0x144   : > { %744 = vmax.xlane.f32.xlu1 %v743_v4  ;;  %v647_v6 = vpop.f32.mrb[12].mxu0 }
 0x145   : > { %v2047_v7 = vmul.f32 0.25, %v647_v6  ;;  %v649_v8 = vpop.f32.mrb[13].mxu0 }
 0x146   : > { %v2050_v10 = vmul.f32 0.25, %v649_v8  ;;  %v651_v11 = vpop.f32.mrb[14].mxu0 }
 0x147   : > { %v2053_v13 = vmul.f32 0.25, %v651_v11  ;;  %v653_v14 = vpop.f32.mrb[15].mxu0 }
 0x148   : > { %v2055_v15 = vmul.f32 0.25, %v653_v14  ;;  %v746_v16 = vmax.f32 %v2047_v7, %v2050_v10 }
 0x14a   : > { %747 = vmax.xlane.f32.xlu0 %v746_v16  ;;  %v749_v18 = vmax.f32 %v2053_v13, %v2055_v15 }
 0x14c   : > { %750 = vmax.xlane.f32.xlu1 %v749_v18  ;;  %v657_v20 = vpop.f32.mrb[16].mxu0 }
 0x14d   : > { %v2063_v21 = vmul.f32 0.25, %v657_v20  ;;  %v659_v22 = vpop.f32.mrb[17].mxu0 }
 0x14e   : > { %v2066_v24 = vmul.f32 0.25, %v659_v22  ;;  %v661_v25 = vpop.f32.mrb[18].mxu0 }
 0x14f   : > { %v2069_v27 = vmul.f32 0.25, %v661_v25  ;;  %v663_v28 = vpop.f32.mrb[19].mxu0 }
 0x150   : > { %v2071_v29 = vmul.f32 0.25, %v663_v28  ;;  %v752_v30 = vmax.f32 %v2063_v21, %v2066_v24 }
 0x152   : > { %753 = vmax.xlane.f32.xlu0 %v752_v30  ;;  %v755_v32 = vmax.f32 %v2069_v27, %v2071_v29 }
 0x154   : > { %756 = vmax.xlane.f32.xlu1 %v755_v32  ;;  %v667_v34 = vpop.f32.mrb[20].mxu0 }
 0x155   : > { %v2079_v35 = vmul.f32 0.25, %v667_v34  ;;  %v669_v36 = vpop.f32.mrb[21].mxu0 }
 0x156   : > { %v2081_v37 = vmul.f32 0.25, %v669_v36  ;;  %v671_v38 = vpop.f32.mrb[22].mxu0 }
 0x157   : > { %v2083_v40 = vmul.f32 0.25, %v671_v38  ;;  %v673_v42 = vpop.f32.mrb[23].mxu0 }
 0x158   : > { %v2085_v43 = vmul.f32 0.25, %v673_v42  ;;  %v758_v46 = vmax.f32 %v2079_v35, %v2081_v37 }
 0x15a   : > { %759 = vmax.xlane.f32.xlu0 %v758_v46  ;;  %v761_v47 = vmax.f32 %v2083_v40, %v2085_v43 }
 0x15c   : > { %762 = vmax.xlane.f32.xlu1 %v761_v47  ;;  %v677_v48 = vpop.f32.mrb[24].mxu0 }
 0x15d   : > { %v2091_v50 = vmul.f32 0.25, %v677_v48  ;;  %v679_v52 = vpop.f32.mrb[25].mxu0 }
 0x15e   : > { %v2093_v53 = vmul.f32 0.25, %v679_v52  ;;  %v681_v56 = vpop.f32.mrb[26].mxu0 }
 0x15f   : > { %v2095_v57 = vmul.f32 0.25, %v681_v56  ;;  %v683_v58 = vpop.f32.mrb[27].mxu0 }
 0x160   : > { %v2097_v60 = vmul.f32 0.25, %v683_v58  ;;  %v764_v62 = vmax.f32 %v2091_v50, %v2093_v53 }
 0x162   : > { %765 = vmax.xlane.f32.xlu0 %v764_v62  ;;  %v767_v0 = vmax.f32 %v2095_v57, %v2097_v60 }
 0x164   : > { %768 = vmax.xlane.f32.xlu1 %v767_v0  ;;  %v687_v2 = vpop.f32.mrb[28].mxu0 }
 0x165   : > { %v2103_v3 = vmul.f32 0.25, %v687_v2  ;;  %v689_v4 = vpop.f32.mrb[29].mxu0 }
 0x166   : > { %v2105_v5 = vmul.f32 0.25, %v689_v4  ;;  %v691_v6 = vpop.f32.mrb[30].mxu0 }
 0x167   : > { %v2107_v8 = vmul.f32 0.25, %v691_v6  ;;  %v693_v9 = vpop.f32.mrb[31].mxu0 }
 0x168   : > { %v2109_v11 = vmul.f32 0.25, %v693_v9  ;;  %v770_v12 = vmax.f32 %v2103_v3, %v2105_v5 }
 0x16a   : > { %771 = vmax.xlane.f32.xlu0 %v770_v12  ;;  %v773_v14 = vmax.f32 %v2107_v8, %v2109_v11 }
 0x16c   : > { %774 = vmax.xlane.f32.xlu1 %v773_v14 }
 0x1bf   : > { %v730_v16 = vpop.xlane.xlu0 %729 }
 0x1c0   : > { %v776_v17 = vsub.f32 %v2009_v39, %v730_v16  ;;  %v777_v18 = vsub.f32 %v2011_v41, %v730_v16 }
 0x1c2   : > { %v808_v19 = vmul.f32 1.442695, %v776_v17  ;;  %v810_v20 = vmul.f32 1.442695, %v777_v18 }
 0x1c3   : > { %v733_v22 = vpop.xlane.xlu0 %732 }
 0x1c4   : > { %1703 = vpow2.f32 %v808_v19  ;;  %v778_v23 = vsub.f32 %v2013_v44, %v733_v22  ;;  %v779_v25 = vsub.f32 %v2015_v45, %v733_v22 }
 0x1c5   : > { %1705 = vpow2.f32 %v810_v20 }
 0x1c6   : > { %v812_v26 = vmul.f32 1.442695, %v778_v23  ;;  %v814_v28 = vmul.f32 1.442695, %v779_v25 }
 0x1c7   : > { %v736_v30 = vpop.xlane.xlu1 %735 }
 0x1c8   : > { %1707 = vpow2.f32 %v812_v26  ;;  %v780_v31 = vsub.f32 %v2021_v49, %v736_v30  ;;  %v781_v32 = vsub.f32 %v2023_v51, %v736_v30 }
 0x1c9   : > { %1709 = vpow2.f32 %v814_v28 }
 0x1ca   : > { %v816_v39 = vmul.f32 1.442695, %v780_v31  ;;  %v818_v41 = vmul.f32 1.442695, %v781_v32 }
 0x1cb   : > { %v739_v33 = vpop.xlane.xlu1 %738 }
 0x1cc   : > { %1711 = vpow2.f32 %v816_v39  ;;  %v782_v34 = vsub.f32 %v2025_v54, %v739_v33  ;;  %v783_v44 = vsub.f32 %v2027_v55, %v739_v33 }
 0x1cd   : > { %1713 = vpow2.f32 %v818_v41 }
 0x1ce   : > { %v1704_v45 = vpop.eup %1703  ;;  %v820_v36 = vmul.f32 1.442695, %v782_v34  ;;  %v822_v38 = vmul.f32 1.442695, %v783_v44 }
 0x1cf   : > { %v1706_v42 = vpop.eup %1705  ;;  %v742_v46 = vpop.xlane.xlu0 %741 }
 0x1d0   : > { %1715 = vpow2.f32 %v820_v36  ;;  %v784_v49 = vsub.f32 %v2033_v59, %v742_v46  ;;  %v785_v51 = vsub.f32 %v2035_v61, %v742_v46  ;;  %v872_v47 = vadd.f32 %v1706_v42, %v1704_v45 }
 0x1d1   : > { %1717 = vpow2.f32 %v822_v38  ;;  %v745_v48 = vpop.xlane.xlu1 %744 }
 0x1d2   : > { %v1708_v52 = vpop.eup %1707  ;;  %v824_v56 = vmul.f32 1.442695, %v784_v49  ;;  %v826_v58 = vmul.f32 1.442695, %v785_v51  ;;  %v786_v54 = vsub.f32 %v2037_v63, %v745_v48  ;;  %v787_v55 = vsub.f32 %v2039_v1, %v745_v48  ;;  %873 = vadd.xlane.f32.xlu0 %v872_v47 }
 0x1d3   : > { %v1710_v62 = vpop.eup %1709  ;;  %v920_v0 = vpack.c.bf16 %v1708_v52, %v1704_v45 }
 0x1d4   : > { %1719 = vpow2.f32 %v824_v56  ;;  %v828_v2 = vmul.f32 1.442695, %v786_v54  ;;  %v830_v4 = vmul.f32 1.442695, %v787_v55  ;;  %v921_v6 = vpack.c.bf16 %v1710_v62, %v1706_v42 }
 0x1d5   : > { %1721 = vpow2.f32 %v826_v58  ;;  %v875_v59 = vadd.f32 %v1710_v62, %v1708_v52 }
 0x1d6   : > { %v1712_v61 = vpop.eup %1711  ;;  %1723 = vpow2.f32 %v828_v2  ;;  %1064 = vmatprep.mubr.bf16.mxu1 %v921_v6 }
 0x1d7   : > { %v1714_v9 = vpop.eup %1713  ;;  %1725 = vpow2.f32 %v830_v4  ;;  %876 = vadd.xlane.f32.xlu1 %v875_v59  ;;  %1065 = vmatmul.mubr.bf16.vlgmr.msra.gmra.mrb[0].mxu1 %v920_v0  ;;  %v748_v12 = vpop.xlane.xlu0 %747 }
 0x1d8   : > { %v788_v63 = vsub.f32 %v2047_v7, %v748_v12  ;;  %v789_v1 = vsub.f32 %v2050_v10, %v748_v12  ;;  %v878_v14 = vadd.f32 %v1714_v9, %v1712_v61 }
 0x1d9   : > { %v751_v16 = vpop.xlane.xlu1 %750 }
 0x1da   : > { %v1716_v17 = vpop.eup %1715  ;;  %v832_v18 = vmul.f32 1.442695, %v788_v63  ;;  %v834_v19 = vmul.f32 1.442695, %v789_v1  ;;  %v790_v20 = vsub.f32 %v2053_v13, %v751_v16  ;;  %v791_v22 = vsub.f32 %v2055_v15, %v751_v16  ;;  %879 = vadd.xlane.f32.xlu0 %v878_v14 }
 0x1db   : > { %v1718_v23 = vpop.eup %1717  ;;  %v922_v25 = vpack.c.bf16 %v1716_v17, %v1712_v61 }
 0x1dc   : > { %1727 = vpow2.f32 %v832_v18  ;;  %v836_v26 = vmul.f32 1.442695, %v790_v20  ;;  %v838_v28 = vmul.f32 1.442695, %v791_v22  ;;  %v923_v30 = vpack.c.bf16 %v1718_v23, %v1714_v9 }
 0x1dd   : > { %1729 = vpow2.f32 %v834_v19  ;;  %v881_v7 = vadd.f32 %v1718_v23, %v1716_v17 }
 0x1de   : > { %v1720_v31 = vpop.eup %1719  ;;  %1731 = vpow2.f32 %v836_v26  ;;  %1072 = vmatprep.mubr.bf16.mxu1 %v923_v30 }
 0x1df   : > { %v1722_v10 = vpop.eup %1721  ;;  %1733 = vpow2.f32 %v838_v28  ;;  %882 = vadd.xlane.f32.xlu1 %v881_v7  ;;  %1073 = vmatmul.mubr.bf16.gmra.mrb[4].mxu1 %v922_v25  ;;  %v754_v32 = vpop.xlane.xlu0 %753 }
 0x1e0   : > { %v1724_v13 = vpop.eup %1723  ;;  %v792_v15 = vsub.f32 %v2063_v21, %v754_v32  ;;  %v793_v39 = vsub.f32 %v2066_v24, %v754_v32  ;;  %v884_v41 = vadd.f32 %v1722_v10, %v1720_v31 }
 0x1e1   : > { %v1726_v33 = vpop.eup %1725  ;;  %v757_v34 = vpop.xlane.xlu1 %756  ;;  %v924_v21 = vpack.c.bf16 %v1724_v13, %v1720_v31 }
 0x1e2   : > { %v840_v44 = vmul.f32 1.442695, %v792_v15  ;;  %v842_v45 = vmul.f32 1.442695, %v793_v39  ;;  %v794_v36 = vsub.f32 %v2069_v27, %v757_v34  ;;  %v795_v38 = vsub.f32 %v2071_v29, %v757_v34  ;;  %885 = vadd.xlane.f32.xlu0 %v884_v41 }
 0x1e3   : > { %v925_v42 = vpack.c.bf16 %v1726_v33, %v1722_v10  ;;  %v887_v46 = vadd.f32 %v1726_v33, %v1724_v13 }
 0x1e4   : > { %1735 = vpow2.f32 %v840_v44  ;;  %v844_v49 = vmul.f32 1.442695, %v794_v36  ;;  %v846_v51 = vmul.f32 1.442695, %v795_v38 }
 0x1e5   : > { %1737 = vpow2.f32 %v842_v45  ;;  %1080 = vmatprep.mubr.bf16.mxu1 %v925_v42  ;;  %888 = vadd.xlane.f32.xlu1 %v887_v46 }
 0x1e6   : > { %v1728_v24 = vpop.eup %1727  ;;  %1739 = vpow2.f32 %v844_v49 }
 0x1e7   : > { %v1730_v47 = vpop.eup %1729  ;;  %1741 = vpow2.f32 %v846_v51  ;;  %1081 = vmatmul.mubr.bf16.gmra.mrb[8].mxu1 %v924_v21  ;;  %v760_v48 = vpop.xlane.xlu0 %759 }
 0x1e8   : > { %v1732_v52 = vpop.eup %1731  ;;  %v796_v27 = vsub.f32 %v2079_v35, %v760_v48  ;;  %v797_v29 = vsub.f32 %v2081_v37, %v760_v48  ;;  %v890_v56 = vadd.f32 %v1730_v47, %v1728_v24 }
 0x1e9   : > { %v1734_v58 = vpop.eup %1733  ;;  %v763_v54 = vpop.xlane.xlu1 %762  ;;  %v926_v35 = vpack.c.bf16 %v1732_v52, %v1728_v24 }
 0x1ea   : > { %v848_v55 = vmul.f32 1.442695, %v796_v27  ;;  %v850_v62 = vmul.f32 1.442695, %v797_v29  ;;  %v798_v0 = vsub.f32 %v2083_v40, %v763_v54  ;;  %v799_v2 = vsub.f32 %v2085_v43, %v763_v54  ;;  %891 = vadd.xlane.f32.xlu0 %v890_v56 }
 0x1eb   : > { %v927_v4 = vpack.c.bf16 %v1734_v58, %v1730_v47  ;;  %v893_v6 = vadd.f32 %v1734_v58, %v1732_v52 }
 0x1ec   : > { %1743 = vpow2.f32 %v848_v55  ;;  %v852_v59 = vmul.f32 1.442695, %v798_v0  ;;  %v854_v61 = vmul.f32 1.442695, %v799_v2 }
 0x1ed   : > { %1745 = vpow2.f32 %v850_v62  ;;  %1088 = vmatprep.mubr.bf16.mxu1 %v927_v4  ;;  %894 = vadd.xlane.f32.xlu1 %v893_v6 }
 0x1ee   : > { %v1736_v37 = vpop.eup %1735  ;;  %1747 = vpow2.f32 %v852_v59 }
 0x1ef   : > { %v1738_v9 = vpop.eup %1737  ;;  %1749 = vpow2.f32 %v854_v61  ;;  %1089 = vmatmul.mubr.bf16.gmra.mrb[12].mxu1 %v926_v35  ;;  %v766_v12 = vpop.xlane.xlu0 %765 }
 0x1f0   : > { %v1740_v63 = vpop.eup %1739  ;;  %v800_v40 = vsub.f32 %v2091_v50, %v766_v12  ;;  %v801_v43 = vsub.f32 %v2093_v53, %v766_v12  ;;  %v896_v1 = vadd.f32 %v1738_v9, %v1736_v37 }
 0x1f1   : > { %v1742_v14 = vpop.eup %1741  ;;  %v769_v16 = vpop.xlane.xlu1 %768  ;;  %v928_v50 = vpack.c.bf16 %v1740_v63, %v1736_v37 }
 0x1f2   : > { %v856_v17 = vmul.f32 1.442695, %v800_v40  ;;  %v858_v18 = vmul.f32 1.442695, %v801_v43  ;;  %v802_v19 = vsub.f32 %v2095_v57, %v769_v16  ;;  %v803_v20 = vsub.f32 %v2097_v60, %v769_v16  ;;  %897 = vadd.xlane.f32.xlu0 %v896_v1 }
 0x1f3   : > { %v929_v22 = vpack.c.bf16 %v1742_v14, %v1738_v9  ;;  %v899_v23 = vadd.f32 %v1742_v14, %v1740_v63 }
 0x1f4   : > { %1751 = vpow2.f32 %v856_v17  ;;  %v860_v25 = vmul.f32 1.442695, %v802_v19  ;;  %v862_v26 = vmul.f32 1.442695, %v803_v20 }
 0x1f5   : > { %1753 = vpow2.f32 %v858_v18  ;;  %1096 = vmatprep.mubr.bf16.mxu1 %v929_v22  ;;  %900 = vadd.xlane.f32.xlu1 %v899_v23 }
 0x1f6   : > { %v1744_v53 = vpop.eup %1743  ;;  %1755 = vpow2.f32 %v860_v25 }
 0x1f7   : > { %v1746_v28 = vpop.eup %1745  ;;  %1757 = vpow2.f32 %v862_v26  ;;  %1097 = vmatmul.mubr.bf16.gmra.mrb[16].mxu1 %v928_v50  ;;  %v772_v30 = vpop.xlane.xlu0 %771 }
 0x1f8   : > { %v1748_v7 = vpop.eup %1747  ;;  %v804_v57 = vsub.f32 %v2103_v3, %v772_v30  ;;  %v805_v60 = vsub.f32 %v2105_v5, %v772_v30  ;;  %v902_v31 = vadd.f32 %v1746_v28, %v1744_v53 }
 0x1f9   : > { %v1750_v10 = vpop.eup %1749  ;;  %v775_v32 = vpop.xlane.xlu1 %774  ;;  %v930_v3 = vpack.c.bf16 %v1748_v7, %v1744_v53 }
 0x1fa   : > { %v864_v13 = vmul.f32 1.442695, %v804_v57  ;;  %v866_v15 = vmul.f32 1.442695, %v805_v60  ;;  %903 = vadd.xlane.f32.xlu0 %v902_v31  ;;  %v806_v39 = vsub.f32 %v2107_v8, %v775_v32  ;;  %v807_v41 = vsub.f32 %v2109_v11, %v775_v32 }
 0x1fb   : > { %v931_v33 = vpack.c.bf16 %v1750_v10, %v1746_v28  ;;  %v905_v34 = vadd.f32 %v1750_v10, %v1748_v7 }
 0x1fc   : > { %1759 = vpow2.f32 %v864_v13  ;;  %v868_v44 = vmul.f32 1.442695, %v806_v39  ;;  %v870_v45 = vmul.f32 1.442695, %v807_v41 }
 0x1fd   : > { %1761 = vpow2.f32 %v866_v15  ;;  %1104 = vmatprep.mubr.bf16.mxu1 %v931_v33  ;;  %906 = vadd.xlane.f32.xlu1 %v905_v34 }
 0x1fe   : > { %v1752_v5 = vpop.eup %1751  ;;  %1763 = vpow2.f32 %v868_v44 }
 0x1ff   : > { %v1754_v36 = vpop.eup %1753  ;;  %1765 = vpow2.f32 %v870_v45  ;;  %1105 = vmatmul.mubr.bf16.gmra.mrb[20].mxu1 %v930_v3 }
 0x200   : > { %v1756_v38 = vpop.eup %1755  ;;  %v908_v42 = vadd.f32 %v1754_v36, %v1752_v5 }
 0x201   : > { %v1758_v46 = vpop.eup %1757  ;;  %v932_v49 = vpack.c.bf16 %v1756_v38, %v1752_v5 }
 0x202   : > { %909 = vadd.xlane.f32.xlu0 %v908_v42  ;;  %v933_v8 = vpack.c.bf16 %v1758_v46, %v1754_v36  ;;  %v911_v11 = vadd.f32 %v1758_v46, %v1756_v38 }
 0x204   : > { %1112 = vmatprep.mubr.bf16.mxu1 %v933_v8  ;;  %912 = vadd.xlane.f32.xlu1 %v911_v11 }
 0x206   : > { %v1760_v51 = vpop.eup %1759 }
 0x207   : > { %v1762_v21 = vpop.eup %1761  ;;  %1113 = vmatmul.mubr.bf16.gmra.mrb[24].mxu1 %v932_v49 }
 0x208   : > { %v1764_v24 = vpop.eup %1763  ;;  %v914_v47 = vadd.f32 %v1762_v21, %v1760_v51 }
 0x209   : > { %v1766_v48 = vpop.eup %1765  ;;  %v934_v29 = vpack.c.bf16 %v1764_v24, %v1760_v51 }
 0x20a   : > { %915 = vadd.xlane.f32.xlu0 %v914_v47  ;;  %v935_v52 = vpack.c.bf16 %v1766_v48, %v1762_v21  ;;  %v917_v27 = vadd.f32 %v1766_v48, %v1764_v24 }
 0x20c   : > { %1120 = vmatprep.mubr.bf16.mxu1 %v935_v52  ;;  %918 = vadd.xlane.f32.xlu1 %v917_v27 }
 0x20f   : > { %1121 = vmatmul.mubr.bf16.gmra.mrb[28].mxu1 %v934_v29 }
 0x25f   : > { %v874_v56 = vpop.xlane.xlu0 %873 }
 0x260   : > { %1767 = vrcp.f32 %v874_v56 }
 0x264   : > { %v877_v58 = vpop.xlane.xlu1 %876 }
 0x265   : > { %1769 = vrcp.f32 %v877_v58 }
 0x267   : > { %v880_v54 = vpop.xlane.xlu0 %879 }
 0x268   : > { %1771 = vrcp.f32 %v880_v54 }
 0x26a   : > { %v1768_v6 = vpop.eup %1767 }
 0x26c   : > { %v883_v55 = vpop.xlane.xlu1 %882 }
 0x26d   : > { %1773 = vrcp.f32 %v883_v55 }
 0x26f   : > { %v1770_v37 = vpop.eup %1769  ;;  %v886_v9 = vpop.xlane.xlu0 %885 }
 0x270   : > { %1775 = vrcp.f32 %v886_v9 }
 0x272   : > { %v889_v40 = vpop.xlane.xlu1 %888  ;;  %v1772_v18 = vpop.eup %1771 }
 0x273   : > { %1777 = vrcp.f32 %v889_v40 }
 0x277   : > { %v1774_v23 = vpop.eup %1773  ;;  %v892_v25 = vpop.xlane.xlu0 %891 }
 0x278   : > { %1779 = vrcp.f32 %v892_v25 }
 0x27a   : > { %v895_v53 = vpop.xlane.xlu1 %894  ;;  %v1776_v31 = vpop.eup %1775 }
 0x27b   : > { %1781 = vrcp.f32 %v895_v53 }
 0x27d   : > { %v1778_v15 = vpop.eup %1777 }
 0x27f   : > { %v898_v39 = vpop.xlane.xlu0 %897 }
 0x280   : > { %1783 = vrcp.f32 %v898_v39 }
 0x282   : > { %v901_v34 = vpop.xlane.xlu1 %900  ;;  %v1780_v38 = vpop.eup %1779 }
 0x283   : > { %1785 = vrcp.f32 %v901_v34 }
 0x285   : > { %v1782_v11 = vpop.eup %1781 }
 0x287   : > { %v904_v49 = vpop.xlane.xlu0 %903 }
 0x288   : > { %1787 = vrcp.f32 %v904_v49 }
 0x28a   : > { %v907_v24 = vpop.xlane.xlu1 %906  ;;  %v1784_v56 = vpop.eup %1783 }
 0x28b   : > { %1789 = vrcp.f32 %v907_v24 }
 0x2aa   : > { %v1551_v62 = vpop.f32.mrb[0].mxu1 }
 0x2ab   : > { %v1552_v0 = vpop.f32.mrb[1].mxu1 }
 0x2ac   : > { %v1553_v2 = vadd.f32 %v1552_v0, %v1551_v62  ;;  %v1554_v4 = vpop.f32.mrb[2].mxu1  ;;  %v1786_v62 = vpop.eup %1785 }
 0x2ad   : > { %v1555_v59 = vpop.f32.mrb[3].mxu1  ;;  %v910_v0 = vpop.xlane.xlu0 %909 }
 0x2ae   : > { %v1145_v61 = vmul.f32 %v1768_v6, %v1553_v2  ;;  %v1556_v35 = vadd.f32 %v1555_v59, %v1554_v4  ;;  %v913_v6 = vpop.xlane.xlu1 %912  ;;  %1791 = vrcp.f32 %v910_v0 }
 0x2af   : > { %1793 = vrcp.f32 %v913_v6 }
 0x2b0   : > { %v1487_v12 = vpack.c.bf16 %v1145_v61, %v1145_v61  ;;  %v1146_v63 = vmul.f32 %v1770_v37, %v1556_v35 }
 0x2b2   : > { %1226 = vst.msk [vmem:[%s2152_s14] sm:$0xf] %vm1225_vm1, %v1487_v12  ;;  %v1488_v43 = vpack.c.bf16 %v1146_v63, %v1146_v63  ;;  %v1557_v1 = vpop.f32.mrb[4].mxu1  ;;  %v1788_v12 = vpop.eup %1787 }
 0x2b3   : > { %v1558_v14 = vpop.f32.mrb[5].mxu1 }
 0x2b4   : > { %1227 = vst.msk [vmem:[%s2152_s14 + $0x4] sm:$0xf] %vm1225_vm1, %v1488_v43  ;;  %v1559_v16 = vadd.f32 %v1558_v14, %v1557_v1  ;;  %v1560_v17 = vpop.f32.mrb[6].mxu1  ;;  %v1790_v1 = vpop.eup %1789 }
 0x2b5   : > { %v1561_v19 = vpop.f32.mrb[7].mxu1  ;;  %v916_v14 = vpop.xlane.xlu0 %915 }
 0x2b6   : > { %v1147_v20 = vmul.f32 %v1772_v18, %v1559_v16  ;;  %v1562_v22 = vadd.f32 %v1561_v19, %v1560_v17  ;;  %v919_v18 = vpop.xlane.xlu1 %918  ;;  %1795 = vrcp.f32 %v916_v14 }
 0x2b7   : > { %1797 = vrcp.f32 %v919_v18 }
 0x2b8   : > { %v1489_v26 = vpack.c.bf16 %v1147_v20, %v1147_v20  ;;  %v1148_v50 = vmul.f32 %v1774_v23, %v1562_v22 }
 0x2ba   : > { %1228 = vst.msk [vmem:[%s2152_s14 + $0x8] sm:$0xf] %vm1225_vm1, %v1489_v26  ;;  %v1490_v28 = vpack.c.bf16 %v1148_v50, %v1148_v50  ;;  %v1563_v30 = vpop.f32.mrb[8].mxu1  ;;  %v1792_v26 = vpop.eup %1791 }
 0x2bb   : > { %v1564_v7 = vpop.f32.mrb[9].mxu1 }
 0x2bc   : > { %1229 = vst.msk [vmem:[%s2152_s14 + $0xc] sm:$0xf] %vm1225_vm1, %v1490_v28  ;;  %v1565_v57 = vadd.f32 %v1564_v7, %v1563_v30  ;;  %v1566_v60 = vpop.f32.mrb[10].mxu1  ;;  %v1794_v30 = vpop.eup %1793 }
 0x2bd   : > { %v1567_v10 = vpop.f32.mrb[11].mxu1 }
 0x2be   : > { %v1149_v32 = vmul.f32 %v1776_v31, %v1565_v57  ;;  %v1568_v13 = vadd.f32 %v1567_v10, %v1566_v60 }
 0x2c0   : > { %v1491_v41 = vpack.c.bf16 %v1149_v32, %v1149_v32  ;;  %v1150_v33 = vmul.f32 %v1778_v15, %v1568_v13  ;;  %v1796_v15 = vpop.eup %1795 }
 0x2c1   : > { %v1798_v34 = vpop.eup %1797 }
 0x2c2   : > { %1230 = vst.msk [vmem:[%s2152_s14 + $0x10] sm:$0xf] %vm1225_vm1, %v1491_v41  ;;  %v1492_v44 = vpack.c.bf16 %v1150_v33, %v1150_v33  ;;  %v1569_v45 = vpop.f32.mrb[12].mxu1 }
 0x2c3   : > { %v1570_v3 = vpop.f32.mrb[13].mxu1 }
 0x2c4   : > { %1231 = vst.msk [vmem:[%s2152_s14 + $0x14] sm:$0xf] %vm1225_vm1, %v1492_v44  ;;  %v1571_v5 = vadd.f32 %v1570_v3, %v1569_v45  ;;  %v1572_v36 = vpop.f32.mrb[14].mxu1 }
 0x2c5   : > { %v1573_v42 = vpop.f32.mrb[15].mxu1 }
 0x2c6   : > { %v1151_v46 = vmul.f32 %v1780_v38, %v1571_v5  ;;  %v1574_v8 = vadd.f32 %v1573_v42, %v1572_v36 }
 0x2c8   : > { %v1493_v51 = vpack.c.bf16 %v1151_v46, %v1151_v46  ;;  %v1152_v21 = vmul.f32 %v1782_v11, %v1574_v8 }
 0x2ca   : > { %1232 = vst.msk [vmem:[%s2152_s14 + $0x18] sm:$0xf] %vm1225_vm1, %v1493_v51  ;;  %v1494_v47 = vpack.c.bf16 %v1152_v21, %v1152_v21  ;;  %v1575_v48 = vpop.f32.mrb[16].mxu1 }
 0x2cb   : > { %v1576_v52 = vpop.f32.mrb[17].mxu1 }
 0x2cc   : > { %1233 = vst.msk [vmem:[%s2152_s14 + $0x1c] sm:$0xf] %vm1225_vm1, %v1494_v47  ;;  %v1577_v27 = vadd.f32 %v1576_v52, %v1575_v48  ;;  %v1578_v29 = vpop.f32.mrb[18].mxu1 }
 0x2cd   : > { %v1579_v58 = vpop.f32.mrb[19].mxu1 }
 0x2ce   : > { %v1153_v54 = vmul.f32 %v1784_v56, %v1577_v27  ;;  %v1580_v55 = vadd.f32 %v1579_v58, %v1578_v29 }
 0x2d0   : > { %v1495_v2 = vpack.c.bf16 %v1153_v54, %v1153_v54  ;;  %v1154_v4 = vmul.f32 %v1786_v62, %v1580_v55 }
 0x2d2   : > { %1234 = vst.msk [vmem:[%s2152_s14 + $0x20] sm:$0xf] %vm1225_vm1, %v1495_v2  ;;  %v1496_v59 = vpack.c.bf16 %v1154_v4, %v1154_v4  ;;  %v1581_v61 = vpop.f32.mrb[20].mxu1 }
 0x2d3   : > { %v1582_v35 = vpop.f32.mrb[21].mxu1 }
 0x2d4   : > { %1235 = vst.msk [vmem:[%s2152_s14 + $0x24] sm:$0xf] %vm1225_vm1, %v1496_v59  ;;  %v1583_v37 = vadd.f32 %v1582_v35, %v1581_v61  ;;  %v1584_v9 = vpop.f32.mrb[22].mxu1 }
 0x2d5   : > { %v1585_v63 = vpop.f32.mrb[23].mxu1 }
 0x2d6   : > { %v1155_v40 = vmul.f32 %v1788_v12, %v1583_v37  ;;  %v1586_v43 = vadd.f32 %v1585_v63, %v1584_v9 }
 0x2d8   : > { %v1497_v16 = vpack.c.bf16 %v1155_v40, %v1155_v40  ;;  %v1156_v17 = vmul.f32 %v1790_v1, %v1586_v43 }
 0x2da   : > { %1236 = vst.msk [vmem:[%s2152_s14 + $0x28] sm:$0xf] %vm1225_vm1, %v1497_v16  ;;  %v1498_v19 = vpack.c.bf16 %v1156_v17, %v1156_v17  ;;  %v1587_v20 = vpop.f32.mrb[24].mxu1 }
 0x2db   : > { %v1588_v22 = vpop.f32.mrb[25].mxu1 }
 0x2dc   : > { %1237 = vst.msk [vmem:[%s2152_s14 + $0x2c] sm:$0xf] %vm1225_vm1, %v1498_v19  ;;  %v1589_v23 = vadd.f32 %v1588_v22, %v1587_v20  ;;  %v1590_v25 = vpop.f32.mrb[26].mxu1 }
 0x2dd   : > { %v1591_v50 = vpop.f32.mrb[27].mxu1 }
 0x2de   : > { %v1157_v53 = vmul.f32 %v1792_v26, %v1589_v23  ;;  %v1592_v28 = vadd.f32 %v1591_v50, %v1590_v25 }
 0x2e0   : > { %v1499_v7 = vpack.c.bf16 %v1157_v53, %v1157_v53  ;;  %v1158_v57 = vmul.f32 %v1794_v30, %v1592_v28 }
 0x2e2   : > { %1238 = vst.msk [vmem:[%s2152_s14 + $0x30] sm:$0xf] %vm1225_vm1, %v1499_v7  ;;  %v1500_v60 = vpack.c.bf16 %v1158_v57, %v1158_v57  ;;  %v1593_v31 = vpop.f32.mrb[28].mxu1 }
 0x2e3   : > { %v1594_v10 = vpop.f32.mrb[29].mxu1 }
 0x2e4   : > { %1239 = vst.msk [vmem:[%s2152_s14 + $0x34] sm:$0xf] %vm1225_vm1, %v1500_v60  ;;  %v1595_v32 = vadd.f32 %v1594_v10, %v1593_v31  ;;  %v1596_v13 = vpop.f32.mrb[30].mxu1 }
 0x2e5   : > { %v1597_v39 = vpop.f32.mrb[31].mxu1 }
 0x2e6   : > { %v1159_v41 = vmul.f32 %v1796_v15, %v1595_v32  ;;  %v1598_v33 = vadd.f32 %v1597_v39, %v1596_v13 }
 0x2e8   : > { %v1501_v44 = vpack.c.bf16 %v1159_v41, %v1159_v41  ;;  %v1160_v45 = vmul.f32 %v1798_v34, %v1598_v33 }
 0x2ea   : > { %1240 = vst.msk [vmem:[%s2152_s14 + $0x38] sm:$0xf] %vm1225_vm1, %v1501_v44  ;;  %v1502_v3 = vpack.c.bf16 %v1160_v45, %v1160_v45 }
 0x2ec   : > { %1241 = vst.msk [vmem:[%s2152_s14 + $0x3c] sm:$0xf] %vm1225_vm1, %v1502_v3 }
 0x2ed PF: > { %s13_s18 = sadd.s32 1, %s1853_s18   ;;  %s2211_s12 = smov %s1841_s15 }
 0x2ee   : > { %p10_p9 = scmp.ge.s32.totalorder %s13_s18, 34   ;;  %s2212_s13 = smov %s1845_s16 }
 0x2ef   : > { %s2213_s14 = smov %s1849_s17  ;;  %s2214_s15 = smov %s2218_s19 }
 0x2f0   : > { %s2215_s16 = smov %s2222_s20  ;;  %s2216_s17 = smov %s2226_s21 }
 0x2f1   :  { %12 = sbr.rel (!%p10_p9) target bundleno = 4 (0x4), region = 68 }

// kernel: forward.16
= control target key start
LH: loop header
LB: loop body
LE: loop exit
PB: predicated region body
PF: predicated region fallthrough
CT: control target
= control target key end

     0   :  { %s1484_s21 = smov 0   ;;  %s1486_s22 = smov 0   ;;  %s1786_s0 = inlined_call_operand.vmem [shape: bf16[512,128], index: 0, kind: input, shape index: {}]   ;;  %s1787_s1 = inlined_call_operand.vmem [shape: bf16[128,128], index: 1, kind: input, shape index: {}]   ;;  %s1788_s2 = inlined_call_operand.vmem [shape: f32[1,128], index: 2, kind: input, shape index: {}]   ;;  %s1789_s3 = inlined_call_operand.vmem [shape: bf16[512,128], index: 3, kind: input, shape index: {}]   ;;  %s1790_s4 = inlined_call_operand.vmem [shape: f32[1,128], index: 4, kind: input, shape index: {}]   ;;  %s1791_s5 = inlined_call_operand.vmem [shape: f32[1,128], index: 5, kind: input, shape index: {}]   ;;  %s1792_s6 = inlined_call_operand.vmem [shape: bf16[512,128], index: 6, kind: output, shape index: {}]  }
   0x1   :  { %s1488_s23 = smov 0  }
   0x2 LB: > { %s35_s24 = sadd.s32 1, %s1443_s22  ;;  %p1143_p0 = scmp.ge.s32.totalorder %s1447_s23, 1  ;;  %s1447_s23 = sphi %s1488_s23, %s16_s23   ;;  %s1443_s22 = sphi %s1486_s22, %s1794_s22   ;;  %s1439_s21 = sphi %s1484_s21, %s1793_s21  }
   0x3   : > { %p37_p1 = scmp.ge.s32.totalorder %s35_s24, 4  ;;  %p295_p2 = scmp.lt.s32.totalorder %s1447_s23, 5 }
   0x5   : > { %s1796_s24 = smov (%p37_p1, %s35_s24), 0  ;;  %p296_p3 = pnand %p1143_p0, %p295_p2 }
   0x6   : > { %v1377_v0 = vld [vmem:[%s1787_s1] sm:$0xff] (!%p296_p3)   ;;  %s1144_s27 = sshll.u32 (!%p296_p3), %s1439_s21, 4  ;;  %v1378_v1 = vld [vmem:[%s1787_s1 + $0x8] sm:$0xff] (!%p296_p3)   ;;  %v1379_v2 = vld [vmem:[%s1787_s1 + $0x10] sm:$0xff] (!%p296_p3)  }
   0x7   : > { %299 = sbr.rel (%p296_p3) target bundleno = 601 (0x259), region = 44  ;;  %p357_p4 = scmp.lt.s32.totalorder (!%p296_p3), %s1144_s27, 63  ;;  %1305 = vmatprep.subr.bf16.mxu0 (!%p296_p3), %v1377_v0  ;;  %1337 = vmatprep.subr.bf16.mxu1 (!%p296_p3), %v1377_v0  ;;  %v1380_v3 = vld [vmem:[%s1787_s1 + $0x18] sm:$0xff] (!%p296_p3)   ;;  %v1381_v6 = vld [vmem:[%s1787_s1 + $0x20] sm:$0xff] (!%p296_p3)   ;;  %v1382_v7 = vld [vmem:[%s1787_s1 + $0x28] sm:$0xff] (!%p296_p3)  }
   0x8   : > { %1306 = vmatpush3.bf16.msra.mxu0 (!%p296_p3), %v1377_v0  ;;  %1345 = vmatpush3.bf16.msra.mxu1 (!%p296_p3), %v1377_v0  ;;  %v1383_v8 = vld [vmem:[%s1787_s1 + $0x30] sm:$0xff] (!%p296_p3)   ;;  %v1384_v9 = vld [vmem:[%s1787_s1 + $0x38] sm:$0xff] (!%p296_p3)   ;;  %v1553_v18 = vld [vmem:[%s1788_s2] ss:$0 sm:$0xff] (!%p296_p3) }
   0x9   : > { %1307 = vmatprep.subr.bf16.mxu0 (!%p296_p3), %v1378_v1  ;;  %1338 = vmatprep.subr.bf16.mxu1 (!%p296_p3), %v1378_v1 }
   0xc   : > { %1308 = vmatpush3.bf16.msra.mxu0 (!%p296_p3), %v1378_v1  ;;  %1346 = vmatpush3.bf16.msra.mxu1 (!%p296_p3), %v1378_v1 }
   0xd   : > { %1309 = vmatprep.subr.bf16.mxu0 (!%p296_p3), %v1379_v2  ;;  %1339 = vmatprep.subr.bf16.mxu1 (!%p296_p3), %v1379_v2 }
   0xe   : > { %s1798_s27 = smov (!%p357_p4, %s1144_s27), 63 }
   0xf   : > { %s1511_s8 = sshll.u32 %s1798_s27, 2 }
  0x10   : > { %s1517_s11 = scalar_lea.vmem %s1786_s0, %s1511_s8  ;;  %1310 = vmatpush3.bf16.msra.mxu0 %v1379_v2  ;;  %1347 = vmatpush3.bf16.msra.mxu1 %v1379_v2  ;;  %s1546_s27 = scalar_lea.vmem %s1789_s3, %s1511_s8 }
  0x11   : > { %v1385_v4 = vld [vmem:[%s1517_s11] sm:$0xff]   ;;  %1311 = vmatprep.subr.bf16.mxu0 %v1380_v3  ;;  %1340 = vmatprep.subr.bf16.mxu1 %v1380_v3  ;;  %v1387_v10 = vld [vmem:[%s1517_s11 + $0x8] sm:$0xff]   ;;  %v1389_v12 = vld [vmem:[%s1517_s11 + $0x10] sm:$0xff]   ;;  %s1728_s13 = scalar_lea.vmem %s1792_s6, %s1511_s8 }
  0x12   : > { %v1386_v5 = vld [vmem:[%s1517_s11 + $0x20] sm:$0xff]   ;;  %1321 = vmatprep.mubr.bf16.mxu0 %v1385_v4  ;;  %v1388_v11 = vld [vmem:[%s1517_s11 + $0x28] sm:$0xff]   ;;  %v1391_v13 = vld [vmem:[%s1517_s11 + $0x30] sm:$0xff]  }
  0x13   : > { %1329 = vmatprep.mubr.bf16.mxu1 %v1386_v5  ;;  %v1390_v14 = vld [vmem:[%s1517_s11 + $0x18] sm:$0xff]   ;;  %v1279_v16 = vld [vmem:[%s1546_s27 + $0x28] sm:$0xff]   ;;  %v1204_v21 = vld [vmem:[%s1546_s27] sm:$0xff]  }
  0x14   : > { %1312 = vmatpush3.bf16.msra.mxu0 %v1380_v3  ;;  %1348 = vmatpush3.bf16.msra.mxu1 %v1380_v3  ;;  %v1392_v15 = vld [vmem:[%s1517_s11 + $0x38] sm:$0xff]   ;;  %v1275_v17 = vld [vmem:[%s1546_s27 + $0x8] sm:$0xff]   ;;  %v1225_v19 = vunpack.c.l.bf16 %v1279_v16  ;;  %v1205_v31 = vunpack.c.l.bf16 %v1204_v21  ;;  %v1278_v38 = vld [vmem:[%s1546_s27 + $0x20] sm:$0xff]   ;;  %v1226_v39 = vunpack.c.h.bf16 %v1279_v16  ;;  %v1206_v51 = vunpack.c.h.bf16 %v1204_v21 }
  0x15   : > { %1313 = vmatprep.subr.bf16.mxu0 %v1381_v6  ;;  %1341 = vmatprep.subr.bf16.mxu1 %v1381_v6  ;;  %v1209_v20 = vunpack.c.l.bf16 %v1275_v17  ;;  %v1210_v30 = vunpack.c.h.bf16 %v1275_v17  ;;  %v1221_v40 = vunpack.c.l.bf16 %v1278_v38  ;;  %v1222_v50 = vunpack.c.h.bf16 %v1278_v38  ;;  %v1277_v52 = vld [vmem:[%s1546_s27 + $0x18] sm:$0xff]   ;;  %v1276_v2 = vld [vmem:[%s1546_s27 + $0x10] sm:$0xff]  }
  0x16   : > { %v1218_v62 = vunpack.c.h.bf16 %v1277_v52  ;;  %v1217_v63 = vunpack.c.l.bf16 %v1277_v52  ;;  %v1280_v5 = vld [vmem:[%s1546_s27 + $0x30] sm:$0xff]   ;;  %v1281_v16 = vld [vmem:[%s1546_s27 + $0x38] sm:$0xff]  }
  0x18   : > { %1314 = vmatpush3.bf16.msra.mxu0 %v1381_v6  ;;  %1349 = vmatpush3.bf16.msra.mxu1 %v1381_v6 }
  0x19   : > { %1315 = vmatprep.subr.bf16.mxu0 %v1382_v7  ;;  %1342 = vmatprep.subr.bf16.mxu1 %v1382_v7 }
  0x1c   : > { %1316 = vmatpush3.bf16.msra.mxu0 %v1382_v7  ;;  %1350 = vmatpush3.bf16.msra.mxu1 %v1382_v7 }
  0x1d   : > { %1317 = vmatprep.subr.bf16.mxu0 %v1383_v8  ;;  %1343 = vmatprep.subr.bf16.mxu1 %v1383_v8 }
  0x20   : > { %1318 = vmatpush3.bf16.msra.mxu0 %v1383_v8  ;;  %1351 = vmatpush3.bf16.msra.mxu1 %v1383_v8  ;;  %v1214_v8 = vunpack.c.h.bf16 %v1276_v2 }
  0x21   : > { %1319 = vmatprep.subr.bf16.mxu0 %v1384_v9  ;;  %1344 = vmatprep.subr.bf16.mxu1 %v1384_v9 }
  0x24   : > { %1320 = vmatpush3.bf16.msra.mxu0 %v1384_v9  ;;  %1352 = vmatpush3.bf16.msra.mxu1 %v1384_v9  ;;  %v1213_v9 = vunpack.c.l.bf16 %v1276_v2 }
  0x27   : > { %1322 = vmatmul.mubr.bf16.vlgmr.msra.gmra.mrb[0].mxu0 %v1387_v10  ;;  %1330 = vmatmul.mubr.bf16.vlgmr.msra.gmra.mrb[0].mxu1 %v1388_v11 }
  0x28   : > { %1325 = vmatprep.mubr.bf16.mxu0 %v1389_v12  ;;  %1333 = vmatprep.mubr.bf16.mxu1 %v1391_v13  ;;  %v1230_v12 = vunpack.c.h.bf16 %v1280_v5  ;;  %v1229_v13 = vunpack.c.l.bf16 %v1280_v5 }
  0x2f   : > { %1326 = vmatmul.mubr.bf16.gmra.mrb[4].mxu0 %v1390_v14  ;;  %1334 = vmatmul.mubr.bf16.gmra.mrb[4].mxu1 %v1392_v15 }
  0xfa   : > { %v1323_v22 = vpop.f32.mrb[0].mxu0  ;;  %v1331_v23 = vpop.f32.mrb[0].mxu1 }
  0xfb   : > { %v580_v24 = vadd.f32 %v1323_v22, %v1553_v18  ;;  %v612_v25 = vadd.f32 %v1331_v23, %v1553_v18  ;;  %v571_v26 = vpop.f32.mrb[1].mxu0  ;;  %v603_v27 = vpop.f32.mrb[1].mxu1  ;;  %v1234_v22 = vunpack.c.h.bf16 %v1281_v16  ;;  %v1233_v23 = vunpack.c.l.bf16 %v1281_v16 }
  0xfc   : > { %v1324_v28 = vpop.f32.mrb[2].mxu0  ;;  %v1332_v29 = vpop.f32.mrb[2].mxu1  ;;  %v572_v32 = vadd.f32 %v1553_v18, %v571_v26  ;;  %v604_v41 = vadd.f32 %v1553_v18, %v603_v27 }
  0xfd   : > { %v583_v33 = vadd.f32 %v1324_v28, %v1553_v18  ;;  %v574_v34 = vpop.f32.mrb[3].mxu0  ;;  %v606_v35 = vpop.f32.mrb[3].mxu1  ;;  %v1560_v36 = vadd.f32 %v1225_v19, %v612_v25  ;;  %v1562_v37 = vadd.f32 %v1209_v20, %v580_v24  ;;  %v615_v42 = vadd.f32 %v1332_v29, %v1553_v18 }
  0xfe   : > { %v1571_v44 = vadd.f32 %v1205_v31, %v572_v32  ;;  %v575_v54 = vadd.f32 %v1553_v18, %v574_v34  ;;  %v607_v55 = vadd.f32 %v1553_v18, %v606_v35  ;;  %v1580_v57 = vadd.f32 %v1221_v40, %v604_v41 }
  0xff   : > { %702 = vadd.xlane.f32.xlu0 %v1560_v36  ;;  %686 = vadd.xlane.f32.xlu1 %v1562_v37  ;;  %v1569_v43 = vadd.f32 %v1210_v30, %v583_v33  ;;  %v1578_v56 = vadd.f32 %v1226_v39, %v615_v42 }
 0x100   : > { %v1586_v0 = vadd.f32 %v1222_v50, %v607_v55  ;;  %v1588_v1 = vadd.f32 %v1206_v51, %v575_v54 }
 0x102   : > { %v1327_v45 = vpop.f32.mrb[4].mxu0  ;;  %v1335_v46 = vpop.f32.mrb[4].mxu1 }
 0x103   : > { %688 = vadd.xlane.f32.xlu1 %v1569_v43  ;;  %682 = vadd.xlane.f32.xlu0 %v1571_v44  ;;  %v587_v47 = vpop.f32.mrb[5].mxu0  ;;  %v619_v48 = vpop.f32.mrb[5].mxu1  ;;  %v596_v60 = vadd.f32 %v1327_v45, %v1553_v18  ;;  %v628_v20 = vadd.f32 %v1335_v46, %v1553_v18 }
 0x104   : > { %v1328_v49 = vpop.f32.mrb[6].mxu0  ;;  %v1336_v53 = vpop.f32.mrb[6].mxu1  ;;  %v588_v6 = vadd.f32 %v1553_v18, %v587_v47  ;;  %v620_v10 = vadd.f32 %v1553_v18, %v619_v48 }
 0x105   : > { %v590_v58 = vpop.f32.mrb[7].mxu0  ;;  %v622_v59 = vpop.f32.mrb[7].mxu1  ;;  %v599_v61 = vadd.f32 %v1328_v49, %v1553_v18  ;;  %v1595_v4 = vadd.f32 %v1217_v63, %v596_v60  ;;  %v631_v21 = vadd.f32 %v1336_v53, %v1553_v18  ;;  %v1621_v25 = vadd.f32 %v1233_v23, %v628_v20 }
 0x106   : > { %v591_v7 = vadd.f32 %v1553_v18, %v590_v58  ;;  %v623_v11 = vadd.f32 %v1553_v18, %v622_v59  ;;  %v1606_v15 = vadd.f32 %v1213_v9, %v588_v6  ;;  %v1613_v19 = vadd.f32 %v1229_v13, %v620_v10 }
 0x107   : > { %704 = vadd.xlane.f32.xlu1 %v1578_v56  ;;  %698 = vadd.xlane.f32.xlu0 %v1580_v57  ;;  %v1593_v3 = vadd.f32 %v1218_v62, %v599_v61  ;;  %v1619_v24 = vadd.f32 %v1234_v22, %v631_v21 }
 0x108   : > { %v1604_v14 = vadd.f32 %v1214_v8, %v591_v7  ;;  %v1611_v17 = vadd.f32 %v1230_v12, %v623_v11 }
 0x10b   : > { %700 = vadd.xlane.f32.xlu1 %v1586_v0  ;;  %684 = vadd.xlane.f32.xlu0 %v1588_v1 }
 0x10f   : > { %696 = vadd.xlane.f32.xlu1 %v1593_v3  ;;  %694 = vadd.xlane.f32.xlu0 %v1595_v4 }
 0x113   : > { %692 = vadd.xlane.f32.xlu1 %v1604_v14  ;;  %690 = vadd.xlane.f32.xlu0 %v1606_v15 }
 0x117   : > { %708 = vadd.xlane.f32.xlu1 %v1611_v17  ;;  %706 = vadd.xlane.f32.xlu0 %v1613_v19 }
 0x11b   : > { %712 = vadd.xlane.f32.xlu1 %v1619_v24  ;;  %710 = vadd.xlane.f32.xlu0 %v1621_v25 }
 0x18c   : > { %v703_v26 = vpop.xlane.xlu0 %702  ;;  %v687_v27 = vpop.xlane.xlu1 %686 }
 0x18d   : > { %v725_v28 = vmul.f32 0.0078125, %v703_v26  ;;  %v717_v29 = vmul.f32 0.0078125, %v687_v27 }
 0x18f   : > { %v1626_v18 = vsub.f32 %v1562_v37, %v717_v29  ;;  %v1629_v32 = vsub.f32 %v1560_v36, %v725_v28 }
 0x190   : > { %v689_v30 = vpop.xlane.xlu1 %688  ;;  %v683_v31 = vpop.xlane.xlu0 %682 }
 0x191   : > { %v718_v33 = vmul.f32 0.0078125, %v689_v30  ;;  %v715_v34 = vmul.f32 0.0078125, %v683_v31  ;;  %v749_v35 = vmul.f32 %v1626_v18, %v1626_v18  ;;  %v757_v45 = vmul.f32 %v1629_v32, %v1629_v32 }
 0x193   : > { %v1634_v38 = vsub.f32 %v1569_v43, %v718_v33  ;;  %767 = vadd.xlane.f32.xlu0 %v749_v35  ;;  %v1637_v39 = vsub.f32 %v1571_v44, %v715_v34 }
 0x194   : > { %v705_v40 = vpop.xlane.xlu1 %704  ;;  %v699_v37 = vpop.xlane.xlu0 %698 }
 0x195   : > { %v726_v41 = vmul.f32 0.0078125, %v705_v40  ;;  %v723_v42 = vmul.f32 0.0078125, %v699_v37  ;;  %v750_v36 = vmul.f32 %v1634_v38, %v1634_v38  ;;  %v747_v44 = vmul.f32 %v1637_v39, %v1637_v39 }
 0x197   : > { %v1644_v46 = vsub.f32 %v1578_v56, %v726_v41  ;;  %769 = vadd.xlane.f32.xlu1 %v750_v36  ;;  %783 = vadd.xlane.f32.xlu0 %v757_v45  ;;  %v1649_v48 = vsub.f32 %v1580_v57, %v723_v42 }
 0x198   : > { %v701_v43 = vpop.xlane.xlu1 %700  ;;  %v685_v47 = vpop.xlane.xlu0 %684 }
 0x199   : > { %v724_v49 = vmul.f32 0.0078125, %v701_v43  ;;  %v716_v50 = vmul.f32 0.0078125, %v685_v47  ;;  %v758_v51 = vmul.f32 %v1644_v46, %v1644_v46  ;;  %v755_v57 = vmul.f32 %v1649_v48, %v1649_v48 }
 0x19b   : > { %v1654_v52 = vsub.f32 %v1588_v1, %v716_v50  ;;  %785 = vadd.xlane.f32.xlu1 %v758_v51  ;;  %763 = vadd.xlane.f32.xlu0 %v747_v44  ;;  %v1657_v53 = vsub.f32 %v1586_v0, %v724_v49 }
 0x19c   : > { %v697_v54 = vpop.xlane.xlu1 %696  ;;  %v695_v55 = vpop.xlane.xlu0 %694 }
 0x19d   : > { %v722_v56 = vmul.f32 0.0078125, %v697_v54  ;;  %v721_v58 = vmul.f32 0.0078125, %v695_v55  ;;  %v748_v59 = vmul.f32 %v1654_v52, %v1654_v52  ;;  %v756_v63 = vmul.f32 %v1657_v53, %v1657_v53 }
 0x19f   : > { %v1664_v60 = vsub.f32 %v1595_v4, %v721_v58  ;;  %779 = vadd.xlane.f32.xlu0 %v755_v57  ;;  %765 = vadd.xlane.f32.xlu1 %v748_v59  ;;  %v1669_v0 = vsub.f32 %v1593_v3, %v722_v56  ;;  %v1709_v57 = vld [vmem:[%s1790_s4] ss:$0 sm:$0xff] }
 0x1a0   : > { %v693_v61 = vpop.xlane.xlu1 %692  ;;  %v691_v62 = vpop.xlane.xlu0 %690 }
 0x1a1   : > { %v720_v1 = vmul.f32 0.0078125, %v693_v61  ;;  %v719_v2 = vmul.f32 0.0078125, %v691_v62  ;;  %v753_v5 = vmul.f32 %v1664_v60, %v1664_v60  ;;  %v754_v3 = vmul.f32 %v1669_v0, %v1669_v0 }
 0x1a3   : > { %v1674_v6 = vsub.f32 %v1606_v15, %v719_v2  ;;  %781 = vadd.xlane.f32.xlu1 %v756_v63  ;;  %775 = vadd.xlane.f32.xlu0 %v753_v5  ;;  %v1677_v4 = vsub.f32 %v1604_v14, %v720_v1 }
 0x1a4   : > { %v709_v7 = vpop.xlane.xlu1 %708  ;;  %v707_v8 = vpop.xlane.xlu0 %706 }
 0x1a5   : > { %v728_v9 = vmul.f32 0.0078125, %v709_v7  ;;  %v727_v10 = vmul.f32 0.0078125, %v707_v8  ;;  %v751_v11 = vmul.f32 %v1674_v6, %v1674_v6  ;;  %v752_v14 = vmul.f32 %v1677_v4, %v1677_v4 }
 0x1a7   : > { %v1684_v12 = vsub.f32 %v1613_v19, %v727_v10  ;;  %777 = vadd.xlane.f32.xlu1 %v754_v3  ;;  %771 = vadd.xlane.f32.xlu0 %v751_v11  ;;  %v1689_v16 = vsub.f32 %v1611_v17, %v728_v9  ;;  %v1716_v9 = vld [vmem:[%s1791_s5] ss:$0 sm:$0xff] }
 0x1a8   : > { %v713_v13 = vpop.xlane.xlu1 %712  ;;  %v711_v15 = vpop.xlane.xlu0 %710 }
 0x1a9   : > { %v730_v20 = vmul.f32 0.0078125, %v713_v13  ;;  %v729_v21 = vmul.f32 0.0078125, %v711_v15  ;;  %v759_v22 = vmul.f32 %v1684_v12, %v1684_v12  ;;  %v760_v26 = vmul.f32 %v1689_v16, %v1689_v16 }
 0x1ab   : > { %v1694_v23 = vsub.f32 %v1621_v25, %v729_v21  ;;  %773 = vadd.xlane.f32.xlu1 %v752_v14  ;;  %787 = vadd.xlane.f32.xlu0 %v759_v22  ;;  %v1697_v19 = vsub.f32 %v1619_v24, %v730_v20 }
 0x1ad   : > { %v761_v17 = vmul.f32 %v1694_v23, %v1694_v23  ;;  %v762_v27 = vmul.f32 %v1697_v19, %v1697_v19 }
 0x1af   : > { %789 = vadd.xlane.f32.xlu1 %v760_v26  ;;  %791 = vadd.xlane.f32.xlu0 %v761_v17 }
 0x1b3   : > { %793 = vadd.xlane.f32.xlu1 %v762_v27 }
 0x220   : > { %v768_v28 = vpop.xlane.xlu0 %767 }
 0x221   : > { %v797_v25 = vmul.f32 0.0078125, %v768_v28 }
 0x223   : > { %v813_v29 = vadd.f32 1e-05, %v797_v25 }
 0x224   : > { %v770_v30 = vpop.xlane.xlu1 %769  ;;  %v784_v31 = vpop.xlane.xlu0 %783 }
 0x225   : > { %1393 = vrsqrt.f32 %v813_v29  ;;  %v798_v24 = vmul.f32 0.0078125, %v770_v30  ;;  %v805_v33 = vmul.f32 0.0078125, %v784_v31 }
 0x227   : > { %v814_v34 = vadd.f32 1e-05, %v798_v24  ;;  %v821_v35 = vadd.f32 1e-05, %v805_v33 }
 0x228   : > { %v786_v40 = vpop.xlane.xlu1 %785  ;;  %v764_v37 = vpop.xlane.xlu0 %763 }
 0x229   : > { %1395 = vrsqrt.f32 %v814_v34  ;;  %v806_v41 = vmul.f32 0.0078125, %v786_v40  ;;  %v795_v42 = vmul.f32 0.0078125, %v764_v37 }
 0x22a   : > { %1397 = vrsqrt.f32 %v821_v35 }
 0x22b   : > { %v822_v36 = vadd.f32 1e-05, %v806_v41  ;;  %v811_v45 = vadd.f32 1e-05, %v795_v42 }
 0x22c   : > { %v766_v43 = vpop.xlane.xlu1 %765  ;;  %v780_v47 = vpop.xlane.xlu0 %779 }
 0x22d   : > { %1399 = vrsqrt.f32 %v822_v36  ;;  %v796_v44 = vmul.f32 0.0078125, %v766_v43  ;;  %v803_v49 = vmul.f32 0.0078125, %v780_v47 }
 0x22e   : > { %1401 = vrsqrt.f32 %v811_v45 }
 0x22f   : > { %v1394_v50 = vpop.eup %1393  ;;  %v812_v51 = vadd.f32 1e-05, %v796_v44  ;;  %v819_v54 = vadd.f32 1e-05, %v803_v49 }
 0x230   : > { %v845_v55 = vmul.f32 %v1394_v50, %v1626_v18  ;;  %v782_v56 = vpop.xlane.xlu1 %781  ;;  %v776_v58 = vpop.xlane.xlu0 %775 }
 0x231   : > { %1403 = vrsqrt.f32 %v812_v51  ;;  %v804_v59 = vmul.f32 0.0078125, %v782_v56  ;;  %v801_v61 = vmul.f32 0.0078125, %v776_v58 }
 0x232   : > { %1405 = vrsqrt.f32 %v819_v54  ;;  %v868_v5 = vmul.f32 %v1709_v57, %v845_v55 }
 0x233   : > { %v1396_v62 = vpop.eup %1395  ;;  %v820_v63 = vadd.f32 1e-05, %v804_v59  ;;  %v817_v1 = vadd.f32 1e-05, %v801_v61 }
 0x234   : > { %v1398_v2 = vpop.eup %1397  ;;  %v846_v7 = vmul.f32 %v1396_v62, %v1634_v38  ;;  %v778_v18 = vpop.xlane.xlu1 %777  ;;  %v891_v21 = vadd.f32 %v1716_v9, %v868_v5 }
 0x235   : > { %v772_v8 = vpop.xlane.xlu0 %771  ;;  %v853_v10 = vmul.f32 %v1398_v2, %v1629_v32  ;;  %1407 = vrsqrt.f32 %v820_v63  ;;  %v802_v3 = vmul.f32 0.0078125, %v778_v18 }
 0x236   : > { %v799_v11 = vmul.f32 0.0078125, %v772_v8  ;;  %v869_v13 = vmul.f32 %v1709_v57, %v846_v7  ;;  %1409 = vrsqrt.f32 %v817_v1 }
 0x237   : > { %v1400_v15 = vpop.eup %1399  ;;  %v818_v14 = vadd.f32 1e-05, %v802_v3  ;;  %v876_v26 = vmul.f32 %v1709_v57, %v853_v10 }
 0x238   : > { %v815_v20 = vadd.f32 1e-05, %v799_v11  ;;  %v1402_v38 = vpop.eup %1401  ;;  %v892_v22 = vadd.f32 %v1716_v9, %v869_v13  ;;  %v854_v17 = vmul.f32 %v1400_v15, %v1644_v46  ;;  %v774_v32 = vpop.xlane.xlu1 %773 }
 0x239   : > { %v788_v27 = vpop.xlane.xlu0 %787  ;;  %v843_v28 = vmul.f32 %v1402_v38, %v1637_v39  ;;  %1411 = vrsqrt.f32 %v818_v14  ;;  %v800_v25 = vmul.f32 0.0078125, %v774_v32  ;;  %v899_v35 = vadd.f32 %v1716_v9, %v876_v26 }
 0x23a   : > { %v1243_v29 = vpack.c.bf16 %v892_v22, %v891_v21  ;;  %v877_v30 = vmul.f32 %v1709_v57, %v854_v17  ;;  %1413 = vrsqrt.f32 %v815_v20  ;;  %v807_v31 = vmul.f32 0.0078125, %v788_v27 }
 0x23b   : > { %v1404_v24 = vpop.eup %1403  ;;  %v866_v46 = vmul.f32 %v1709_v57, %v843_v28  ;;  %v816_v33 = vadd.f32 1e-05, %v800_v25 }
 0x23c   : > { %v1406_v34 = vpop.eup %1405  ;;  %1282 = vst [vmem:[%s1728_s13 + $0x8] sm:$0xff] %v1243_v29   ;;  %v900_v40 = vadd.f32 %v1716_v9, %v877_v30  ;;  %v844_v39 = vmul.f32 %v1404_v24, %v1654_v52  ;;  %v823_v37 = vadd.f32 1e-05, %v807_v31  ;;  %v790_v41 = vpop.xlane.xlu1 %789 }
 0x23d   : > { %v792_v42 = vpop.xlane.xlu0 %791  ;;  %v851_v36 = vmul.f32 %v1406_v34, %v1649_v48  ;;  %1415 = vrsqrt.f32 %v816_v33  ;;  %v808_v45 = vmul.f32 0.0078125, %v790_v41  ;;  %v889_v50 = vadd.f32 %v1716_v9, %v866_v46 }
 0x23e   : > { %v1263_v43 = vpack.c.bf16 %v900_v40, %v899_v35  ;;  %v867_v47 = vmul.f32 %v1709_v57, %v844_v39  ;;  %1417 = vrsqrt.f32 %v823_v37  ;;  %v809_v44 = vmul.f32 0.0078125, %v792_v42 }
 0x23f   : > { %v1408_v49 = vpop.eup %1407  ;;  %v824_v51 = vadd.f32 1e-05, %v808_v45  ;;  %v874_v55 = vmul.f32 %v1709_v57, %v851_v36 }
 0x240   : > { %v1410_v54 = vpop.eup %1409  ;;  %1286 = vst [vmem:[%s1728_s13 + $0x28] sm:$0xff] %v1263_v43   ;;  %v890_v52 = vadd.f32 %v1716_v9, %v867_v47  ;;  %v852_v48 = vmul.f32 %v1408_v49, %v1657_v53  ;;  %v825_v56 = vadd.f32 1e-05, %v809_v44  ;;  %v794_v58 = vpop.xlane.xlu1 %793 }
 0x241   : > { %v849_v59 = vmul.f32 %v1410_v54, %v1664_v60  ;;  %1419 = vrsqrt.f32 %v824_v51  ;;  %v810_v61 = vmul.f32 0.0078125, %v794_v58  ;;  %v897_v7 = vadd.f32 %v1716_v9, %v874_v55 }
 0x242   : > { %v1238_v62 = vpack.c.bf16 %v890_v52, %v889_v50  ;;  %v875_v63 = vmul.f32 %v1709_v57, %v852_v48  ;;  %1421 = vrsqrt.f32 %v825_v56 }
 0x243   : > { %v1412_v1 = vpop.eup %1411  ;;  %v826_v2 = vadd.f32 1e-05, %v810_v61  ;;  %v872_v53 = vmul.f32 %v1709_v57, %v849_v59 }
 0x244   : > { %v1414_v5 = vpop.eup %1413  ;;  %1239 = vst [vmem:[%s1728_s13] sm:$0xff] %v1238_v62   ;;  %v898_v18 = vadd.f32 %v1716_v9, %v875_v63  ;;  %v850_v8 = vmul.f32 %v1412_v1, %v1669_v0 }
 0x245   : > { %v847_v60 = vmul.f32 %v1414_v5, %v1674_v6  ;;  %1423 = vrsqrt.f32 %v826_v2  ;;  %v895_v15 = vadd.f32 %v1716_v9, %v872_v53 }
 0x246   : > { %v1258_v10 = vpack.c.bf16 %v898_v18, %v897_v7  ;;  %v873_v3 = vmul.f32 %v1709_v57, %v850_v8 }
 0x247   : > { %v1416_v11 = vpop.eup %1415  ;;  %v870_v20 = vmul.f32 %v1709_v57, %v847_v60 }
 0x248   : > { %v1418_v13 = vpop.eup %1417  ;;  %1285 = vst [vmem:[%s1728_s13 + $0x20] sm:$0xff] %v1258_v10   ;;  %v896_v14 = vadd.f32 %v1716_v9, %v873_v3  ;;  %v848_v38 = vmul.f32 %v1416_v11, %v1677_v4 }
 0x249   : > { %v855_v0 = vmul.f32 %v1418_v13, %v1684_v12  ;;  %v893_v17 = vadd.f32 %v1716_v9, %v870_v20 }
 0x24a   : > { %v1253_v6 = vpack.c.bf16 %v896_v14, %v895_v15  ;;  %v871_v21 = vmul.f32 %v1709_v57, %v848_v38 }
 0x24b   : > { %v1420_v22 = vpop.eup %1419  ;;  %v878_v27 = vmul.f32 %v1709_v57, %v855_v0 }
 0x24c   : > { %v1422_v26 = vpop.eup %1421  ;;  %1284 = vst [vmem:[%s1728_s13 + $0x18] sm:$0xff] %v1253_v6   ;;  %v894_v32 = vadd.f32 %v1716_v9, %v871_v21  ;;  %v856_v28 = vmul.f32 %v1420_v22, %v1689_v16 }
 0x24d   : > { %v857_v4 = vmul.f32 %v1422_v26, %v1694_v23  ;;  %v901_v30 = vadd.f32 %v1716_v9, %v878_v27 }
 0x24e   : > { %v1248_v25 = vpack.c.bf16 %v894_v32, %v893_v17  ;;  %v879_v12 = vmul.f32 %v1709_v57, %v856_v28 }
 0x24f   : > { %v1424_v29 = vpop.eup %1423  ;;  %v880_v24 = vmul.f32 %v1709_v57, %v857_v4 }
 0x250   : > { %1283 = vst [vmem:[%s1728_s13 + $0x10] sm:$0xff] %v1248_v25   ;;  %v902_v31 = vadd.f32 %v1716_v9, %v879_v12  ;;  %v858_v46 = vmul.f32 %v1424_v29, %v1697_v19 }
 0x251   : > { %v903_v16 = vadd.f32 %v1716_v9, %v880_v24 }
 0x252   : > { %v1268_v33 = vpack.c.bf16 %v902_v31, %v901_v30  ;;  %v881_v34 = vmul.f32 %v1709_v57, %v858_v46 }
 0x254   : > { %1287 = vst [vmem:[%s1728_s13 + $0x30] sm:$0xff] %v1268_v33   ;;  %v904_v23 = vadd.f32 %v1716_v9, %v881_v34 }
 0x256   : > { %v1273_v35 = vpack.c.bf16 %v904_v23, %v903_v16 }
 0x258   : > { %1288 = vst [vmem:[%s1728_s13 + $0x38] sm:$0xff] %v1273_v35  }
 0x259 PF: > { %s16_s23 = sadd.s32 1, %s1447_s23   ;;  %s1793_s21 = smov %s1443_s22 }
 0x25a   : > { %p13_p5 = scmp.ge.s32.totalorder %s16_s23, 6   ;;  %s1794_s22 = smov %s1796_s24 }
 0x25c   :  { %15 = sbr.rel (!%p13_p5) target bundleno = 2 (0x2), region = 89 }

// kernel: forward.17
= control target key start
LH: loop header
LB: loop body
LE: loop exit
PB: predicated region body
PF: predicated region fallthrough
CT: control target
= control target key end

     0   :  { %s1019_s12 = smov 0   ;;  %s1021_s13 = smov 0   ;;  %s1179_s0 = inlined_call_operand.vmem [shape: bf16[512,128], index: 0, kind: input, shape index: {}]   ;;  %s1180_s1 = inlined_call_operand.vmem [shape: bf16[128,256], index: 1, kind: input, shape index: {}]   ;;  %s1181_s2 = inlined_call_operand.vmem [shape: f32[1,256], index: 2, kind: input, shape index: {}]   ;;  %s1182_s3 = inlined_call_operand.vmem [shape: bf16[512,256], index: 3, kind: output, shape index: {}]  }
   0x1   :  { %s1023_s14 = smov 0  }
   0x2 LB: > { %s32_s15 = sadd.s32 1, %s992_s13  ;;  %p836_p0 = scmp.ge.s32.totalorder %s996_s14, 1  ;;  %s996_s14 = sphi %s1023_s14, %s13_s14   ;;  %s992_s13 = sphi %s1021_s13, %s1184_s13   ;;  %s988_s12 = sphi %s1019_s12, %s1183_s12  }
   0x3   : > { %p34_p1 = scmp.ge.s32.totalorder %s32_s15, 4  ;;  %p193_p2 = scmp.lt.s32.totalorder %s996_s14, 5 }
   0x5   : > { %s1186_s15 = smov (%p34_p1, %s32_s15), 0  ;;  %p194_p3 = pnand %p836_p0, %p193_p2 }
   0x6   : > { %v942_v0 = vld [vmem:[%s1180_s1 + $0x4] ss:$8 sps:$4 sm:$0xff] (!%p194_p3)   ;;  %s837_s18 = sshll.u32 (!%p194_p3), %s988_s12, 4  ;;  %v944_v1 = vld [vmem:[%s1180_s1] ss:$8 sps:$4 sm:$0xff] (!%p194_p3)   ;;  %v998_v2 = vmov (!%p194_p3), 0   ;;  %v312_v25 = vlaneseq (!%p194_p3) }
   0x7   : > { %197 = sbr.rel (%p194_p3) target bundleno = 286 (0x11e), region = 32  ;;  %482 = vmatprep.mubr.bf16.mxu0 (!%p194_p3), %v998_v2  ;;  %522 = vmatprep.mubr.bf16.mxu1 (!%p194_p3), %v998_v2  ;;  %p240_p4 = scmp.lt.s32.totalorder (!%p194_p3), %s837_s18, 63  ;;  %v945_v3 = vld [vmem:[%s1180_s1 + $0x14] ss:$8 sps:$4 sm:$0xff] (!%p194_p3)   ;;  %v947_v4 = vld [vmem:[%s1180_s1 + $0x10] ss:$8 sps:$4 sm:$0xff] (!%p194_p3)  }
   0x8   : > { %450 = vmatprep.subr.bf16.mxu0 (!%p194_p3), %v942_v0  ;;  %901 = vmatprep.subr.bf16.mxu1 (!%p194_p3), %v942_v0  ;;  %v948_v5 = vld [vmem:[%s1180_s1 + $0x24] ss:$8 sps:$4 sm:$0xff] (!%p194_p3)   ;;  %v950_v6 = vld [vmem:[%s1180_s1 + $0x20] ss:$8 sps:$4 sm:$0xff] (!%p194_p3)   ;;  %v951_v7 = vld [vmem:[%s1180_s1 + $0x34] ss:$8 sps:$4 sm:$0xff] (!%p194_p3)  }
   0x9   : > { %451 = vmatpush1.bf16.msra.mxu0 (!%p194_p3), %v944_v1  ;;  %909 = vmatpush1.bf16.msra.mxu1 (!%p194_p3), %v944_v1  ;;  %v953_v8 = vld [vmem:[%s1180_s1 + $0x30] ss:$8 sps:$4 sm:$0xff] (!%p194_p3)   ;;  %v954_v9 = vld [vmem:[%s1180_s1 + $0x44] ss:$8 sps:$4 sm:$0xff] (!%p194_p3)   ;;  %v956_v10 = vld [vmem:[%s1180_s1 + $0x40] ss:$8 sps:$4 sm:$0xff] (!%p194_p3)  }
   0xa   : > { %452 = vmatprep.subr.bf16.mxu0 (!%p194_p3), %v945_v3  ;;  %902 = vmatprep.subr.bf16.mxu1 (!%p194_p3), %v945_v3  ;;  %v957_v11 = vld [vmem:[%s1180_s1 + $0x54] ss:$8 sps:$4 sm:$0xff] (!%p194_p3)   ;;  %v959_v12 = vld [vmem:[%s1180_s1 + $0x50] ss:$8 sps:$4 sm:$0xff] (!%p194_p3)   ;;  %v960_v13 = vld [vmem:[%s1180_s1 + $0x64] ss:$8 sps:$4 sm:$0xff] (!%p194_p3)  }
   0xb   : > { %v962_v14 = vld [vmem:[%s1180_s1 + $0x60] ss:$8 sps:$4 sm:$0xff] (!%p194_p3)   ;;  %v963_v15 = vld [vmem:[%s1180_s1 + $0x74] ss:$8 sps:$4 sm:$0xff] (!%p194_p3)   ;;  %v965_v16 = vld [vmem:[%s1180_s1 + $0x70] ss:$8 sps:$4 sm:$0xff] (!%p194_p3)  }
   0xc   : > { %v313_v26 = vshrl.u32 (!%p194_p3), %v312_v25, 7  ;;  %v310_v28 = vld [vmem:[%s1181_s2] sm:$0x3] (!%p194_p3) }
   0xd   : > { %453 = vmatpush1.bf16.msra.mxu0 (!%p194_p3), %v947_v4  ;;  %910 = vmatpush1.bf16.msra.mxu1 (!%p194_p3), %v947_v4 }
   0xe   : > { %s1188_s18 = smov (!%p240_p4, %s837_s18), 63  ;;  %454 = vmatprep.subr.bf16.mxu0 %v948_v5  ;;  %903 = vmatprep.subr.bf16.mxu1 %v948_v5  ;;  %v314_v27 = vsub.s32 0, %v313_v26  ;;  %v318_v29 = vsub.s32 1, %v313_v26 }
   0xf   : > { %s838_s27 = sshll.u32 %s1188_s18, 2  ;;  %s884_s5 = sshll.u32 %s1188_s18, 3 }
  0x10   : > { %s1066_s7 = scalar_lea.vmem %s1179_s0, %s838_s27  ;;  %v1112_v30 = vrot.slane %v310_v28, %v314_v27  ;;  %v1114_v31 = vrot.slane %v310_v28, %v318_v29 }
  0x11   : > { %455 = vmatpush1.bf16.msra.mxu0 %v950_v6  ;;  %911 = vmatpush1.bf16.msra.mxu1 %v950_v6  ;;  %v966_v17 = vld [vmem:[%s1066_s7] sm:$0xff]   ;;  %v968_v19 = vld [vmem:[%s1066_s7 + $0x8] sm:$0xff]   ;;  %v970_v21 = vld [vmem:[%s1066_s7 + $0x10] sm:$0xff]  }
  0x12   : > { %456 = vmatprep.subr.bf16.mxu0 %v951_v7  ;;  %904 = vmatprep.subr.bf16.mxu1 %v951_v7  ;;  %v967_v18 = vld [vmem:[%s1066_s7 + $0x20] sm:$0xff]   ;;  %v969_v20 = vld [vmem:[%s1066_s7 + $0x28] sm:$0xff]   ;;  %v971_v22 = vld [vmem:[%s1066_s7 + $0x30] sm:$0xff]  }
  0x13   : > { %v972_v23 = vld [vmem:[%s1066_s7 + $0x18] sm:$0xff]  }
  0x14   : > { %v973_v24 = vld [vmem:[%s1066_s7 + $0x38] sm:$0xff]   ;;  %s1128_s7 = scalar_lea.vmem %s1182_s3, %s884_s5 }
  0x15   : > { %457 = vmatpush1.bf16.msra.mxu0 %v953_v8  ;;  %912 = vmatpush1.bf16.msra.mxu1 %v953_v8 }
  0x16   : > { %458 = vmatprep.subr.bf16.mxu0 %v954_v9  ;;  %905 = vmatprep.subr.bf16.mxu1 %v954_v9 }
  0x19   : > { %459 = vmatpush1.bf16.msra.mxu0 %v956_v10  ;;  %913 = vmatpush1.bf16.msra.mxu1 %v956_v10 }
  0x1a   : > { %460 = vmatprep.subr.bf16.mxu0 %v957_v11  ;;  %906 = vmatprep.subr.bf16.mxu1 %v957_v11 }
  0x1d   : > { %461 = vmatpush1.bf16.msra.mxu0 %v959_v12  ;;  %914 = vmatpush1.bf16.msra.mxu1 %v959_v12 }
  0x1e   : > { %462 = vmatprep.subr.bf16.mxu0 %v960_v13  ;;  %907 = vmatprep.subr.bf16.mxu1 %v960_v13 }
  0x21   : > { %463 = vmatpush1.bf16.msra.mxu0 %v962_v14  ;;  %915 = vmatpush1.bf16.msra.mxu1 %v962_v14 }
  0x22   : > { %464 = vmatprep.subr.bf16.mxu0 %v963_v15  ;;  %908 = vmatprep.subr.bf16.mxu1 %v963_v15 }
  0x25   : > { %465 = vmatpush1.bf16.msra.mxu0 %v965_v16  ;;  %916 = vmatpush1.bf16.msra.mxu1 %v965_v16 }
  0x28   : > { %483 = vmatmul.mubr.bf16.vlgmr.msra.gmra.mrb[0].mxu0 %v966_v17  ;;  %523 = vmatmul.mubr.bf16.vlgmr.msra.gmra.mrb[0].mxu1 %v967_v18 }
  0x29   : > { %492 = vmatprep.mubr.bf16.mxu0 %v998_v2  ;;  %532 = vmatprep.mubr.bf16.mxu1 %v998_v2 }
  0x30   : > { %493 = vmatmul.mubr.bf16.gmra.mrb[4].mxu0 %v968_v19  ;;  %533 = vmatmul.mubr.bf16.gmra.mrb[4].mxu1 %v969_v20 }
  0x31   : > { %502 = vmatprep.mubr.bf16.mxu0 %v998_v2  ;;  %542 = vmatprep.mubr.bf16.mxu1 %v998_v2 }
  0x38   : > { %503 = vmatmul.mubr.bf16.gmra.mrb[8].mxu0 %v970_v21  ;;  %543 = vmatmul.mubr.bf16.gmra.mrb[8].mxu1 %v971_v22 }
  0x39   : > { %512 = vmatprep.mubr.bf16.mxu0 %v998_v2  ;;  %552 = vmatprep.mubr.bf16.mxu1 %v998_v2 }
  0x40   : > { %513 = vmatmul.mubr.bf16.gmra.mrb[12].mxu0 %v972_v23  ;;  %553 = vmatmul.mubr.bf16.gmra.mrb[12].mxu1 %v973_v24 }
  0xfb   : > { %v484_v32 = vpop.f32.mrb[0].mxu0  ;;  %v524_v33 = vpop.f32.mrb[0].mxu1 }
  0xfc   : > { %v485_v34 = vadd.f32 %v484_v32, %v1112_v30  ;;  %v525_v35 = vadd.f32 %v524_v33, %v1112_v30  ;;  %v486_v36 = vpop.f32.mrb[1].mxu0  ;;  %v526_v37 = vpop.f32.mrb[1].mxu1 }
  0xfd   : > { %v487_v38 = vadd.f32 %v486_v36, %v1114_v31  ;;  %v527_v39 = vadd.f32 %v526_v37, %v1114_v31  ;;  %v488_v40 = vpop.f32.mrb[2].mxu0  ;;  %v528_v41 = vpop.f32.mrb[2].mxu1 }
  0xfe   : > { %v563_v42 = vmax.f32 %v485_v34, 0.0  ;;  %v579_v43 = vmax.f32 %v525_v35, 0.0  ;;  %v489_v44 = vadd.f32 %v488_v40, %v1112_v30  ;;  %v529_v45 = vadd.f32 %v528_v41, %v1112_v30  ;;  %v490_v46 = vpop.f32.mrb[3].mxu0  ;;  %v530_v47 = vpop.f32.mrb[3].mxu1 }
  0xff   : > { %v564_v48 = vmax.f32 %v487_v38, 0.0  ;;  %v580_v49 = vmax.f32 %v527_v39, 0.0  ;;  %v491_v50 = vadd.f32 %v490_v46, %v1114_v31  ;;  %v531_v51 = vadd.f32 %v530_v47, %v1114_v31 }
 0x100   : > { %v565_v52 = vmax.f32 %v489_v44, 0.0  ;;  %v581_v53 = vmax.f32 %v529_v45, 0.0 }
 0x101   : > { %v885_v54 = vpack.c.bf16 %v564_v48, %v563_v42  ;;  %v893_v55 = vpack.c.bf16 %v580_v49, %v579_v43  ;;  %v566_v56 = vmax.f32 %v491_v50, 0.0  ;;  %v582_v57 = vmax.f32 %v531_v51, 0.0 }
 0x103   : > { %691 = vst [vmem:[%s1128_s7] sm:$0xff] %v885_v54  ;;  %699 = vst [vmem:[%s1128_s7 + $0x40] sm:$0xff] %v893_v55  ;;  %v886_v58 = vpack.c.bf16 %v566_v56, %v565_v52  ;;  %v894_v59 = vpack.c.bf16 %v582_v57, %v581_v53  ;;  %v494_v60 = vpop.f32.mrb[4].mxu0  ;;  %v534_v61 = vpop.f32.mrb[4].mxu1 }
 0x104   : > { %v495_v62 = vadd.f32 %v494_v60, %v1112_v30  ;;  %v535_v63 = vadd.f32 %v534_v61, %v1112_v30  ;;  %v496_v0 = vpop.f32.mrb[5].mxu0  ;;  %v536_v1 = vpop.f32.mrb[5].mxu1 }
 0x105   : > { %692 = vst [vmem:[%s1128_s7 + $0x8] sm:$0xff] %v886_v58  ;;  %700 = vst [vmem:[%s1128_s7 + $0x48] sm:$0xff] %v894_v59  ;;  %v497_v2 = vadd.f32 %v496_v0, %v1114_v31  ;;  %v537_v3 = vadd.f32 %v536_v1, %v1114_v31  ;;  %v498_v4 = vpop.f32.mrb[6].mxu0  ;;  %v538_v5 = vpop.f32.mrb[6].mxu1 }
 0x106   : > { %v567_v6 = vmax.f32 %v495_v62, 0.0  ;;  %v583_v7 = vmax.f32 %v535_v63, 0.0  ;;  %v499_v8 = vadd.f32 %v498_v4, %v1112_v30  ;;  %v539_v9 = vadd.f32 %v538_v5, %v1112_v30  ;;  %v500_v10 = vpop.f32.mrb[7].mxu0  ;;  %v540_v11 = vpop.f32.mrb[7].mxu1 }
 0x107   : > { %v568_v12 = vmax.f32 %v497_v2, 0.0  ;;  %v584_v13 = vmax.f32 %v537_v3, 0.0  ;;  %v501_v14 = vadd.f32 %v500_v10, %v1114_v31  ;;  %v541_v15 = vadd.f32 %v540_v11, %v1114_v31 }
 0x108   : > { %v569_v16 = vmax.f32 %v499_v8, 0.0  ;;  %v585_v17 = vmax.f32 %v539_v9, 0.0 }
 0x109   : > { %v887_v18 = vpack.c.bf16 %v568_v12, %v567_v6  ;;  %v895_v19 = vpack.c.bf16 %v584_v13, %v583_v7  ;;  %v570_v20 = vmax.f32 %v501_v14, 0.0  ;;  %v586_v21 = vmax.f32 %v541_v15, 0.0 }
 0x10b   : > { %693 = vst [vmem:[%s1128_s7 + $0x10] sm:$0xff] %v887_v18  ;;  %701 = vst [vmem:[%s1128_s7 + $0x50] sm:$0xff] %v895_v19  ;;  %v888_v22 = vpack.c.bf16 %v570_v20, %v569_v16  ;;  %v896_v23 = vpack.c.bf16 %v586_v21, %v585_v17  ;;  %v504_v24 = vpop.f32.mrb[8].mxu0  ;;  %v544_v25 = vpop.f32.mrb[8].mxu1 }
 0x10c   : > { %v505_v26 = vadd.f32 %v504_v24, %v1112_v30  ;;  %v545_v27 = vadd.f32 %v544_v25, %v1112_v30  ;;  %v506_v28 = vpop.f32.mrb[9].mxu0  ;;  %v546_v29 = vpop.f32.mrb[9].mxu1 }
 0x10d   : > { %694 = vst [vmem:[%s1128_s7 + $0x18] sm:$0xff] %v888_v22  ;;  %702 = vst [vmem:[%s1128_s7 + $0x58] sm:$0xff] %v896_v23  ;;  %v507_v32 = vadd.f32 %v506_v28, %v1114_v31  ;;  %v547_v33 = vadd.f32 %v546_v29, %v1114_v31  ;;  %v508_v34 = vpop.f32.mrb[10].mxu0  ;;  %v548_v35 = vpop.f32.mrb[10].mxu1 }
 0x10e   : > { %v571_v36 = vmax.f32 %v505_v26, 0.0  ;;  %v587_v37 = vmax.f32 %v545_v27, 0.0  ;;  %v509_v38 = vadd.f32 %v508_v34, %v1112_v30  ;;  %v549_v39 = vadd.f32 %v548_v35, %v1112_v30  ;;  %v510_v40 = vpop.f32.mrb[11].mxu0  ;;  %v550_v41 = vpop.f32.mrb[11].mxu1 }
 0x10f   : > { %v572_v42 = vmax.f32 %v507_v32, 0.0  ;;  %v588_v43 = vmax.f32 %v547_v33, 0.0  ;;  %v511_v44 = vadd.f32 %v510_v40, %v1114_v31  ;;  %v551_v45 = vadd.f32 %v550_v41, %v1114_v31 }
 0x110   : > { %v573_v46 = vmax.f32 %v509_v38, 0.0  ;;  %v589_v47 = vmax.f32 %v549_v39, 0.0 }
 0x111   : > { %v889_v48 = vpack.c.bf16 %v572_v42, %v571_v36  ;;  %v897_v49 = vpack.c.bf16 %v588_v43, %v587_v37  ;;  %v574_v50 = vmax.f32 %v511_v44, 0.0  ;;  %v590_v51 = vmax.f32 %v551_v45, 0.0 }
 0x113   : > { %695 = vst [vmem:[%s1128_s7 + $0x20] sm:$0xff] %v889_v48  ;;  %703 = vst [vmem:[%s1128_s7 + $0x60] sm:$0xff] %v897_v49  ;;  %v890_v52 = vpack.c.bf16 %v574_v50, %v573_v46  ;;  %v898_v53 = vpack.c.bf16 %v590_v51, %v589_v47  ;;  %v514_v54 = vpop.f32.mrb[12].mxu0  ;;  %v554_v55 = vpop.f32.mrb[12].mxu1 }
 0x114   : > { %v515_v56 = vadd.f32 %v514_v54, %v1112_v30  ;;  %v555_v57 = vadd.f32 %v554_v55, %v1112_v30  ;;  %v516_v58 = vpop.f32.mrb[13].mxu0  ;;  %v556_v59 = vpop.f32.mrb[13].mxu1 }
 0x115   : > { %696 = vst [vmem:[%s1128_s7 + $0x28] sm:$0xff] %v890_v52  ;;  %704 = vst [vmem:[%s1128_s7 + $0x68] sm:$0xff] %v898_v53  ;;  %v517_v60 = vadd.f32 %v516_v58, %v1114_v31  ;;  %v557_v61 = vadd.f32 %v556_v59, %v1114_v31  ;;  %v518_v62 = vpop.f32.mrb[14].mxu0  ;;  %v558_v63 = vpop.f32.mrb[14].mxu1 }
 0x116   : > { %v575_v0 = vmax.f32 %v515_v56, 0.0  ;;  %v591_v1 = vmax.f32 %v555_v57, 0.0  ;;  %v519_v2 = vadd.f32 %v518_v62, %v1112_v30  ;;  %v559_v3 = vadd.f32 %v558_v63, %v1112_v30  ;;  %v520_v4 = vpop.f32.mrb[15].mxu0  ;;  %v560_v5 = vpop.f32.mrb[15].mxu1 }
 0x117   : > { %v576_v6 = vmax.f32 %v517_v60, 0.0  ;;  %v592_v7 = vmax.f32 %v557_v61, 0.0  ;;  %v521_v8 = vadd.f32 %v520_v4, %v1114_v31  ;;  %v561_v9 = vadd.f32 %v560_v5, %v1114_v31 }
 0x118   : > { %v577_v10 = vmax.f32 %v519_v2, 0.0  ;;  %v593_v11 = vmax.f32 %v559_v3, 0.0 }
 0x119   : > { %v891_v12 = vpack.c.bf16 %v576_v6, %v575_v0  ;;  %v899_v13 = vpack.c.bf16 %v592_v7, %v591_v1  ;;  %v578_v14 = vmax.f32 %v521_v8, 0.0  ;;  %v594_v15 = vmax.f32 %v561_v9, 0.0 }
 0x11b   : > { %697 = vst [vmem:[%s1128_s7 + $0x30] sm:$0xff] %v891_v12  ;;  %705 = vst [vmem:[%s1128_s7 + $0x70] sm:$0xff] %v899_v13  ;;  %v892_v16 = vpack.c.bf16 %v578_v14, %v577_v10  ;;  %v900_v30 = vpack.c.bf16 %v594_v15, %v593_v11 }
 0x11d   : > { %698 = vst [vmem:[%s1128_s7 + $0x38] sm:$0xff] %v892_v16  ;;  %706 = vst [vmem:[%s1128_s7 + $0x78] sm:$0xff] %v900_v30 }
 0x11e PF: > { %s13_s14 = sadd.s32 1, %s996_s14   ;;  %s1183_s12 = smov %s992_s13 }
 0x11f   : > { %p10_p5 = scmp.ge.s32.totalorder %s13_s14, 6   ;;  %s1184_s13 = smov %s1186_s15 }
 0x121   :  { %12 = sbr.rel (!%p10_p5) target bundleno = 2 (0x2), region = 68 }

// kernel: forward.18
= control target key start
LH: loop header
LB: loop body
LE: loop exit
PB: predicated region body
PF: predicated region fallthrough
CT: control target
= control target key end

     0   :  { %s1649_s21 = smov 0   ;;  %s1651_s22 = smov 0   ;;  %s1986_s0 = inlined_call_operand.vmem [shape: bf16[512,256], index: 0, kind: input, shape index: {}]   ;;  %s1987_s1 = inlined_call_operand.vmem [shape: bf16[256,128], index: 1, kind: input, shape index: {}]   ;;  %s1988_s2 = inlined_call_operand.vmem [shape: f32[1,128], index: 2, kind: input, shape index: {}]   ;;  %s1989_s3 = inlined_call_operand.vmem [shape: bf16[512,128], index: 3, kind: input, shape index: {}]   ;;  %s1990_s4 = inlined_call_operand.vmem [shape: f32[1,128], index: 4, kind: input, shape index: {}]   ;;  %s1991_s5 = inlined_call_operand.vmem [shape: f32[1,128], index: 5, kind: input, shape index: {}]   ;;  %s1992_s6 = inlined_call_operand.vmem [shape: bf16[512,128], index: 6, kind: output, shape index: {}]  }
   0x1   :  { %s1653_s23 = smov 0  }
   0x2 LB: > { %s35_s24 = sadd.s32 1, %s1608_s22  ;;  %p1250_p0 = scmp.ge.s32.totalorder %s1612_s23, 1  ;;  %s1612_s23 = sphi %s1653_s23, %s16_s23   ;;  %s1608_s22 = sphi %s1651_s22, %s1994_s22   ;;  %s1604_s21 = sphi %s1649_s21, %s1993_s21  }
   0x3   : > { %p37_p1 = scmp.ge.s32.totalorder %s35_s24, 4  ;;  %p298_p2 = scmp.lt.s32.totalorder %s1612_s23, 5 }
   0x5   : > { %s1996_s24 = smov (%p37_p1, %s35_s24), 0  ;;  %p299_p3 = pnand %p1250_p0, %p298_p2 }
   0x6   : > { %v1518_v0 = vld [vmem:[%s1987_s1 + $0x40] sm:$0xff] (!%p299_p3)   ;;  %s1251_s27 = sshll.u32 (!%p299_p3), %s1604_s21, 4  ;;  %v1520_v2 = vld [vmem:[%s1987_s1 + $0x48] sm:$0xff] (!%p299_p3)   ;;  %v1522_v4 = vld [vmem:[%s1987_s1 + $0x50] sm:$0xff] (!%p299_p3)  }
   0x7   : > { %302 = sbr.rel (%p299_p3) target bundleno = 608 (0x260), region = 44  ;;  %v1519_v1 = vld [vmem:[%s1987_s1] sm:$0xff] (!%p299_p3)   ;;  %1414 = vmatprep.subr.bf16.mxu0 (!%p299_p3), %v1518_v0  ;;  %1478 = vmatprep.subr.bf16.mxu1 (!%p299_p3), %v1518_v0  ;;  %v1521_v3 = vld [vmem:[%s1987_s1 + $0x8] sm:$0xff] (!%p299_p3)   ;;  %p363_p4 = scmp.lt.s32.totalorder (!%p299_p3), %s1251_s27, 63  ;;  %v1523_v5 = vld [vmem:[%s1987_s1 + $0x10] sm:$0xff] (!%p299_p3)  }
   0x8   : > { %1415 = vmatpush3.bf16.msra.mxu0 (!%p299_p3), %v1519_v1  ;;  %1486 = vmatpush3.bf16.msra.mxu1 (!%p299_p3), %v1519_v1  ;;  %v1524_v6 = vld [vmem:[%s1987_s1 + $0x58] sm:$0xff] (!%p299_p3)   ;;  %v1526_v8 = vld [vmem:[%s1987_s1 + $0x60] sm:$0xff] (!%p299_p3)   ;;  %v1528_v10 = vld [vmem:[%s1987_s1 + $0x68] sm:$0xff] (!%p299_p3)  }
   0x9   : > { %1416 = vmatprep.subr.bf16.mxu0 (!%p299_p3), %v1520_v2  ;;  %1479 = vmatprep.subr.bf16.mxu1 (!%p299_p3), %v1520_v2  ;;  %v1525_v7 = vld [vmem:[%s1987_s1 + $0x18] sm:$0xff] (!%p299_p3)   ;;  %v1527_v9 = vld [vmem:[%s1987_s1 + $0x20] sm:$0xff] (!%p299_p3)   ;;  %v1529_v13 = vld [vmem:[%s1987_s1 + $0x28] sm:$0xff] (!%p299_p3)  }
   0xa   : > { %v1530_v14 = vld [vmem:[%s1987_s1 + $0x70] sm:$0xff] (!%p299_p3)   ;;  %v1532_v16 = vld [vmem:[%s1987_s1 + $0x78] sm:$0xff] (!%p299_p3)   ;;  %v1752_v36 = vld [vmem:[%s1988_s2] ss:$0 sm:$0xff] (!%p299_p3) }
   0xb   : > { %v1531_v15 = vld [vmem:[%s1987_s1 + $0x30] sm:$0xff] (!%p299_p3)   ;;  %v1533_v17 = vld [vmem:[%s1987_s1 + $0x38] sm:$0xff] (!%p299_p3)  }
   0xc   : > { %1417 = vmatpush3.bf16.msra.mxu0 (!%p299_p3), %v1521_v3  ;;  %1487 = vmatpush3.bf16.msra.mxu1 (!%p299_p3), %v1521_v3 }
   0xd   : > { %1418 = vmatprep.subr.bf16.mxu0 (!%p299_p3), %v1522_v4  ;;  %1480 = vmatprep.subr.bf16.mxu1 (!%p299_p3), %v1522_v4 }
   0xe   : > { %s1998_s27 = smov (!%p363_p4, %s1251_s27), 63 }
   0xf   : > { %s1311_s18 = sshll.u32 %s1998_s27, 3 }
  0x10   : > { %1419 = vmatpush3.bf16.msra.mxu0 %v1523_v5  ;;  %1488 = vmatpush3.bf16.msra.mxu1 %v1523_v5  ;;  %s1700_s26 = scalar_lea.vmem %s1986_s0, %s1311_s18  ;;  %s1255_s18 = sshll.u32 %s1998_s27, 2 }
  0x11   : > { %1420 = vmatprep.subr.bf16.mxu0 %v1524_v6  ;;  %1481 = vmatprep.subr.bf16.mxu1 %v1524_v6  ;;  %v1536_v11 = vld [vmem:[%s1700_s26 + $0x4] ss:$8 sps:$4 sm:$0xff]   ;;  %v1534_v18 = vld [vmem:[%s1700_s26] ss:$8 sps:$4 sm:$0xff]   ;;  %v1540_v20 = vld [vmem:[%s1700_s26 + $0x14] ss:$8 sps:$4 sm:$0xff]   ;;  %s1745_s21 = scalar_lea.vmem %s1989_s3, %s1255_s18  ;;  %s1929_s10 = scalar_lea.vmem %s1992_s6, %s1255_s18 }
  0x12   : > { %v1539_v12 = vld [vmem:[%s1700_s26 + $0x44] ss:$8 sps:$4 sm:$0xff]   ;;  %673 = vmatprep.mubr.bf16.mxu0 %v1536_v11  ;;  %v1537_v19 = vld [vmem:[%s1700_s26 + $0x40] ss:$8 sps:$4 sm:$0xff]   ;;  %v1543_v21 = vld [vmem:[%s1700_s26 + $0x54] ss:$8 sps:$4 sm:$0xff]  }
  0x13   : > { %705 = vmatprep.mubr.bf16.mxu1 %v1539_v12  ;;  %v1542_v22 = vld [vmem:[%s1700_s26 + $0x10] ss:$8 sps:$4 sm:$0xff]   ;;  %v1546_v24 = vld [vmem:[%s1700_s26 + $0x24] ss:$8 sps:$4 sm:$0xff]   ;;  %v1548_v26 = vld [vmem:[%s1700_s26 + $0x20] ss:$8 sps:$4 sm:$0xff]  }
  0x14   : > { %1421 = vmatpush3.bf16.msra.mxu0 %v1525_v7  ;;  %1489 = vmatpush3.bf16.msra.mxu1 %v1525_v7  ;;  %v1545_v23 = vld [vmem:[%s1700_s26 + $0x50] ss:$8 sps:$4 sm:$0xff]   ;;  %v1549_v25 = vld [vmem:[%s1700_s26 + $0x64] ss:$8 sps:$4 sm:$0xff]   ;;  %v1551_v27 = vld [vmem:[%s1700_s26 + $0x60] ss:$8 sps:$4 sm:$0xff]  }
  0x15   : > { %1422 = vmatprep.subr.bf16.mxu0 %v1526_v8  ;;  %1482 = vmatprep.subr.bf16.mxu1 %v1526_v8  ;;  %v1552_v28 = vld [vmem:[%s1700_s26 + $0x34] ss:$8 sps:$4 sm:$0xff]   ;;  %v1554_v30 = vld [vmem:[%s1700_s26 + $0x30] ss:$8 sps:$4 sm:$0xff]   ;;  %v1329_v32 = vld [vmem:[%s1745_s21] sm:$0xff]  }
  0x16   : > { %v1555_v29 = vld [vmem:[%s1700_s26 + $0x74] ss:$8 sps:$4 sm:$0xff]   ;;  %v1557_v31 = vld [vmem:[%s1700_s26 + $0x70] ss:$8 sps:$4 sm:$0xff]   ;;  %v1403_v35 = vld [vmem:[%s1745_s21 + $0x20] sm:$0xff]   ;;  %v1330_v43 = vunpack.c.l.bf16 %v1329_v32  ;;  %v1331_v62 = vunpack.c.h.bf16 %v1329_v32 }
  0x17   : > { %v1347_v46 = vunpack.c.h.bf16 %v1403_v35  ;;  %v1346_v47 = vunpack.c.l.bf16 %v1403_v35  ;;  %v1400_v54 = vld [vmem:[%s1745_s21 + $0x8] sm:$0xff]  }
  0x18   : > { %1423 = vmatpush3.bf16.msra.mxu0 %v1527_v9  ;;  %1490 = vmatpush3.bf16.msra.mxu1 %v1527_v9  ;;  %v1404_v59 = vld [vmem:[%s1745_s21 + $0x28] sm:$0xff]   ;;  %v1334_v4 = vunpack.c.l.bf16 %v1400_v54  ;;  %v1335_v7 = vunpack.c.h.bf16 %v1400_v54 }
  0x19   : > { %1424 = vmatprep.subr.bf16.mxu0 %v1528_v10  ;;  %1483 = vmatprep.subr.bf16.mxu1 %v1528_v10  ;;  %v1350_v8 = vunpack.c.l.bf16 %v1404_v59 }
  0x1c   : > { %1425 = vmatpush3.bf16.msra.mxu0 %v1529_v13  ;;  %1491 = vmatpush3.bf16.msra.mxu1 %v1529_v13 }
  0x1d   : > { %1426 = vmatprep.subr.bf16.mxu0 %v1530_v14  ;;  %1484 = vmatprep.subr.bf16.mxu1 %v1530_v14 }
  0x20   : > { %1427 = vmatpush3.bf16.msra.mxu0 %v1531_v15  ;;  %1492 = vmatpush3.bf16.msra.mxu1 %v1531_v15 }
  0x21   : > { %1428 = vmatprep.subr.bf16.mxu0 %v1532_v16  ;;  %1485 = vmatprep.subr.bf16.mxu1 %v1532_v16 }
  0x24   : > { %1429 = vmatpush3.bf16.msra.mxu0 %v1533_v17  ;;  %1493 = vmatpush3.bf16.msra.mxu1 %v1533_v17  ;;  %v1351_v17 = vunpack.c.h.bf16 %v1404_v59 }
  0x27   : > { %674 = vmatmul.mubr.bf16.vlgmr.msra.gmra.mrb[0].mxu0 %v1534_v18  ;;  %706 = vmatmul.mubr.bf16.vlgmr.msra.gmra.mrb[0].mxu1 %v1537_v19  ;;  %v1401_v18 = vld [vmem:[%s1745_s21 + $0x10] sm:$0xff]  }
  0x28   : > { %681 = vmatprep.mubr.bf16.mxu0 %v1540_v20  ;;  %713 = vmatprep.mubr.bf16.mxu1 %v1543_v21 }
  0x2f   : > { %682 = vmatmul.mubr.bf16.gmra.mrb[4].mxu0 %v1542_v22  ;;  %714 = vmatmul.mubr.bf16.gmra.mrb[4].mxu1 %v1545_v23 }
  0x30   : > { %689 = vmatprep.mubr.bf16.mxu0 %v1546_v24  ;;  %721 = vmatprep.mubr.bf16.mxu1 %v1549_v25  ;;  %v1405_v25 = vld [vmem:[%s1745_s21 + $0x30] sm:$0xff]  }
  0x37   : > { %690 = vmatmul.mubr.bf16.gmra.mrb[8].mxu0 %v1548_v26  ;;  %722 = vmatmul.mubr.bf16.gmra.mrb[8].mxu1 %v1551_v27 }
  0x38   : > { %697 = vmatprep.mubr.bf16.mxu0 %v1552_v28  ;;  %729 = vmatprep.mubr.bf16.mxu1 %v1555_v29 }
  0x3f   : > { %698 = vmatmul.mubr.bf16.gmra.mrb[12].mxu0 %v1554_v30  ;;  %730 = vmatmul.mubr.bf16.gmra.mrb[12].mxu1 %v1557_v31  ;;  %v1338_v30 = vunpack.c.l.bf16 %v1401_v18 }
  0xfa   : > { %v1430_v33 = vpop.f32.mrb[0].mxu0  ;;  %v1454_v34 = vpop.f32.mrb[0].mxu1 }
  0xfb   : > { %v1431_v37 = vpop.f32.mrb[1].mxu0  ;;  %v1455_v38 = vpop.f32.mrb[1].mxu1 }
  0xfc   : > { %v1432_v39 = vadd.f32 %v1431_v37, %v1430_v33  ;;  %v1456_v40 = vadd.f32 %v1455_v38, %v1454_v34  ;;  %v1433_v41 = vpop.f32.mrb[2].mxu0  ;;  %v1457_v42 = vpop.f32.mrb[2].mxu1  ;;  %v1339_v34 = vunpack.c.h.bf16 %v1401_v18 }
  0xfd   : > { %v1434_v44 = vpop.f32.mrb[3].mxu0  ;;  %v1458_v45 = vpop.f32.mrb[3].mxu1 }
  0xfe   : > { %v676_v48 = vadd.f32 %v1432_v39, %v1752_v36  ;;  %v708_v49 = vadd.f32 %v1456_v40, %v1752_v36  ;;  %v1435_v50 = vadd.f32 %v1434_v44, %v1433_v41  ;;  %v1459_v51 = vadd.f32 %v1458_v45, %v1457_v42  ;;  %v1402_v45 = vld [vmem:[%s1745_s21 + $0x18] sm:$0xff]  }
  0xff   : > { %v1354_v39 = vunpack.c.l.bf16 %v1405_v25  ;;  %v1355_v44 = vunpack.c.h.bf16 %v1405_v25 }
 0x100   : > { %v711_v52 = vadd.f32 %v1459_v51, %v1752_v36  ;;  %v1757_v53 = vadd.f32 %v1330_v43, %v676_v48  ;;  %v1763_v58 = vadd.f32 %v1346_v47, %v708_v49  ;;  %v679_v63 = vadd.f32 %v1435_v50, %v1752_v36 }
 0x102   : > { %v1436_v55 = vpop.f32.mrb[4].mxu0  ;;  %786 = vadd.xlane.f32.xlu0 %v1757_v53  ;;  %v1761_v56 = vadd.f32 %v1347_v46, %v711_v52  ;;  %v1460_v57 = vpop.f32.mrb[4].mxu1  ;;  %v1774_v15 = vadd.f32 %v1331_v62, %v679_v63  ;;  %v1406_v52 = vld [vmem:[%s1745_s21 + $0x38] sm:$0xff]  }
 0x103   : > { %v1437_v60 = vpop.f32.mrb[5].mxu0  ;;  %v1461_v61 = vpop.f32.mrb[5].mxu1 }
 0x104   : > { %v1438_v0 = vadd.f32 %v1437_v60, %v1436_v55  ;;  %804 = vadd.xlane.f32.xlu1 %v1761_v56  ;;  %v1439_v1 = vpop.f32.mrb[6].mxu0  ;;  %v1462_v2 = vadd.f32 %v1461_v61, %v1460_v57  ;;  %v1463_v3 = vpop.f32.mrb[6].mxu1  ;;  %v1342_v60 = vunpack.c.l.bf16 %v1402_v45 }
 0x105   : > { %v1440_v5 = vpop.f32.mrb[7].mxu0  ;;  %v1464_v6 = vpop.f32.mrb[7].mxu1 }
 0x106   : > { %v684_v9 = vadd.f32 %v1438_v0, %v1752_v36  ;;  %v1441_v10 = vadd.f32 %v1440_v5, %v1439_v1  ;;  %802 = vadd.xlane.f32.xlu0 %v1763_v58  ;;  %v716_v11 = vadd.f32 %v1462_v2, %v1752_v36  ;;  %v1465_v12 = vadd.f32 %v1464_v6, %v1463_v3 }
 0x107   : > { %v1343_v0 = vunpack.c.h.bf16 %v1402_v45 }
 0x108   : > { %v687_v13 = vadd.f32 %v1441_v10, %v1752_v36  ;;  %v1772_v14 = vadd.f32 %v1334_v4, %v684_v9  ;;  %v719_v16 = vadd.f32 %v1465_v12, %v1752_v36  ;;  %v1782_v22 = vadd.f32 %v1350_v8, %v716_v11 }
 0x109   : > { %v1358_v4 = vunpack.c.l.bf16 %v1406_v52  ;;  %v1359_v11 = vunpack.c.h.bf16 %v1406_v52 }
 0x10a   : > { %v1442_v19 = vpop.f32.mrb[8].mxu0  ;;  %790 = vadd.xlane.f32.xlu1 %v1772_v14  ;;  %788 = vadd.xlane.f32.xlu0 %v1774_v15  ;;  %v1466_v20 = vpop.f32.mrb[8].mxu1  ;;  %v1780_v21 = vadd.f32 %v1335_v7, %v687_v13  ;;  %v1785_v32 = vadd.f32 %v1351_v17, %v719_v16 }
 0x10b   : > { %v1443_v23 = vpop.f32.mrb[9].mxu0  ;;  %v1467_v24 = vpop.f32.mrb[9].mxu1 }
 0x10c   : > { %v1444_v26 = vadd.f32 %v1443_v23, %v1442_v19  ;;  %v1445_v27 = vpop.f32.mrb[10].mxu0  ;;  %v1468_v28 = vadd.f32 %v1467_v24, %v1466_v20  ;;  %v1469_v29 = vpop.f32.mrb[10].mxu1 }
 0x10d   : > { %v1446_v31 = vpop.f32.mrb[11].mxu0  ;;  %v1470_v33 = vpop.f32.mrb[11].mxu1 }
 0x10e   : > { %v692_v35 = vadd.f32 %v1444_v26, %v1752_v36  ;;  %792 = vadd.xlane.f32.xlu1 %v1780_v21  ;;  %806 = vadd.xlane.f32.xlu0 %v1782_v22  ;;  %v1447_v37 = vadd.f32 %v1446_v31, %v1445_v27  ;;  %v724_v38 = vadd.f32 %v1468_v28, %v1752_v36 }
 0x10f   : > { %v1471_v40 = vadd.f32 %v1470_v33, %v1469_v29 }
 0x110   : > { %v695_v41 = vadd.f32 %v1447_v37, %v1752_v36  ;;  %v1792_v42 = vadd.f32 %v1338_v30, %v692_v35  ;;  %v1800_v49 = vadd.f32 %v1354_v39, %v724_v38 }
 0x111   : > { %v727_v43 = vadd.f32 %v1471_v40, %v1752_v36 }
 0x112   : > { %v1448_v46 = vpop.f32.mrb[12].mxu0  ;;  %808 = vadd.xlane.f32.xlu1 %v1785_v32  ;;  %794 = vadd.xlane.f32.xlu0 %v1792_v42  ;;  %v1472_v47 = vpop.f32.mrb[12].mxu1  ;;  %v1798_v48 = vadd.f32 %v1339_v34, %v695_v41 }
 0x113   : > { %v1449_v50 = vpop.f32.mrb[13].mxu0  ;;  %v1473_v51 = vpop.f32.mrb[13].mxu1  ;;  %v1803_v62 = vadd.f32 %v1355_v44, %v727_v43 }
 0x114   : > { %v1450_v54 = vadd.f32 %v1449_v50, %v1448_v46  ;;  %v1451_v55 = vpop.f32.mrb[14].mxu0  ;;  %v1474_v57 = vadd.f32 %v1473_v51, %v1472_v47  ;;  %v1475_v59 = vpop.f32.mrb[14].mxu1 }
 0x115   : > { %v1452_v61 = vpop.f32.mrb[15].mxu0  ;;  %v1476_v63 = vpop.f32.mrb[15].mxu1 }
 0x116   : > { %v700_v1 = vadd.f32 %v1450_v54, %v1752_v36  ;;  %796 = vadd.xlane.f32.xlu1 %v1798_v48  ;;  %810 = vadd.xlane.f32.xlu0 %v1800_v49  ;;  %v1453_v2 = vadd.f32 %v1452_v61, %v1451_v55  ;;  %v732_v3 = vadd.f32 %v1474_v57, %v1752_v36 }
 0x117   : > { %v1477_v5 = vadd.f32 %v1476_v63, %v1475_v59 }
 0x118   : > { %v703_v6 = vadd.f32 %v1453_v2, %v1752_v36  ;;  %v1810_v7 = vadd.f32 %v1342_v60, %v700_v1  ;;  %v1817_v10 = vadd.f32 %v1358_v4, %v732_v3 }
 0x119   : > { %v735_v8 = vadd.f32 %v1477_v5, %v1752_v36 }
 0x11a   : > { %812 = vadd.xlane.f32.xlu1 %v1803_v62  ;;  %798 = vadd.xlane.f32.xlu0 %v1810_v7  ;;  %v1815_v9 = vadd.f32 %v1343_v0, %v703_v6 }
 0x11b   : > { %v1821_v12 = vadd.f32 %v1359_v11, %v735_v8 }
 0x11e   : > { %800 = vadd.xlane.f32.xlu1 %v1815_v9  ;;  %814 = vadd.xlane.f32.xlu0 %v1817_v10 }
 0x122   : > { %816 = vadd.xlane.f32.xlu1 %v1821_v12 }
 0x18f   : > { %v787_v13 = vpop.xlane.xlu0 %786 }
 0x190   : > { %v819_v16 = vmul.f32 0.0078125, %v787_v13 }
 0x191   : > { %v805_v18 = vpop.xlane.xlu1 %804 }
 0x192   : > { %v1825_v17 = vsub.f32 %v1757_v53, %v819_v16  ;;  %v828_v24 = vmul.f32 0.0078125, %v805_v18 }
 0x193   : > { %v803_v36 = vpop.xlane.xlu0 %802 }
 0x194   : > { %v827_v19 = vmul.f32 0.0078125, %v803_v36  ;;  %v851_v20 = vmul.f32 %v1825_v17, %v1825_v17  ;;  %v1841_v31 = vsub.f32 %v1761_v56, %v828_v24 }
 0x196   : > { %v1830_v23 = vsub.f32 %v1763_v58, %v827_v19  ;;  %867 = vadd.xlane.f32.xlu0 %v851_v20  ;;  %v860_v43 = vmul.f32 %v1841_v31, %v1841_v31 }
 0x197   : > { %v791_v25 = vpop.xlane.xlu1 %790  ;;  %v789_v26 = vpop.xlane.xlu0 %788 }
 0x198   : > { %v821_v27 = vmul.f32 0.0078125, %v791_v25  ;;  %v820_v28 = vmul.f32 0.0078125, %v789_v26  ;;  %v859_v29 = vmul.f32 %v1830_v23, %v1830_v23 }
 0x19a   : > { %v1835_v53 = vsub.f32 %v1772_v14, %v821_v27  ;;  %v1838_v30 = vsub.f32 %v1774_v15, %v820_v28  ;;  %883 = vadd.xlane.f32.xlu0 %v859_v29 }
 0x19b   : > { %v793_v58 = vpop.xlane.xlu1 %792  ;;  %v807_v33 = vpop.xlane.xlu0 %806 }
 0x19c   : > { %v822_v34 = vmul.f32 0.0078125, %v793_v58  ;;  %v829_v35 = vmul.f32 0.0078125, %v807_v33  ;;  %v853_v37 = vmul.f32 %v1835_v53, %v1835_v53  ;;  %v852_v38 = vmul.f32 %v1838_v30, %v1838_v30 }
 0x19e   : > { %v1848_v14 = vsub.f32 %v1782_v22, %v829_v35  ;;  %871 = vadd.xlane.f32.xlu0 %v853_v37  ;;  %869 = vadd.xlane.f32.xlu1 %v852_v38  ;;  %v1851_v15 = vsub.f32 %v1780_v21, %v822_v34 }
 0x19f   : > { %v809_v56 = vpop.xlane.xlu1 %808  ;;  %v795_v39 = vpop.xlane.xlu0 %794 }
 0x1a0   : > { %v830_v40 = vmul.f32 0.0078125, %v809_v56  ;;  %v823_v41 = vmul.f32 0.0078125, %v795_v39  ;;  %v861_v44 = vmul.f32 %v1848_v14, %v1848_v14  ;;  %v854_v21 = vmul.f32 %v1851_v15, %v1851_v15 }
 0x1a2   : > { %v1858_v45 = vsub.f32 %v1792_v42, %v823_v41  ;;  %885 = vadd.xlane.f32.xlu1 %v860_v43  ;;  %887 = vadd.xlane.f32.xlu0 %v861_v44  ;;  %v1863_v47 = vsub.f32 %v1785_v32, %v830_v40 }
 0x1a3   : > { %v797_v22 = vpop.xlane.xlu1 %796  ;;  %v811_v46 = vpop.xlane.xlu0 %810 }
 0x1a4   : > { %v824_v50 = vmul.f32 0.0078125, %v797_v22  ;;  %v831_v51 = vmul.f32 0.0078125, %v811_v46  ;;  %v855_v52 = vmul.f32 %v1858_v45, %v1858_v45  ;;  %v862_v32 = vmul.f32 %v1863_v47, %v1863_v47 }
 0x1a6   : > { %v1868_v54 = vsub.f32 %v1800_v49, %v831_v51  ;;  %873 = vadd.xlane.f32.xlu1 %v854_v21  ;;  %875 = vadd.xlane.f32.xlu0 %v855_v52  ;;  %v1871_v42 = vsub.f32 %v1798_v48, %v824_v50  ;;  %v1908_v52 = vld [vmem:[%s1990_s4] ss:$0 sm:$0xff] }
 0x1a7   : > { %v813_v55 = vpop.xlane.xlu1 %812  ;;  %v799_v57 = vpop.xlane.xlu0 %798 }
 0x1a8   : > { %v832_v59 = vmul.f32 0.0078125, %v813_v55  ;;  %v825_v60 = vmul.f32 0.0078125, %v799_v57  ;;  %v863_v61 = vmul.f32 %v1868_v54, %v1868_v54  ;;  %v856_v48 = vmul.f32 %v1871_v42, %v1871_v42 }
 0x1aa   : > { %v1878_v63 = vsub.f32 %v1810_v7, %v825_v60  ;;  %889 = vadd.xlane.f32.xlu1 %v862_v32  ;;  %891 = vadd.xlane.f32.xlu0 %v863_v61  ;;  %v1883_v1 = vsub.f32 %v1803_v62, %v832_v59 }
 0x1ab   : > { %v801_v49 = vpop.xlane.xlu1 %800  ;;  %v815_v0 = vpop.xlane.xlu0 %814 }
 0x1ac   : > { %v826_v2 = vmul.f32 0.0078125, %v801_v49  ;;  %v833_v3 = vmul.f32 0.0078125, %v815_v0  ;;  %v857_v4 = vmul.f32 %v1878_v63, %v1878_v63  ;;  %v864_v11 = vmul.f32 %v1883_v1, %v1883_v1 }
 0x1ae   : > { %v1888_v5 = vsub.f32 %v1817_v10, %v833_v3  ;;  %877 = vadd.xlane.f32.xlu1 %v856_v48  ;;  %879 = vadd.xlane.f32.xlu0 %v857_v4  ;;  %v1891_v7 = vsub.f32 %v1815_v9, %v826_v2  ;;  %v1916_v3 = vld [vmem:[%s1991_s5] ss:$0 sm:$0xff] }
 0x1af   : > { %v817_v6 = vpop.xlane.xlu1 %816 }
 0x1b0   : > { %v834_v8 = vmul.f32 0.0078125, %v817_v6  ;;  %v865_v62 = vmul.f32 %v1888_v5, %v1888_v5  ;;  %v858_v10 = vmul.f32 %v1891_v7, %v1891_v7 }
 0x1b2   : > { %893 = vadd.xlane.f32.xlu1 %v864_v11  ;;  %895 = vadd.xlane.f32.xlu0 %v865_v62  ;;  %v1898_v13 = vsub.f32 %v1821_v12, %v834_v8 }
 0x1b4   : > { %v866_v9 = vmul.f32 %v1898_v13, %v1898_v13 }
 0x1b6   : > { %881 = vadd.xlane.f32.xlu1 %v858_v10 }
 0x1ba   : > { %897 = vadd.xlane.f32.xlu1 %v866_v9 }
 0x223   : > { %v868_v16 = vpop.xlane.xlu0 %867 }
 0x224   : > { %v899_v18 = vmul.f32 0.0078125, %v868_v16 }
 0x226   : > { %v915_v36 = vadd.f32 1e-05, %v899_v18 }
 0x227   : > { %v884_v19 = vpop.xlane.xlu0 %883 }
 0x228   : > { %v907_v20 = vmul.f32 0.0078125, %v884_v19  ;;  %1558 = vrsqrt.f32 %v915_v36 }
 0x22a   : > { %v923_v24 = vadd.f32 1e-05, %v907_v20 }
 0x22b   : > { %v870_v25 = vpop.xlane.xlu1 %869  ;;  %v872_v26 = vpop.xlane.xlu0 %871 }
 0x22c   : > { %v900_v27 = vmul.f32 0.0078125, %v870_v25  ;;  %v901_v12 = vmul.f32 0.0078125, %v872_v26  ;;  %1560 = vrsqrt.f32 %v923_v24 }
 0x22e   : > { %v916_v28 = vadd.f32 1e-05, %v900_v27  ;;  %v917_v29 = vadd.f32 1e-05, %v901_v12 }
 0x22f   : > { %v886_v58 = vpop.xlane.xlu1 %885  ;;  %v888_v33 = vpop.xlane.xlu0 %887 }
 0x230   : > { %1562 = vrsqrt.f32 %v916_v28  ;;  %v908_v34 = vmul.f32 0.0078125, %v886_v58  ;;  %v909_v35 = vmul.f32 0.0078125, %v888_v33 }
 0x231   : > { %1564 = vrsqrt.f32 %v917_v29 }
 0x232   : > { %v924_v37 = vadd.f32 1e-05, %v908_v34  ;;  %v925_v38 = vadd.f32 1e-05, %v909_v35  ;;  %v1559_v40 = vpop.eup %1558 }
 0x233   : > { %v874_v56 = vpop.xlane.xlu1 %873  ;;  %v876_v39 = vpop.xlane.xlu0 %875  ;;  %v947_v21 = vmul.f32 %v1559_v40, %v1825_v17 }
 0x234   : > { %1566 = vrsqrt.f32 %v924_v37  ;;  %v902_v41 = vmul.f32 0.0078125, %v874_v56  ;;  %v903_v43 = vmul.f32 0.0078125, %v876_v39 }
 0x235   : > { %1568 = vrsqrt.f32 %v925_v38  ;;  %v970_v0 = vmul.f32 %v1908_v52, %v947_v21 }
 0x236   : > { %v918_v44 = vadd.f32 1e-05, %v902_v41  ;;  %v919_v22 = vadd.f32 1e-05, %v903_v43  ;;  %v1561_v46 = vpop.eup %1560 }
 0x237   : > { %v890_v50 = vpop.xlane.xlu1 %889  ;;  %v892_v51 = vpop.xlane.xlu0 %891  ;;  %v955_v60 = vmul.f32 %v1561_v46, %v1830_v23  ;;  %v993_v9 = vadd.f32 %v1916_v3, %v970_v0 }
 0x238   : > { %1570 = vrsqrt.f32 %v918_v44  ;;  %v910_v55 = vmul.f32 0.0078125, %v890_v50  ;;  %v911_v57 = vmul.f32 0.0078125, %v892_v51 }
 0x239   : > { %1572 = vrsqrt.f32 %v919_v22  ;;  %v978_v11 = vmul.f32 %v1908_v52, %v955_v60 }
 0x23a   : > { %v1563_v59 = vpop.eup %1562  ;;  %v926_v32 = vadd.f32 1e-05, %v910_v55  ;;  %v927_v61 = vadd.f32 1e-05, %v911_v57 }
 0x23b   : > { %v1565_v49 = vpop.eup %1564  ;;  %v948_v17 = vmul.f32 %v1563_v59, %v1838_v30  ;;  %v878_v48 = vpop.xlane.xlu1 %877  ;;  %v1001_v12 = vadd.f32 %v1916_v3, %v978_v11 }
 0x23c   : > { %v880_v2 = vpop.xlane.xlu0 %879  ;;  %1574 = vrsqrt.f32 %v926_v32  ;;  %v904_v4 = vmul.f32 0.0078125, %v878_v48  ;;  %v949_v62 = vmul.f32 %v1565_v49, %v1835_v53 }
 0x23d   : > { %v905_v6 = vmul.f32 0.0078125, %v880_v2  ;;  %v971_v23 = vmul.f32 %v1908_v52, %v948_v17  ;;  %1576 = vrsqrt.f32 %v927_v61 }
 0x23e   : > { %v1567_v8 = vpop.eup %1566  ;;  %v920_v30 = vadd.f32 1e-05, %v904_v4 }
 0x23f   : > { %v921_v10 = vadd.f32 1e-05, %v905_v6  ;;  %v994_v16 = vadd.f32 %v1916_v3, %v971_v23  ;;  %v956_v18 = vmul.f32 %v1567_v8, %v1841_v31  ;;  %v894_v36 = vpop.xlane.xlu1 %893  ;;  %v1569_v20 = vpop.eup %1568  ;;  %v972_v31 = vmul.f32 %v1908_v52, %v949_v62 }
 0x240   : > { %v896_v19 = vpop.xlane.xlu0 %895  ;;  %1578 = vrsqrt.f32 %v920_v30  ;;  %v912_v53 = vmul.f32 0.0078125, %v894_v36  ;;  %v957_v58 = vmul.f32 %v1569_v20, %v1848_v14 }
 0x241   : > { %v1363_v24 = vpack.c.bf16 %v994_v16, %v993_v9  ;;  %v979_v25 = vmul.f32 %v1908_v52, %v956_v18  ;;  %v913_v26 = vmul.f32 0.0078125, %v896_v19  ;;  %1580 = vrsqrt.f32 %v921_v10 }
 0x242   : > { %v1571_v27 = vpop.eup %1570  ;;  %v928_v28 = vadd.f32 1e-05, %v912_v53  ;;  %v995_v41 = vadd.f32 %v1916_v3, %v972_v31  ;;  %v980_v14 = vmul.f32 %v1908_v52, %v957_v58 }
 0x243   : > { %1364 = vst [vmem:[%s1929_s10] sm:$0xff] %v1363_v24   ;;  %v1002_v29 = vadd.f32 %v1916_v3, %v979_v25  ;;  %v950_v33 = vmul.f32 %v1571_v27, %v1851_v15  ;;  %v929_v34 = vadd.f32 1e-05, %v913_v26  ;;  %v882_v35 = vpop.xlane.xlu1 %881  ;;  %v1573_v37 = vpop.eup %1572 }
 0x244   : > { %1582 = vrsqrt.f32 %v928_v28  ;;  %v906_v38 = vmul.f32 0.0078125, %v882_v35  ;;  %v951_v22 = vmul.f32 %v1573_v37, %v1858_v45  ;;  %v1003_v32 = vadd.f32 %v1916_v3, %v980_v14 }
 0x245   : > { %v1383_v56 = vpack.c.bf16 %v1002_v29, %v1001_v12  ;;  %v973_v39 = vmul.f32 %v1908_v52, %v950_v33  ;;  %1584 = vrsqrt.f32 %v929_v34 }
 0x246   : > { %v1575_v40 = vpop.eup %1574  ;;  %v922_v43 = vadd.f32 1e-05, %v906_v38  ;;  %v974_v61 = vmul.f32 %v1908_v52, %v951_v22 }
 0x247   : > { %v1577_v44 = vpop.eup %1576  ;;  %1410 = vst [vmem:[%s1929_s10 + $0x20] sm:$0xff] %v1383_v56   ;;  %v996_v15 = vadd.f32 %v1916_v3, %v973_v39  ;;  %v958_v46 = vmul.f32 %v1575_v40, %v1863_v47  ;;  %v898_v21 = vpop.xlane.xlu1 %897 }
 0x248   : > { %1586 = vrsqrt.f32 %v922_v43  ;;  %v914_v50 = vmul.f32 0.0078125, %v898_v21  ;;  %v959_v59 = vmul.f32 %v1577_v44, %v1868_v54  ;;  %v997_v54 = vadd.f32 %v1916_v3, %v974_v61 }
 0x249   : > { %v1368_v51 = vpack.c.bf16 %v996_v15, %v995_v41  ;;  %v981_v55 = vmul.f32 %v1908_v52, %v958_v46 }
 0x24a   : > { %v1579_v57 = vpop.eup %1578  ;;  %v930_v60 = vadd.f32 1e-05, %v914_v50  ;;  %v982_v2 = vmul.f32 %v1908_v52, %v959_v59 }
 0x24b   : > { %1407 = vst [vmem:[%s1929_s10 + $0x8] sm:$0xff] %v1368_v51   ;;  %v1004_v45 = vadd.f32 %v1916_v3, %v981_v55  ;;  %v952_v47 = vmul.f32 %v1579_v57, %v1871_v42  ;;  %v1581_v49 = vpop.eup %1580 }
 0x24c   : > { %1588 = vrsqrt.f32 %v930_v60  ;;  %v953_v6 = vmul.f32 %v1581_v49, %v1878_v63  ;;  %v1005_v30 = vadd.f32 %v1916_v3, %v982_v2 }
 0x24d   : > { %v1388_v0 = vpack.c.bf16 %v1004_v45, %v1003_v32  ;;  %v975_v17 = vmul.f32 %v1908_v52, %v952_v47 }
 0x24e   : > { %v1583_v48 = vpop.eup %1582  ;;  %v976_v10 = vmul.f32 %v1908_v52, %v953_v6 }
 0x24f   : > { %1411 = vst [vmem:[%s1929_s10 + $0x28] sm:$0xff] %v1388_v0   ;;  %v998_v4 = vadd.f32 %v1916_v3, %v975_v17  ;;  %v960_v23 = vmul.f32 %v1583_v48, %v1883_v1  ;;  %v1585_v42 = vpop.eup %1584 }
 0x250   : > { %v961_v16 = vmul.f32 %v1585_v42, %v1888_v5  ;;  %v999_v19 = vadd.f32 %v1916_v3, %v976_v10 }
 0x251   : > { %v1373_v8 = vpack.c.bf16 %v998_v4, %v997_v54  ;;  %v983_v11 = vmul.f32 %v1908_v52, %v960_v23 }
 0x252   : > { %v1587_v62 = vpop.eup %1586  ;;  %v984_v20 = vmul.f32 %v1908_v52, %v961_v16 }
 0x253   : > { %1408 = vst [vmem:[%s1929_s10 + $0x10] sm:$0xff] %v1373_v8   ;;  %v1006_v9 = vadd.f32 %v1916_v3, %v983_v11  ;;  %v954_v63 = vmul.f32 %v1587_v62, %v1891_v7 }
 0x254   : > { %v1007_v5 = vadd.f32 %v1916_v3, %v984_v20 }
 0x255   : > { %v1393_v18 = vpack.c.bf16 %v1006_v9, %v1005_v30  ;;  %v977_v1 = vmul.f32 %v1908_v52, %v954_v63 }
 0x256   : > { %v1589_v36 = vpop.eup %1588 }
 0x257   : > { %1412 = vst [vmem:[%s1929_s10 + $0x30] sm:$0xff] %v1393_v18   ;;  %v1000_v53 = vadd.f32 %v1916_v3, %v977_v1  ;;  %v962_v24 = vmul.f32 %v1589_v36, %v1898_v13 }
 0x259   : > { %v1378_v25 = vpack.c.bf16 %v1000_v53, %v999_v19  ;;  %v985_v26 = vmul.f32 %v1908_v52, %v962_v24 }
 0x25b   : > { %1409 = vst [vmem:[%s1929_s10 + $0x18] sm:$0xff] %v1378_v25   ;;  %v1008_v7 = vadd.f32 %v1916_v3, %v985_v26 }
 0x25d   : > { %v1398_v27 = vpack.c.bf16 %v1008_v7, %v1007_v5 }
 0x25f   : > { %1413 = vst [vmem:[%s1929_s10 + $0x38] sm:$0xff] %v1398_v27  }
 0x260 PF: > { %s16_s23 = sadd.s32 1, %s1612_s23   ;;  %s1993_s21 = smov %s1608_s22 }
 0x261   : > { %p13_p5 = scmp.ge.s32.totalorder %s16_s23, 6   ;;  %s1994_s22 = smov %s1996_s24 }
 0x263   :  { %15 = sbr.rel (!%p13_p5) target bundleno = 2 (0x2), region = 89 }

// kernel: forward.24
= control target key start
LH: loop header
LB: loop body
LE: loop exit
PB: predicated region body
PF: predicated region fallthrough
CT: control target
= control target key end

     0   :  { %s987_s12 = smov 0   ;;  %s989_s13 = smov 0   ;;  %s1147_s0 = inlined_call_operand.vmem [shape: bf16[512,128], index: 0, kind: input, shape index: {}]   ;;  %s1148_s1 = inlined_call_operand.vmem [shape: bf16[128,256], index: 1, kind: input, shape index: {}]   ;;  %s1149_s2 = inlined_call_operand.vmem [shape: f32[1,256], index: 2, kind: input, shape index: {}]   ;;  %s1150_s3 = inlined_call_operand.vmem [shape: bf16[512,256], index: 3, kind: output, shape index: {}]  }
   0x1   :  { %s991_s14 = smov 0  }
   0x2 LB: > { %s32_s15 = sadd.s32 1, %s960_s13  ;;  %p804_p0 = scmp.ge.s32.totalorder %s964_s14, 1  ;;  %s964_s14 = sphi %s991_s14, %s13_s14   ;;  %s960_s13 = sphi %s989_s13, %s1152_s13   ;;  %s956_s12 = sphi %s987_s12, %s1151_s12  }
   0x3   : > { %p34_p1 = scmp.ge.s32.totalorder %s32_s15, 4  ;;  %p193_p2 = scmp.lt.s32.totalorder %s964_s14, 5 }
   0x5   : > { %s1154_s15 = smov (%p34_p1, %s32_s15), 0  ;;  %p194_p3 = pnand %p804_p0, %p193_p2 }
   0x6   : > { %v910_v0 = vld [vmem:[%s1148_s1 + $0x4] ss:$8 sps:$4 sm:$0xff] (!%p194_p3)   ;;  %s805_s18 = sshll.u32 (!%p194_p3), %s956_s12, 4  ;;  %v912_v1 = vld [vmem:[%s1148_s1] ss:$8 sps:$4 sm:$0xff] (!%p194_p3)   ;;  %v966_v2 = vmov (!%p194_p3), 0   ;;  %v312_v25 = vlaneseq (!%p194_p3) }
   0x7   : > { %197 = sbr.rel (%p194_p3) target bundleno = 284 (0x11c), region = 32  ;;  %482 = vmatprep.mubr.bf16.mxu0 (!%p194_p3), %v966_v2  ;;  %522 = vmatprep.mubr.bf16.mxu1 (!%p194_p3), %v966_v2  ;;  %p240_p4 = scmp.lt.s32.totalorder (!%p194_p3), %s805_s18, 63  ;;  %v913_v3 = vld [vmem:[%s1148_s1 + $0x14] ss:$8 sps:$4 sm:$0xff] (!%p194_p3)   ;;  %v915_v4 = vld [vmem:[%s1148_s1 + $0x10] ss:$8 sps:$4 sm:$0xff] (!%p194_p3)  }
   0x8   : > { %450 = vmatprep.subr.bf16.mxu0 (!%p194_p3), %v910_v0  ;;  %869 = vmatprep.subr.bf16.mxu1 (!%p194_p3), %v910_v0  ;;  %v916_v5 = vld [vmem:[%s1148_s1 + $0x24] ss:$8 sps:$4 sm:$0xff] (!%p194_p3)   ;;  %v918_v6 = vld [vmem:[%s1148_s1 + $0x20] ss:$8 sps:$4 sm:$0xff] (!%p194_p3)   ;;  %v919_v7 = vld [vmem:[%s1148_s1 + $0x34] ss:$8 sps:$4 sm:$0xff] (!%p194_p3)  }
   0x9   : > { %451 = vmatpush1.bf16.msra.mxu0 (!%p194_p3), %v912_v1  ;;  %877 = vmatpush1.bf16.msra.mxu1 (!%p194_p3), %v912_v1  ;;  %v921_v8 = vld [vmem:[%s1148_s1 + $0x30] ss:$8 sps:$4 sm:$0xff] (!%p194_p3)   ;;  %v922_v9 = vld [vmem:[%s1148_s1 + $0x44] ss:$8 sps:$4 sm:$0xff] (!%p194_p3)   ;;  %v924_v10 = vld [vmem:[%s1148_s1 + $0x40] ss:$8 sps:$4 sm:$0xff] (!%p194_p3)  }
   0xa   : > { %452 = vmatprep.subr.bf16.mxu0 (!%p194_p3), %v913_v3  ;;  %870 = vmatprep.subr.bf16.mxu1 (!%p194_p3), %v913_v3  ;;  %v925_v11 = vld [vmem:[%s1148_s1 + $0x54] ss:$8 sps:$4 sm:$0xff] (!%p194_p3)   ;;  %v927_v12 = vld [vmem:[%s1148_s1 + $0x50] ss:$8 sps:$4 sm:$0xff] (!%p194_p3)   ;;  %v928_v13 = vld [vmem:[%s1148_s1 + $0x64] ss:$8 sps:$4 sm:$0xff] (!%p194_p3)  }
   0xb   : > { %v930_v14 = vld [vmem:[%s1148_s1 + $0x60] ss:$8 sps:$4 sm:$0xff] (!%p194_p3)   ;;  %v931_v15 = vld [vmem:[%s1148_s1 + $0x74] ss:$8 sps:$4 sm:$0xff] (!%p194_p3)   ;;  %v933_v16 = vld [vmem:[%s1148_s1 + $0x70] ss:$8 sps:$4 sm:$0xff] (!%p194_p3)  }
   0xc   : > { %v313_v26 = vshrl.u32 (!%p194_p3), %v312_v25, 7  ;;  %v310_v28 = vld [vmem:[%s1149_s2] sm:$0x3] (!%p194_p3) }
   0xd   : > { %453 = vmatpush1.bf16.msra.mxu0 (!%p194_p3), %v915_v4  ;;  %878 = vmatpush1.bf16.msra.mxu1 (!%p194_p3), %v915_v4 }
   0xe   : > { %s1156_s18 = smov (!%p240_p4, %s805_s18), 63  ;;  %454 = vmatprep.subr.bf16.mxu0 %v916_v5  ;;  %871 = vmatprep.subr.bf16.mxu1 %v916_v5  ;;  %v314_v27 = vsub.s32 0, %v313_v26  ;;  %v318_v29 = vsub.s32 1, %v313_v26 }
   0xf   : > { %s806_s27 = sshll.u32 %s1156_s18, 2  ;;  %s852_s5 = sshll.u32 %s1156_s18, 3 }
  0x10   : > { %s1034_s7 = scalar_lea.vmem %s1147_s0, %s806_s27  ;;  %v1080_v30 = vrot.slane %v310_v28, %v314_v27  ;;  %v1082_v31 = vrot.slane %v310_v28, %v318_v29  ;;  %s1092_s8 = scalar_lea.vmem %s1150_s3, %s852_s5 }
  0x11   : > { %455 = vmatpush1.bf16.msra.mxu0 %v918_v6  ;;  %879 = vmatpush1.bf16.msra.mxu1 %v918_v6  ;;  %v934_v17 = vld [vmem:[%s1034_s7] sm:$0xff]   ;;  %v936_v19 = vld [vmem:[%s1034_s7 + $0x8] sm:$0xff]   ;;  %v938_v21 = vld [vmem:[%s1034_s7 + $0x10] sm:$0xff]  }
  0x12   : > { %456 = vmatprep.subr.bf16.mxu0 %v919_v7  ;;  %872 = vmatprep.subr.bf16.mxu1 %v919_v7  ;;  %v935_v18 = vld [vmem:[%s1034_s7 + $0x20] sm:$0xff]   ;;  %v937_v20 = vld [vmem:[%s1034_s7 + $0x28] sm:$0xff]   ;;  %v939_v22 = vld [vmem:[%s1034_s7 + $0x30] sm:$0xff]  }
  0x13   : > { %v940_v23 = vld [vmem:[%s1034_s7 + $0x18] sm:$0xff]  }
  0x14   : > { %v941_v24 = vld [vmem:[%s1034_s7 + $0x38] sm:$0xff]  }
  0x15   : > { %457 = vmatpush1.bf16.msra.mxu0 %v921_v8  ;;  %880 = vmatpush1.bf16.msra.mxu1 %v921_v8 }
  0x16   : > { %458 = vmatprep.subr.bf16.mxu0 %v922_v9  ;;  %873 = vmatprep.subr.bf16.mxu1 %v922_v9 }
  0x19   : > { %459 = vmatpush1.bf16.msra.mxu0 %v924_v10  ;;  %881 = vmatpush1.bf16.msra.mxu1 %v924_v10 }
  0x1a   : > { %460 = vmatprep.subr.bf16.mxu0 %v925_v11  ;;  %874 = vmatprep.subr.bf16.mxu1 %v925_v11 }
  0x1d   : > { %461 = vmatpush1.bf16.msra.mxu0 %v927_v12  ;;  %882 = vmatpush1.bf16.msra.mxu1 %v927_v12 }
  0x1e   : > { %462 = vmatprep.subr.bf16.mxu0 %v928_v13  ;;  %875 = vmatprep.subr.bf16.mxu1 %v928_v13 }
  0x21   : > { %463 = vmatpush1.bf16.msra.mxu0 %v930_v14  ;;  %883 = vmatpush1.bf16.msra.mxu1 %v930_v14 }
  0x22   : > { %464 = vmatprep.subr.bf16.mxu0 %v931_v15  ;;  %876 = vmatprep.subr.bf16.mxu1 %v931_v15 }
  0x25   : > { %465 = vmatpush1.bf16.msra.mxu0 %v933_v16  ;;  %884 = vmatpush1.bf16.msra.mxu1 %v933_v16 }
  0x28   : > { %483 = vmatmul.mubr.bf16.vlgmr.msra.gmra.mrb[0].mxu0 %v934_v17  ;;  %523 = vmatmul.mubr.bf16.vlgmr.msra.gmra.mrb[0].mxu1 %v935_v18 }
  0x29   : > { %492 = vmatprep.mubr.bf16.mxu0 %v966_v2  ;;  %532 = vmatprep.mubr.bf16.mxu1 %v966_v2 }
  0x30   : > { %493 = vmatmul.mubr.bf16.gmra.mrb[4].mxu0 %v936_v19  ;;  %533 = vmatmul.mubr.bf16.gmra.mrb[4].mxu1 %v937_v20 }
  0x31   : > { %502 = vmatprep.mubr.bf16.mxu0 %v966_v2  ;;  %542 = vmatprep.mubr.bf16.mxu1 %v966_v2 }
  0x38   : > { %503 = vmatmul.mubr.bf16.gmra.mrb[8].mxu0 %v938_v21  ;;  %543 = vmatmul.mubr.bf16.gmra.mrb[8].mxu1 %v939_v22 }
  0x39   : > { %512 = vmatprep.mubr.bf16.mxu0 %v966_v2  ;;  %552 = vmatprep.mubr.bf16.mxu1 %v966_v2 }
  0x40   : > { %513 = vmatmul.mubr.bf16.gmra.mrb[12].mxu0 %v940_v23  ;;  %553 = vmatmul.mubr.bf16.gmra.mrb[12].mxu1 %v941_v24 }
  0xfb   : > { %v484_v32 = vpop.f32.mrb[0].mxu0  ;;  %v524_v33 = vpop.f32.mrb[0].mxu1 }
  0xfc   : > { %v485_v34 = vadd.f32 %v484_v32, %v1080_v30  ;;  %v525_v35 = vadd.f32 %v524_v33, %v1080_v30  ;;  %v486_v36 = vpop.f32.mrb[1].mxu0  ;;  %v526_v37 = vpop.f32.mrb[1].mxu1 }
  0xfd   : > { %v487_v38 = vadd.f32 %v486_v36, %v1082_v31  ;;  %v527_v39 = vadd.f32 %v526_v37, %v1082_v31  ;;  %v488_v40 = vpop.f32.mrb[2].mxu0  ;;  %v528_v41 = vpop.f32.mrb[2].mxu1 }
  0xfe   : > { %v489_v42 = vadd.f32 %v488_v40, %v1080_v30  ;;  %v529_v43 = vadd.f32 %v528_v41, %v1080_v30  ;;  %v490_v44 = vpop.f32.mrb[3].mxu0  ;;  %v530_v45 = vpop.f32.mrb[3].mxu1 }
  0xff   : > { %v853_v46 = vpack.c.bf16 %v487_v38, %v485_v34  ;;  %v861_v47 = vpack.c.bf16 %v527_v39, %v525_v35  ;;  %v491_v48 = vadd.f32 %v490_v44, %v1082_v31  ;;  %v531_v49 = vadd.f32 %v530_v45, %v1082_v31 }
 0x101   : > { %659 = vst [vmem:[%s1092_s8] sm:$0xff] %v853_v46  ;;  %667 = vst [vmem:[%s1092_s8 + $0x40] sm:$0xff] %v861_v47  ;;  %v854_v50 = vpack.c.bf16 %v491_v48, %v489_v42  ;;  %v862_v51 = vpack.c.bf16 %v531_v49, %v529_v43 }
 0x103   : > { %660 = vst [vmem:[%s1092_s8 + $0x8] sm:$0xff] %v854_v50  ;;  %668 = vst [vmem:[%s1092_s8 + $0x48] sm:$0xff] %v862_v51  ;;  %v494_v52 = vpop.f32.mrb[4].mxu0  ;;  %v534_v53 = vpop.f32.mrb[4].mxu1 }
 0x104   : > { %v495_v54 = vadd.f32 %v494_v52, %v1080_v30  ;;  %v535_v55 = vadd.f32 %v534_v53, %v1080_v30  ;;  %v496_v56 = vpop.f32.mrb[5].mxu0  ;;  %v536_v57 = vpop.f32.mrb[5].mxu1 }
 0x105   : > { %v497_v58 = vadd.f32 %v496_v56, %v1082_v31  ;;  %v537_v59 = vadd.f32 %v536_v57, %v1082_v31  ;;  %v498_v60 = vpop.f32.mrb[6].mxu0  ;;  %v538_v61 = vpop.f32.mrb[6].mxu1 }
 0x106   : > { %v499_v62 = vadd.f32 %v498_v60, %v1080_v30  ;;  %v539_v63 = vadd.f32 %v538_v61, %v1080_v30  ;;  %v500_v0 = vpop.f32.mrb[7].mxu0  ;;  %v540_v1 = vpop.f32.mrb[7].mxu1 }
 0x107   : > { %v855_v2 = vpack.c.bf16 %v497_v58, %v495_v54  ;;  %v863_v3 = vpack.c.bf16 %v537_v59, %v535_v55  ;;  %v501_v4 = vadd.f32 %v500_v0, %v1082_v31  ;;  %v541_v5 = vadd.f32 %v540_v1, %v1082_v31 }
 0x109   : > { %661 = vst [vmem:[%s1092_s8 + $0x10] sm:$0xff] %v855_v2  ;;  %669 = vst [vmem:[%s1092_s8 + $0x50] sm:$0xff] %v863_v3  ;;  %v856_v6 = vpack.c.bf16 %v501_v4, %v499_v62  ;;  %v864_v7 = vpack.c.bf16 %v541_v5, %v539_v63 }
 0x10b   : > { %662 = vst [vmem:[%s1092_s8 + $0x18] sm:$0xff] %v856_v6  ;;  %670 = vst [vmem:[%s1092_s8 + $0x58] sm:$0xff] %v864_v7  ;;  %v504_v8 = vpop.f32.mrb[8].mxu0  ;;  %v544_v9 = vpop.f32.mrb[8].mxu1 }
 0x10c   : > { %v505_v10 = vadd.f32 %v504_v8, %v1080_v30  ;;  %v545_v11 = vadd.f32 %v544_v9, %v1080_v30  ;;  %v506_v12 = vpop.f32.mrb[9].mxu0  ;;  %v546_v13 = vpop.f32.mrb[9].mxu1 }
 0x10d   : > { %v507_v14 = vadd.f32 %v506_v12, %v1082_v31  ;;  %v547_v15 = vadd.f32 %v546_v13, %v1082_v31  ;;  %v508_v16 = vpop.f32.mrb[10].mxu0  ;;  %v548_v17 = vpop.f32.mrb[10].mxu1 }
 0x10e   : > { %v509_v18 = vadd.f32 %v508_v16, %v1080_v30  ;;  %v549_v19 = vadd.f32 %v548_v17, %v1080_v30  ;;  %v510_v20 = vpop.f32.mrb[11].mxu0  ;;  %v550_v21 = vpop.f32.mrb[11].mxu1 }
 0x10f   : > { %v857_v22 = vpack.c.bf16 %v507_v14, %v505_v10  ;;  %v865_v23 = vpack.c.bf16 %v547_v15, %v545_v11  ;;  %v511_v24 = vadd.f32 %v510_v20, %v1082_v31  ;;  %v551_v25 = vadd.f32 %v550_v21, %v1082_v31 }
 0x111   : > { %663 = vst [vmem:[%s1092_s8 + $0x20] sm:$0xff] %v857_v22  ;;  %671 = vst [vmem:[%s1092_s8 + $0x60] sm:$0xff] %v865_v23  ;;  %v858_v26 = vpack.c.bf16 %v511_v24, %v509_v18  ;;  %v866_v27 = vpack.c.bf16 %v551_v25, %v549_v19 }
 0x113   : > { %664 = vst [vmem:[%s1092_s8 + $0x28] sm:$0xff] %v858_v26  ;;  %672 = vst [vmem:[%s1092_s8 + $0x68] sm:$0xff] %v866_v27  ;;  %v514_v28 = vpop.f32.mrb[12].mxu0  ;;  %v554_v29 = vpop.f32.mrb[12].mxu1 }
 0x114   : > { %v515_v32 = vadd.f32 %v514_v28, %v1080_v30  ;;  %v555_v33 = vadd.f32 %v554_v29, %v1080_v30  ;;  %v516_v34 = vpop.f32.mrb[13].mxu0  ;;  %v556_v35 = vpop.f32.mrb[13].mxu1 }
 0x115   : > { %v517_v36 = vadd.f32 %v516_v34, %v1082_v31  ;;  %v557_v37 = vadd.f32 %v556_v35, %v1082_v31  ;;  %v518_v38 = vpop.f32.mrb[14].mxu0  ;;  %v558_v39 = vpop.f32.mrb[14].mxu1 }
 0x116   : > { %v519_v40 = vadd.f32 %v518_v38, %v1080_v30  ;;  %v559_v41 = vadd.f32 %v558_v39, %v1080_v30  ;;  %v520_v42 = vpop.f32.mrb[15].mxu0  ;;  %v560_v43 = vpop.f32.mrb[15].mxu1 }
 0x117   : > { %v859_v44 = vpack.c.bf16 %v517_v36, %v515_v32  ;;  %v867_v45 = vpack.c.bf16 %v557_v37, %v555_v33  ;;  %v521_v46 = vadd.f32 %v520_v42, %v1082_v31  ;;  %v561_v47 = vadd.f32 %v560_v43, %v1082_v31 }
 0x119   : > { %665 = vst [vmem:[%s1092_s8 + $0x30] sm:$0xff] %v859_v44  ;;  %673 = vst [vmem:[%s1092_s8 + $0x70] sm:$0xff] %v867_v45  ;;  %v860_v48 = vpack.c.bf16 %v521_v46, %v519_v40  ;;  %v868_v49 = vpack.c.bf16 %v561_v47, %v559_v41 }
 0x11b   : > { %666 = vst [vmem:[%s1092_s8 + $0x38] sm:$0xff] %v860_v48  ;;  %674 = vst [vmem:[%s1092_s8 + $0x78] sm:$0xff] %v868_v49 }
 0x11c PF: > { %s13_s14 = sadd.s32 1, %s964_s14   ;;  %s1151_s12 = smov %s960_s13 }
 0x11d   : > { %p10_p5 = scmp.ge.s32.totalorder %s13_s14, 6   ;;  %s1152_s13 = smov %s1154_s15 }
 0x11f   :  { %12 = sbr.rel (!%p10_p5) target bundleno = 2 (0x2), region = 68 }

</bundles_post_ra>
